<compile_context>
chip_gen: v5e
topology: v5e:2x2
jax: 0.10.0
libtpu: 0.0.40
codegen_flags: <defaults>
</compile_context>

<pallas_src>
import functools

import jax
import jax.numpy as jnp
from jax.experimental import pallas as pl
from jax.experimental.pallas import tpu as pltpu

_VMEM_LIMIT = 32 * 1024 * 1024   # explicit scoped-VMEM guard (valid v5e/v6e/v7x)


# ----------------------------------------------------------------------------
# Pallas kernel 1: fused Linear  (Z @ W) + bias   (bf16 in, f32 accumulate)
# ----------------------------------------------------------------------------
def _linear_kernel(z_ref, w_ref, b_ref, o_ref):
    y = jnp.dot(z_ref[...], w_ref[...], preferred_element_type=jnp.float32)
    o_ref[...] = (y + b_ref[...]).astype(o_ref.dtype)


def linear_fused(z, w, b, out_dtype, tile_n=256):
    """z:(M,K) bf16, w:(K,N) bf16, b:(1,N) f32 -> (M,N).

    Tiled over the output-feature axis (multiples of 128 -> lane-dense blocks)
    so the grid has >= 2 'parallel' steps and both v7x TensorCores are used."""
    m, k = z.shape
    _, nfeat = w.shape
    tn = min(tile_n, nfeat)
    if tn != nfeat:
        tn = max(128, (tn // 128) * 128)
    return pl.pallas_call(
        _linear_kernel,
        out_shape=jax.ShapeDtypeStruct((m, nfeat), out_dtype),
        grid=(pl.cdiv(nfeat, tn),),
        in_specs=[
            pl.BlockSpec((m, k), lambda j: (0, 0)),
            pl.BlockSpec((k, tn), lambda j: (0, j)),
            pl.BlockSpec((1, tn), lambda j: (0, j)),
        ],
        out_specs=pl.BlockSpec((m, tn), lambda j: (0, j)),
        compiler_params=pltpu.CompilerParams(
            dimension_semantics=("parallel",),
            vmem_limit_bytes=_VMEM_LIMIT),
    )(z, w, b)


# ----------------------------------------------------------------------------
# Pallas kernel 2: fused [3x3 conv (s1, p1) on a 2x-upsampled map] + folded
#                  eval-BN + bias + activation, with in-kernel tap formation.
#
# Input layout: the upsampled map, zero-padded by 1 in H and W, flattened
# row-major to (Rp, Cin) with one extra zero guard row at each end:
#     Rp = (Hu+2)*(Wu+2) + 2 ,   x_flat[1 + hp*(Wu+2) + wp] = x_pad[hp, wp]
# The kernel computes the "extended" output y_ext[i, we], i in [0,Hu),
# we in [0,Wu+2), flattened to Me = Hu*(Wu+2) rows.  Conv tap (kh,kw) of
# extended row p is exactly x_flat row  p + kh*(Wu+2) + kw  -- a contiguous
# slice -- so the conv is 9 shifted sub-matmuls, no im2col materialization.
# Columns we == 0 and we == Wu+1 are garbage and dropped in glue.
# ----------------------------------------------------------------------------
def _conv3x3_kernel(x_ref, w_ref, b_ref, o_ref, *, wu2, cin, activation, chunk):
    me = o_ref.shape[1]
    for m0 in range(0, me, chunk):            # static loop; bounds acc pressure
        mt = min(chunk, me - m0)
        acc = None
        for kh in range(3):
            for kw in range(3):
                off = m0 + kh * wu2 + kw
                tap = x_ref[0, off:off + mt, :]                          # (mt,Cin)
                wk = w_ref[(kh * 3 + kw) * cin:(kh * 3 + kw + 1) * cin, :]
                d = jnp.dot(tap, wk, preferred_element_type=jnp.float32)
                acc = d if acc is None else acc + d
        y = acc + b_ref[...]                                             # (mt,Cout)
        if activation == "leaky_relu":
            y = jnp.where(y >= 0.0, y, 0.2 * y)
        elif activation == "tanh":
            y = jnp.tanh(y)
        o_ref[0, m0:m0 + mt, :] = y.astype(o_ref.dtype)


def _upsample_pad_flatten(x_nhwc):
    """(N,H,W,C) -> (N, (2H+2)*(2W+2)+2, C): nearest x2 upsample, zero-pad H/W
    by 1, row-major flatten, add one zero guard row at each end.  Cheap XLA glue
    (~5x of the tiny pre-upsample map) replacing the old ~36x im2col traffic."""
    n, h, w, c = x_nhwc.shape
    xu = jnp.broadcast_to(x_nhwc[:, :, None, :, None, :], (n, h, 2, w, 2, c))
    xu = xu.reshape(n, 2 * h, 2 * w, c)
    xp = jnp.pad(xu, ((0, 0), (1, 1), (1, 1), (0, 0)))
    xf = xp.reshape(n, (2 * h + 2) * (2 * w + 2), c)
    return jnp.pad(xf, ((0, 0), (1, 1), (0, 0)))


def upconv3x3_fused(x_nhwc, w_mat, bias, activation, out_dtype, chunk=1024):
    """Upsample(x2) -> 3x3/s1/p1 conv (eval-BN pre-folded into w_mat/bias) ->
    bias -> activation.  One Pallas call, grid over the batch ('parallel')."""
    n, h, w, cin = x_nhwc.shape
    hu, wu = 2 * h, 2 * w
    wu2 = wu + 2
    me = hu * wu2
    rp = (hu + 2) * wu2 + 2
    cout = w_mat.shape[1]
    chunk = min(chunk, me)

    xf = _upsample_pad_flatten(x_nhwc).astype(jnp.bfloat16)
    y = pl.pallas_call(
        functools.partial(_conv3x3_kernel, wu2=wu2, cin=cin,
                          activation=activation, chunk=chunk),
        out_shape=jax.ShapeDtypeStruct((n, me, cout), out_dtype),
        grid=(n,),
        in_specs=[
            pl.BlockSpec((1, rp, cin), lambda i: (i, 0, 0)),
            pl.BlockSpec((9 * cin, cout), lambda i: (0, 0)),   # constant blocks
            pl.BlockSpec((1, cout), lambda i: (0, 0)),
        ],
        out_specs=pl.BlockSpec((1, me, cout), lambda i: (i, 0, 0)),
        compiler_params=pltpu.CompilerParams(
            dimension_semantics=("parallel",),        # batch across the 2 v7x TCs
            vmem_limit_bytes=_VMEM_LIMIT),
    )(xf, w_mat, bias)
    # (N, Hu, Wu+2, Cout): drop the 2 garbage border columns of the extended grid
    return y.reshape(n, hu, wu2, cout)[:, :, 1:1 + wu, :]


# ----------------------------------------------------------------------------
# Parameters (spectral norm, eval-BN folds, NHWC permutation done once at init)
# ----------------------------------------------------------------------------
def spectral_normalize(w, key, n_iter=5):
    """w: conv weight (Cout, Cin, Kh, Kw); divide by top singular value."""
    w_mat = w.reshape(w.shape[0], -1)
    u = jax.random.normal(key, (w_mat.shape[0],), dtype=jnp.float32)
    u = u / (jnp.linalg.norm(u) + 1e-12)
    v = None
    for _ in range(n_iter):
        v = w_mat.T @ u
        v = v / (jnp.linalg.norm(v) + 1e-12)
        u = w_mat @ v
        u = u / (jnp.linalg.norm(u) + 1e-12)
    sigma = u @ (w_mat @ v)
    return w / sigma


def _fold_conv(w_oihw, bias, bn_scale):
    """(Cout,Cin,3,3) -> (9*Cin, Cout) matmul weight in tap order (kh,kw,cin),
    eval-mode BN scale folded in (shift is 0 for fresh running stats)."""
    cout, cin = w_oihw.shape[0], w_oihw.shape[1]
    w_mat = jnp.transpose(w_oihw, (2, 3, 1, 0)).reshape(9 * cin, cout)
    w_mat = w_mat * bn_scale[None, :]
    b = (bias * bn_scale).reshape(1, cout)
    return w_mat.astype(jnp.bfloat16), b.astype(jnp.float32)


def make_params(latent_dim, img_shape, key):
    init = img_shape // 8
    ks = jax.random.split(key, 11)

    # --- l1: Linear(latent, 128 * init^2) ---
    lin_out = 128 * init * init
    wl = jax.random.normal(ks[0], (lin_out, latent_dim), jnp.float32) / jnp.sqrt(latent_dim)
    bl = 0.01 * jax.random.normal(ks[1], (lin_out,), jnp.float32)
    # Permute output features once so the linear result is already NHWC-flat
    # (h, w, c): no runtime NCHW -> NHWC shuffle of the feature map.
    perm = jnp.transpose(jnp.arange(lin_out).reshape(128, init, init),
                         (1, 2, 0)).reshape(-1)
    wl, bl = wl[perm], bl[perm]
    # Fold eval-mode BatchNorm2d(128) (eps=1e-5, fresh stats): scale = 1/sqrt(1+eps)
    bn0 = jnp.float32(1.0 / jnp.sqrt(1.0 + 1e-5))
    wl, bl = wl * bn0, bl * bn0

    def conv_w(k, cout, cin):
        return jax.random.normal(k, (cout, cin, 3, 3), jnp.float32) / jnp.sqrt(cin * 9)

    w1 = spectral_normalize(conv_w(ks[2], 128, 128), ks[3])
    b1 = 0.01 * jax.random.normal(ks[4], (128,), jnp.float32)
    w2 = spectral_normalize(conv_w(ks[5], 64, 128), ks[6])
    b2 = 0.01 * jax.random.normal(ks[7], (64,), jnp.float32)
    w3 = spectral_normalize(conv_w(ks[8], 3, 64), ks[9])
    b3 = 0.01 * jax.random.normal(ks[10], (3,), jnp.float32)

    # eval-mode BatchNorm2d(C, eps=0.8): scale = 1/sqrt(1 + 0.8), shift = 0
    bn = jnp.float32(1.0 / jnp.sqrt(1.0 + 0.8))

    p = {}
    p["wl_t"] = wl.T.astype(jnp.bfloat16)                # (latent, 128*init^2)
    p["bl"] = bl.reshape(1, -1).astype(jnp.float32)
    p["w1m"], p["b1"] = _fold_conv(w1, b1, jnp.full((128,), bn, jnp.float32))
    p["w2m"], p["b2"] = _fold_conv(w2, b2, jnp.full((64,), bn, jnp.float32))
    p["w3m"], p["b3"] = _fold_conv(w3, b3, jnp.ones((3,), jnp.float32))
    return p


# ----------------------------------------------------------------------------
# Forward
# ----------------------------------------------------------------------------
def generator_forward(z, p):
    """z: (N, latent_dim) f32 -> img: (N, 3, img_shape, img_shape) f32 in [-1, 1]."""
    n = z.shape[0]

    # l1 (+ folded BatchNorm2d(128)); output already in NHWC-flatten order.
    x = linear_fused(z.astype(jnp.bfloat16), p["wl_t"], p["bl"], jnp.bfloat16)
    init = int(round((x.shape[1] // 128) ** 0.5))
    x = x.reshape(n, init, init, 128)                    # NHWC

    # Block 1: Upsample -> SN-Conv(128->128) -> BN(128, 0.8) -> LeakyReLU(0.2)
    x = upconv3x3_fused(x, p["w1m"], p["b1"], "leaky_relu", jnp.bfloat16)
    # Block 2: Upsample -> SN-Conv(128->64) -> BN(64, 0.8) -> LeakyReLU(0.2)
    #   (kept at 64 channels: zero-padding to 128 would double conv3's K/FLOPs)
    x = upconv3x3_fused(x, p["w2m"], p["b2"], "leaky_relu", jnp.bfloat16)
    # Block 3: Upsample -> SN-Conv(64->3) -> Tanh
    #   (Cout=3 output kept unpadded: masked stores are negligible at this size)
    x = upconv3x3_fused(x, p["w3m"], p["b3"], "tanh", jnp.float32)

    return jnp.transpose(x, (0, 3, 1, 2))                # NHWC -> NCHW


if __name__ == "__main__":
    key = jax.random.PRNGKey(0)
    k_z, k_par = jax.random.split(key)

    batch, latent_dim, img_shape = 2, 32, 16
    z = jax.random.normal(k_z, (batch, latent_dim), jnp.float32)

    params = make_params(latent_dim, img_shape, k_par)
    fwd = jax.jit(generator_forward)
    img = jax.block_until_ready(fwd(z, params))

    assert img.shape == (batch, 3, img_shape, img_shape)
    assert bool(jnp.all(jnp.isfinite(img)))
    assert bool(jnp.all(jnp.abs(img) <= 1.0))   # tanh output range
    print("KERNEL_OK")
</pallas_src>

<mosaic_0001>
module attributes {stable_mosaic.version = 11 : i64} {
  func.func @_linear_kernel(%arg0: i32, %arg1: memref<2x32xbf16, #tpu.memory_space<vmem>>, %arg2: memref<32x256xbf16, #tpu.memory_space<vmem>>, %arg3: memref<1x256xf32, #tpu.memory_space<vmem>>, %arg4: memref<2x256xbf16, #tpu.memory_space<vmem>>) attributes {dimension_semantics = [#tpu.dimension_semantics<parallel>], iteration_bounds = array<i64: 2>, scalar_prefetch = 0 : i64, scratch_operands = 0 : i64, tpu.core_type = #tpu.core_type<tc>, window_params = [{pipeline_mode = #tpu.pipeline_mode<synchronous>, transform_indices = @transform_0, window_bounds = array<i64: 2, 32>}, {transform_indices = @transform_1, window_bounds = array<i64: 32, 256>}, {transform_indices = @transform_2, window_bounds = array<i64: 1, 256>}, {transform_indices = @transform_3, window_bounds = array<i64: 2, 256>}]} {
    %c0 = arith.constant 0 : index
    %c0_0 = arith.constant 0 : index
    %0 = vector.load %arg1[%c0, %c0_0] : memref<2x32xbf16, #tpu.memory_space<vmem>>, vector<2x32xbf16>
    %c0_1 = arith.constant 0 : index
    %c0_2 = arith.constant 0 : index
    %1 = vector.load %arg2[%c0_1, %c0_2] : memref<32x256xbf16, #tpu.memory_space<vmem>>, vector<32x256xbf16>
    %cst = arith.constant dense<0.000000e+00> : vector<2x256xf32>
    %2 = tpu.matmul %0, %1, %cst {dimension_numbers = #tpu.dot_dimension_numbers<[1], [0], [0], [1], [0, 0, 1, 1], [], []>} : vector<2x32xbf16>, vector<32x256xbf16>, vector<2x256xf32> -> vector<2x256xf32>
    %c0_3 = arith.constant 0 : index
    %c0_4 = arith.constant 0 : index
    %3 = vector.load %arg3[%c0_3, %c0_4] : memref<1x256xf32, #tpu.memory_space<vmem>>, vector<1x256xf32>
    %4 = vector.broadcast %3 : vector<1x256xf32> to vector<2x256xf32>
    %5 = arith.addf %2, %4 : vector<2x256xf32>
    %6 = arith.truncf %5 : vector<2x256xf32> to vector<2x256xbf16>
    %c0_5 = arith.constant 0 : index
    %c0_6 = arith.constant 0 : index
    %7 = vector.load %arg4[%c0_5, %c0_6] : memref<2x256xbf16, #tpu.memory_space<vmem>>, vector<2x256xbf16>
    tpu.vector_store %arg4[%c0_5, %c0_6], %6 {strides = array<i32>} : memref<2x256xbf16, #tpu.memory_space<vmem>>, vector<2x256xbf16>,
    return
  }
  func.func @transform_0(%arg0: i32) -> (i32, i32) {
    %c0_i32 = arith.constant 0 : i32
    %c0_i32_0 = arith.constant 0 : i32
    %c0_i32_1 = arith.constant 0 : i32
    return %c0_i32, %c0_i32_0 : i32, i32
  }
  func.func @transform_1(%arg0: i32) -> (i32, i32) {
    %c0_i32 = arith.constant 0 : i32
    %c0_i32_0 = arith.constant 0 : i32
    return %c0_i32, %arg0 : i32, i32
  }
  func.func @transform_2(%arg0: i32) -> (i32, i32) {
    %c0_i32 = arith.constant 0 : i32
    %c0_i32_0 = arith.constant 0 : i32
    return %c0_i32, %arg0 : i32, i32
  }
  func.func @transform_3(%arg0: i32) -> (i32, i32) {
    %c0_i32 = arith.constant 0 : i32
    %c0_i32_0 = arith.constant 0 : i32
    return %c0_i32, %arg0 : i32, i32
  }
}

module attributes {stable_mosaic.version = 11 : i64} {
  func.func @_conv3x3_kernel(%arg0: i32, %arg1: memref<1x38x128xbf16, #tpu.memory_space<vmem>>, %arg2: memref<1152x128xbf16, #tpu.memory_space<vmem>>, %arg3: memref<1x128xf32, #tpu.memory_space<vmem>>, %arg4: memref<1x24x128xbf16, #tpu.memory_space<vmem>>) attributes {dimension_semantics = [#tpu.dimension_semantics<parallel>], iteration_bounds = array<i64: 2>, scalar_prefetch = 0 : i64, scratch_operands = 0 : i64, tpu.core_type = #tpu.core_type<tc>, window_params = [{transform_indices = @transform_0, window_bounds = array<i64: 1, 38, 128>}, {pipeline_mode = #tpu.pipeline_mode<synchronous>, transform_indices = @transform_1, window_bounds = array<i64: 1152, 128>}, {pipeline_mode = #tpu.pipeline_mode<synchronous>, transform_indices = @transform_2, window_bounds = array<i64: 1, 128>}, {transform_indices = @transform_3, window_bounds = array<i64: 1, 24, 128>}]} {
    %c0 = arith.constant 0 : index
    %c0_0 = arith.constant 0 : index
    %c0_1 = arith.constant 0 : index
    %0 = vector.load %arg1[%c0, %c0_0, %c0_1] : memref<1x38x128xbf16, #tpu.memory_space<vmem>>, vector<1x24x128xbf16>
    %1 = vector.shape_cast %0 : vector<1x24x128xbf16> to vector<24x128xbf16>
    %c0_2 = arith.constant 0 : index
    %c0_3 = arith.constant 0 : index
    %2 = vector.load %arg2[%c0_2, %c0_3] : memref<1152x128xbf16, #tpu.memory_space<vmem>>, vector<128x128xbf16>
    %cst = arith.constant dense<0.000000e+00> : vector<24x128xf32>
    %3 = tpu.matmul %1, %2, %cst {dimension_numbers = #tpu.dot_dimension_numbers<[1], [0], [0], [1], [0, 0, 1, 1], [], []>} : vector<24x128xbf16>, vector<128x128xbf16>, vector<24x128xf32> -> vector<24x128xf32>
    %c0_4 = arith.constant 0 : index
    %c1 = arith.constant 1 : index
    %c0_5 = arith.constant 0 : index
    %4 = vector.load %arg1[%c0_4, %c1, %c0_5] : memref<1x38x128xbf16, #tpu.memory_space<vmem>>, vector<1x24x128xbf16>
    %5 = vector.shape_cast %4 : vector<1x24x128xbf16> to vector<24x128xbf16>
    %c128 = arith.constant 128 : index
    %c0_6 = arith.constant 0 : index
    %6 = vector.load %arg2[%c128, %c0_6] : memref<1152x128xbf16, #tpu.memory_space<vmem>>, vector<128x128xbf16>
    %cst_7 = arith.constant dense<0.000000e+00> : vector<24x128xf32>
    %7 = tpu.matmul %5, %6, %cst_7 {dimension_numbers = #tpu.dot_dimension_numbers<[1], [0], [0], [1], [0, 0, 1, 1], [], []>} : vector<24x128xbf16>, vector<128x128xbf16>, vector<24x128xf32> -> vector<24x128xf32>
    %8 = arith.addf %3, %7 : vector<24x128xf32>
    %c0_8 = arith.constant 0 : index
    %c2 = arith.constant 2 : index
    %c0_9 = arith.constant 0 : index
    %9 = vector.load %arg1[%c0_8, %c2, %c0_9] : memref<1x38x128xbf16, #tpu.memory_space<vmem>>, vector<1x24x128xbf16>
    %10 = vector.shape_cast %9 : vector<1x24x128xbf16> to vector<24x128xbf16>
    %c256 = arith.constant 256 : index
    %c0_10 = arith.constant 0 : index
    %11 = vector.load %arg2[%c256, %c0_10] : memref<1152x128xbf16, #tpu.memory_space<vmem>>, vector<128x128xbf16>
    %cst_11 = arith.constant dense<0.000000e+00> : vector<24x128xf32>
    %12 = tpu.matmul %10, %11, %cst_11 {dimension_numbers = #tpu.dot_dimension_numbers<[1], [0], [0], [1], [0, 0, 1, 1], [], []>} : vector<24x128xbf16>, vector<128x128xbf16>, vector<24x128xf32> -> vector<24x128xf32>
    %13 = arith.addf %8, %12 : vector<24x128xf32>
    %c0_12 = arith.constant 0 : index
    %c6 = arith.constant 6 : index
    %c0_13 = arith.constant 0 : index
    %14 = vector.load %arg1[%c0_12, %c6, %c0_13] : memref<1x38x128xbf16, #tpu.memory_space<vmem>>, vector<1x24x128xbf16>
    %15 = vector.shape_cast %14 : vector<1x24x128xbf16> to vector<24x128xbf16>
    %c384 = arith.constant 384 : index
    %c0_14 = arith.constant 0 : index
    %16 = vector.load %arg2[%c384, %c0_14] : memref<1152x128xbf16, #tpu.memory_space<vmem>>, vector<128x128xbf16>
    %cst_15 = arith.constant dense<0.000000e+00> : vector<24x128xf32>
    %17 = tpu.matmul %15, %16, %cst_15 {dimension_numbers = #tpu.dot_dimension_numbers<[1], [0], [0], [1], [0, 0, 1, 1], [], []>} : vector<24x128xbf16>, vector<128x128xbf16>, vector<24x128xf32> -> vector<24x128xf32>
    %18 = arith.addf %13, %17 : vector<24x128xf32>
    %c0_16 = arith.constant 0 : index
    %c7 = arith.constant 7 : index
    %c0_17 = arith.constant 0 : index
    %19 = vector.load %arg1[%c0_16, %c7, %c0_17] : memref<1x38x128xbf16, #tpu.memory_space<vmem>>, vector<1x24x128xbf16>
    %20 = vector.shape_cast %19 : vector<1x24x128xbf16> to vector<24x128xbf16>
    %c512 = arith.constant 512 : index
    %c0_18 = arith.constant 0 : index
    %21 = vector.load %arg2[%c512, %c0_18] : memref<1152x128xbf16, #tpu.memory_space<vmem>>, vector<128x128xbf16>
    %cst_19 = arith.constant dense<0.000000e+00> : vector<24x128xf32>
    %22 = tpu.matmul %20, %21, %cst_19 {dimension_numbers = #tpu.dot_dimension_numbers<[1], [0], [0], [1], [0, 0, 1, 1], [], []>} : vector<24x128xbf16>, vector<128x128xbf16>, vector<24x128xf32> -> vector<24x128xf32>
    %23 = arith.addf %18, %22 : vector<24x128xf32>
    %c0_20 = arith.constant 0 : index
    %c8 = arith.constant 8 : index
    %c0_21 = arith.constant 0 : index
    %24 = vector.load %arg1[%c0_20, %c8, %c0_21] : memref<1x38x128xbf16, #tpu.memory_space<vmem>>, vector<1x24x128xbf16>
    %25 = vector.shape_cast %24 : vector<1x24x128xbf16> to vector<24x128xbf16>
    %c640 = arith.constant 640 : index
    %c0_22 = arith.constant 0 : index
    %26 = vector.load %arg2[%c640, %c0_22] : memref<1152x128xbf16, #tpu.memory_space<vmem>>, vector<128x128xbf16>
    %cst_23 = arith.constant dense<0.000000e+00> : vector<24x128xf32>
    %27 = tpu.matmul %25, %26, %cst_23 {dimension_numbers = #tpu.dot_dimension_numbers<[1], [0], [0], [1], [0, 0, 1, 1], [], []>} : vector<24x128xbf16>, vector<128x128xbf16>, vector<24x128xf32> -> vector<24x128xf32>
    %28 = arith.addf %23, %27 : vector<24x128xf32>
    %c0_24 = arith.constant 0 : index
    %c12 = arith.constant 12 : index
    %c0_25 = arith.constant 0 : index
    %29 = vector.load %arg1[%c0_24, %c12, %c0_25] : memref<1x38x128xbf16, #tpu.memory_space<vmem>>, vector<1x24x128xbf16>
    %30 = vector.shape_cast %29 : vector<1x24x128xbf16> to vector<24x128xbf16>
    %c768 = arith.constant 768 : index
    %c0_26 = arith.constant 0 : index
    %31 = vector.load %arg2[%c768, %c0_26] : memref<1152x128xbf16, #tpu.memory_space<vmem>>, vector<128x128xbf16>
    %cst_27 = arith.constant dense<0.000000e+00> : vector<24x128xf32>
    %32 = tpu.matmul %30, %31, %cst_27 {dimension_numbers = #tpu.dot_dimension_numbers<[1], [0], [0], [1], [0, 0, 1, 1], [], []>} : vector<24x128xbf16>, vector<128x128xbf16>, vector<24x128xf32> -> vector<24x128xf32>
    %33 = arith.addf %28, %32 : vector<24x128xf32>
    %c0_28 = arith.constant 0 : index
    %c13 = arith.constant 13 : index
    %c0_29 = arith.constant 0 : index
    %34 = vector.load %arg1[%c0_28, %c13, %c0_29] : memref<1x38x128xbf16, #tpu.memory_space<vmem>>, vector<1x24x128xbf16>
    %35 = vector.shape_cast %34 : vector<1x24x128xbf16> to vector<24x128xbf16>
    %c896 = arith.constant 896 : index
    %c0_30 = arith.constant 0 : index
    %36 = vector.load %arg2[%c896, %c0_30] : memref<1152x128xbf16, #tpu.memory_space<vmem>>, vector<128x128xbf16>
    %cst_31 = arith.constant dense<0.000000e+00> : vector<24x128xf32>
    %37 = tpu.matmul %35, %36, %cst_31 {dimension_numbers = #tpu.dot_dimension_numbers<[1], [0], [0], [1], [0, 0, 1, 1], [], []>} : vector<24x128xbf16>, vector<128x128xbf16>, vector<24x128xf32> -> vector<24x128xf32>
    %38 = arith.addf %33, %37 : vector<24x128xf32>
    %c0_32 = arith.constant 0 : index
    %c14 = arith.constant 14 : index
    %c0_33 = arith.constant 0 : index
    %39 = vector.load %arg1[%c0_32, %c14, %c0_33] : memref<1x38x128xbf16, #tpu.memory_space<vmem>>, vector<1x24x128xbf16>
    %40 = vector.shape_cast %39 : vector<1x24x128xbf16> to vector<24x128xbf16>
    %c1024 = arith.constant 1024 : index
    %c0_34 = arith.constant 0 : index
    %41 = vector.load %arg2[%c1024, %c0_34] : memref<1152x128xbf16, #tpu.memory_space<vmem>>, vector<128x128xbf16>
    %cst_35 = arith.constant dense<0.000000e+00> : vector<24x128xf32>
    %42 = tpu.matmul %40, %41, %cst_35 {dimension_numbers = #tpu.dot_dimension_numbers<[1], [0], [0], [1], [0, 0, 1, 1], [], []>} : vector<24x128xbf16>, vector<128x128xbf16>, vector<24x128xf32> -> vector<24x128xf32>
    %43 = arith.addf %38, %42 : vector<24x128xf32>
    %c0_36 = arith.constant 0 : index
    %c0_37 = arith.constant 0 : index
    %44 = vector.load %arg3[%c0_36, %c0_37] : memref<1x128xf32, #tpu.memory_space<vmem>>, vector<1x128xf32>
    %45 = vector.broadcast %44 : vector<1x128xf32> to vector<24x128xf32>
    %46 = arith.addf %43, %45 : vector<24x128xf32>
    %cst_38 = arith.constant 0.000000e+00 : f32
    %47 = vector.broadcast %cst_38 : f32 to vector<24x128xf32>
    %48 = arith.cmpf oge, %46, %47 : vector<24x128xf32>
    %cst_39 = arith.constant 2.000000e-01 : f32
    %49 = vector.broadcast %cst_39 : f32 to vector<24x128xf32>
    %50 = arith.mulf %49, %46 : vector<24x128xf32>
    %51 = arith.select %48, %46, %50 : vector<24x128xi1>, vector<24x128xf32>
    %52 = arith.truncf %51 : vector<24x128xf32> to vector<24x128xbf16>
    %c0_40 = arith.constant 0 : index
    %c0_41 = arith.constant 0 : index
    %c0_42 = arith.constant 0 : index
    %53 = vector.load %arg4[%c0_40, %c0_41, %c0_42] : memref<1x24x128xbf16, #tpu.memory_space<vmem>>, vector<1x24x128xbf16>
    %54 = vector.shape_cast %53 : vector<1x24x128xbf16> to vector<24x128xbf16>
    %55 = vector.shape_cast %52 : vector<24x128xbf16> to vector<1x24x128xbf16>
    tpu.vector_store %arg4[%c0_40, %c0_41, %c0_42], %55 {strides = array<i32>} : memref<1x24x128xbf16, #tpu.memory_space<vmem>>, vector<1x24x128xbf16>,
    return
  }
  func.func @transform_0(%arg0: i32) -> (i32, i32, i32) {
    %c0_i32 = arith.constant 0 : i32
    %c0_i32_0 = arith.constant 0 : i32
    %c0_i32_1 = arith.constant 0 : i32
    return %arg0, %c0_i32, %c0_i32_0 : i32, i32, i32
  }
  func.func @transform_1(%arg0: i32) -> (i32, i32) {
    %c0_i32 = arith.constant 0 : i32
    %c0_i32_0 = arith.constant 0 : i32
    %c0_i32_1 = arith.constant 0 : i32
    return %c0_i32, %c0_i32_0 : i32, i32
  }
  func.func @transform_2(%arg0: i32) -> (i32, i32) {
    %c0_i32 = arith.constant 0 : i32
    %c0_i32_0 = arith.constant 0 : i32
    %c0_i32_1 = arith.constant 0 : i32
    return %c0_i32, %c0_i32_0 : i32, i32
  }
  func.func @transform_3(%arg0: i32) -> (i32, i32, i32) {
    %c0_i32 = arith.constant 0 : i32
    %c0_i32_0 = arith.constant 0 : i32
    %c0_i32_1 = arith.constant 0 : i32
    return %arg0, %c0_i32, %c0_i32_0 : i32, i32, i32
  }
}

module attributes {stable_mosaic.version = 11 : i64} {
  func.func @_conv3x3_kernel(%arg0: i32, %arg1: memref<1x102x128xbf16, #tpu.memory_space<vmem>>, %arg2: memref<1152x64xbf16, #tpu.memory_space<vmem>>, %arg3: memref<1x64xf32, #tpu.memory_space<vmem>>, %arg4: memref<1x80x64xbf16, #tpu.memory_space<vmem>>) attributes {dimension_semantics = [#tpu.dimension_semantics<parallel>], iteration_bounds = array<i64: 2>, scalar_prefetch = 0 : i64, scratch_operands = 0 : i64, tpu.core_type = #tpu.core_type<tc>, window_params = [{transform_indices = @transform_0, window_bounds = array<i64: 1, 102, 128>}, {pipeline_mode = #tpu.pipeline_mode<synchronous>, transform_indices = @transform_1, window_bounds = array<i64: 1152, 64>}, {pipeline_mode = #tpu.pipeline_mode<synchronous>, transform_indices = @transform_2, window_bounds = array<i64: 1, 64>}, {transform_indices = @transform_3, window_bounds = array<i64: 1, 80, 64>}]} {
    %c0 = arith.constant 0 : index
    %c0_0 = arith.constant 0 : index
    %c0_1 = arith.constant 0 : index
    %0 = vector.load %arg1[%c0, %c0_0, %c0_1] : memref<1x102x128xbf16, #tpu.memory_space<vmem>>, vector<1x80x128xbf16>
    %1 = vector.shape_cast %0 : vector<1x80x128xbf16> to vector<80x128xbf16>
    %c0_2 = arith.constant 0 : index
    %c0_3 = arith.constant 0 : index
    %2 = vector.load %arg2[%c0_2, %c0_3] : memref<1152x64xbf16, #tpu.memory_space<vmem>>, vector<128x64xbf16>
    %cst = arith.constant dense<0.000000e+00> : vector<80x64xf32>
    %3 = tpu.matmul %1, %2, %cst {dimension_numbers = #tpu.dot_dimension_numbers<[1], [0], [0], [1], [0, 0, 1, 1], [], []>} : vector<80x128xbf16>, vector<128x64xbf16>, vector<80x64xf32> -> vector<80x64xf32>
    %c0_4 = arith.constant 0 : index
    %c1 = arith.constant 1 : index
    %c0_5 = arith.constant 0 : index
    %4 = vector.load %arg1[%c0_4, %c1, %c0_5] : memref<1x102x128xbf16, #tpu.memory_space<vmem>>, vector<1x80x128xbf16>
    %5 = vector.shape_cast %4 : vector<1x80x128xbf16> to vector<80x128xbf16>
    %c128 = arith.constant 128 : index
    %c0_6 = arith.constant 0 : index
    %6 = vector.load %arg2[%c128, %c0_6] : memref<1152x64xbf16, #tpu.memory_space<vmem>>, vector<128x64xbf16>
    %cst_7 = arith.constant dense<0.000000e+00> : vector<80x64xf32>
    %7 = tpu.matmul %5, %6, %cst_7 {dimension_numbers = #tpu.dot_dimension_numbers<[1], [0], [0], [1], [0, 0, 1, 1], [], []>} : vector<80x128xbf16>, vector<128x64xbf16>, vector<80x64xf32> -> vector<80x64xf32>
    %8 = arith.addf %3, %7 : vector<80x64xf32>
    %c0_8 = arith.constant 0 : index
    %c2 = arith.constant 2 : index
    %c0_9 = arith.constant 0 : index
    %9 = vector.load %arg1[%c0_8, %c2, %c0_9] : memref<1x102x128xbf16, #tpu.memory_space<vmem>>, vector<1x80x128xbf16>
    %10 = vector.shape_cast %9 : vector<1x80x128xbf16> to vector<80x128xbf16>
    %c256 = arith.constant 256 : index
    %c0_10 = arith.constant 0 : index
    %11 = vector.load %arg2[%c256, %c0_10] : memref<1152x64xbf16, #tpu.memory_space<vmem>>, vector<128x64xbf16>
    %cst_11 = arith.constant dense<0.000000e+00> : vector<80x64xf32>
    %12 = tpu.matmul %10, %11, %cst_11 {dimension_numbers = #tpu.dot_dimension_numbers<[1], [0], [0], [1], [0, 0, 1, 1], [], []>} : vector<80x128xbf16>, vector<128x64xbf16>, vector<80x64xf32> -> vector<80x64xf32>
    %13 = arith.addf %8, %12 : vector<80x64xf32>
    %c0_12 = arith.constant 0 : index
    %c10 = arith.constant 10 : index
    %c0_13 = arith.constant 0 : index
    %14 = vector.load %arg1[%c0_12, %c10, %c0_13] : memref<1x102x128xbf16, #tpu.memory_space<vmem>>, vector<1x80x128xbf16>
    %15 = vector.shape_cast %14 : vector<1x80x128xbf16> to vector<80x128xbf16>
    %c384 = arith.constant 384 : index
    %c0_14 = arith.constant 0 : index
    %16 = vector.load %arg2[%c384, %c0_14] : memref<1152x64xbf16, #tpu.memory_space<vmem>>, vector<128x64xbf16>
    %cst_15 = arith.constant dense<0.000000e+00> : vector<80x64xf32>
    %17 = tpu.matmul %15, %16, %cst_15 {dimension_numbers = #tpu.dot_dimension_numbers<[1], [0], [0], [1], [0, 0, 1, 1], [], []>} : vector<80x128xbf16>, vector<128x64xbf16>, vector<80x64xf32> -> vector<80x64xf32>
    %18 = arith.addf %13, %17 : vector<80x64xf32>
    %c0_16 = arith.constant 0 : index
    %c11 = arith.constant 11 : index
    %c0_17 = arith.constant 0 : index
    %19 = vector.load %arg1[%c0_16, %c11, %c0_17] : memref<1x102x128xbf16, #tpu.memory_space<vmem>>, vector<1x80x128xbf16>
    %20 = vector.shape_cast %19 : vector<1x80x128xbf16> to vector<80x128xbf16>
    %c512 = arith.constant 512 : index
    %c0_18 = arith.constant 0 : index
    %21 = vector.load %arg2[%c512, %c0_18] : memref<1152x64xbf16, #tpu.memory_space<vmem>>, vector<128x64xbf16>
    %cst_19 = arith.constant dense<0.000000e+00> : vector<80x64xf32>
    %22 = tpu.matmul %20, %21, %cst_19 {dimension_numbers = #tpu.dot_dimension_numbers<[1], [0], [0], [1], [0, 0, 1, 1], [], []>} : vector<80x128xbf16>, vector<128x64xbf16>, vector<80x64xf32> -> vector<80x64xf32>
    %23 = arith.addf %18, %22 : vector<80x64xf32>
    %c0_20 = arith.constant 0 : index
    %c12 = arith.constant 12 : index
    %c0_21 = arith.constant 0 : index
    %24 = vector.load %arg1[%c0_20, %c12, %c0_21] : memref<1x102x128xbf16, #tpu.memory_space<vmem>>, vector<1x80x128xbf16>
    %25 = vector.shape_cast %24 : vector<1x80x128xbf16> to vector<80x128xbf16>
    %c640 = arith.constant 640 : index
    %c0_22 = arith.constant 0 : index
    %26 = vector.load %arg2[%c640, %c0_22] : memref<1152x64xbf16, #tpu.memory_space<vmem>>, vector<128x64xbf16>
    %cst_23 = arith.constant dense<0.000000e+00> : vector<80x64xf32>
    %27 = tpu.matmul %25, %26, %cst_23 {dimension_numbers = #tpu.dot_dimension_numbers<[1], [0], [0], [1], [0, 0, 1, 1], [], []>} : vector<80x128xbf16>, vector<128x64xbf16>, vector<80x64xf32> -> vector<80x64xf32>
    %28 = arith.addf %23, %27 : vector<80x64xf32>
    %c0_24 = arith.constant 0 : index
    %c20 = arith.constant 20 : index
    %c0_25 = arith.constant 0 : index
    %29 = vector.load %arg1[%c0_24, %c20, %c0_25] : memref<1x102x128xbf16, #tpu.memory_space<vmem>>, vector<1x80x128xbf16>
    %30 = vector.shape_cast %29 : vector<1x80x128xbf16> to vector<80x128xbf16>
    %c768 = arith.constant 768 : index
    %c0_26 = arith.constant 0 : index
    %31 = vector.load %arg2[%c768, %c0_26] : memref<1152x64xbf16, #tpu.memory_space<vmem>>, vector<128x64xbf16>
    %cst_27 = arith.constant dense<0.000000e+00> : vector<80x64xf32>
    %32 = tpu.matmul %30, %31, %cst_27 {dimension_numbers = #tpu.dot_dimension_numbers<[1], [0], [0], [1], [0, 0, 1, 1], [], []>} : vector<80x128xbf16>, vector<128x64xbf16>, vector<80x64xf32> -> vector<80x64xf32>
    %33 = arith.addf %28, %32 : vector<80x64xf32>
    %c0_28 = arith.constant 0 : index
    %c21 = arith.constant 21 : index
    %c0_29 = arith.constant 0 : index
    %34 = vector.load %arg1[%c0_28, %c21, %c0_29] : memref<1x102x128xbf16, #tpu.memory_space<vmem>>, vector<1x80x128xbf16>
    %35 = vector.shape_cast %34 : vector<1x80x128xbf16> to vector<80x128xbf16>
    %c896 = arith.constant 896 : index
    %c0_30 = arith.constant 0 : index
    %36 = vector.load %arg2[%c896, %c0_30] : memref<1152x64xbf16, #tpu.memory_space<vmem>>, vector<128x64xbf16>
    %cst_31 = arith.constant dense<0.000000e+00> : vector<80x64xf32>
    %37 = tpu.matmul %35, %36, %cst_31 {dimension_numbers = #tpu.dot_dimension_numbers<[1], [0], [0], [1], [0, 0, 1, 1], [], []>} : vector<80x128xbf16>, vector<128x64xbf16>, vector<80x64xf32> -> vector<80x64xf32>
    %38 = arith.addf %33, %37 : vector<80x64xf32>
    %c0_32 = arith.constant 0 : index
    %c22 = arith.constant 22 : index
    %c0_33 = arith.constant 0 : index
    %39 = vector.load %arg1[%c0_32, %c22, %c0_33] : memref<1x102x128xbf16, #tpu.memory_space<vmem>>, vector<1x80x128xbf16>
    %40 = vector.shape_cast %39 : vector<1x80x128xbf16> to vector<80x128xbf16>
    %c1024 = arith.constant 1024 : index
    %c0_34 = arith.constant 0 : index
    %41 = vector.load %arg2[%c1024, %c0_34] : memref<1152x64xbf16, #tpu.memory_space<vmem>>, vector<128x64xbf16>
    %cst_35 = arith.constant dense<0.000000e+00> : vector<80x64xf32>
    %42 = tpu.matmul %40, %41, %cst_35 {dimension_numbers = #tpu.dot_dimension_numbers<[1], [0], [0], [1], [0, 0, 1, 1], [], []>} : vector<80x128xbf16>, vector<128x64xbf16>, vector<80x64xf32> -> vector<80x64xf32>
    %43 = arith.addf %38, %42 : vector<80x64xf32>
    %c0_36 = arith.constant 0 : index
    %c0_37 = arith.constant 0 : index
    %44 = vector.load %arg3[%c0_36, %c0_37] : memref<1x64xf32, #tpu.memory_space<vmem>>, vector<1x64xf32>
    %45 = vector.broadcast %44 : vector<1x64xf32> to vector<80x64xf32>
    %46 = arith.addf %43, %45 : vector<80x64xf32>
    %cst_38 = arith.constant 0.000000e+00 : f32
    %47 = vector.broadcast %cst_38 : f32 to vector<80x64xf32>
    %48 = arith.cmpf oge, %46, %47 : vector<80x64xf32>
    %cst_39 = arith.constant 2.000000e-01 : f32
    %49 = vector.broadcast %cst_39 : f32 to vector<80x64xf32>
    %50 = arith.mulf %49, %46 : vector<80x64xf32>
    %51 = arith.select %48, %46, %50 : vector<80x64xi1>, vector<80x64xf32>
    %52 = arith.truncf %51 : vector<80x64xf32> to vector<80x64xbf16>
    %c0_40 = arith.constant 0 : index
    %c0_41 = arith.constant 0 : index
    %c0_42 = arith.constant 0 : index
    %53 = vector.load %arg4[%c0_40, %c0_41, %c0_42] : memref<1x80x64xbf16, #tpu.memory_space<vmem>>, vector<1x80x64xbf16>
    %54 = vector.shape_cast %53 : vector<1x80x64xbf16> to vector<80x64xbf16>
    %55 = vector.shape_cast %52 : vector<80x64xbf16> to vector<1x80x64xbf16>
    tpu.vector_store %arg4[%c0_40, %c0_41, %c0_42], %55 {strides = array<i32>} : memref<1x80x64xbf16, #tpu.memory_space<vmem>>, vector<1x80x64xbf16>,
    return
  }
  func.func @transform_0(%arg0: i32) -> (i32, i32, i32) {
    %c0_i32 = arith.constant 0 : i32
    %c0_i32_0 = arith.constant 0 : i32
    %c0_i32_1 = arith.constant 0 : i32
    return %arg0, %c0_i32, %c0_i32_0 : i32, i32, i32
  }
  func.func @transform_1(%arg0: i32) -> (i32, i32) {
    %c0_i32 = arith.constant 0 : i32
    %c0_i32_0 = arith.constant 0 : i32
    %c0_i32_1 = arith.constant 0 : i32
    return %c0_i32, %c0_i32_0 : i32, i32
  }
  func.func @transform_2(%arg0: i32) -> (i32, i32) {
    %c0_i32 = arith.constant 0 : i32
    %c0_i32_0 = arith.constant 0 : i32
    %c0_i32_1 = arith.constant 0 : i32
    return %c0_i32, %c0_i32_0 : i32, i32
  }
  func.func @transform_3(%arg0: i32) -> (i32, i32, i32) {
    %c0_i32 = arith.constant 0 : i32
    %c0_i32_0 = arith.constant 0 : i32
    %c0_i32_1 = arith.constant 0 : i32
    return %arg0, %c0_i32, %c0_i32_0 : i32, i32, i32
  }
}

module attributes {stable_mosaic.version = 11 : i64} {
  func.func @_conv3x3_kernel(%arg0: i32, %arg1: memref<1x326x64xbf16, #tpu.memory_space<vmem>>, %arg2: memref<576x3xbf16, #tpu.memory_space<vmem>>, %arg3: memref<1x3xf32, #tpu.memory_space<vmem>>, %arg4: memref<1x288x3xf32, #tpu.memory_space<vmem>>) attributes {dimension_semantics = [#tpu.dimension_semantics<parallel>], iteration_bounds = array<i64: 2>, scalar_prefetch = 0 : i64, scratch_operands = 0 : i64, tpu.core_type = #tpu.core_type<tc>, window_params = [{transform_indices = @transform_0, window_bounds = array<i64: 1, 326, 64>}, {pipeline_mode = #tpu.pipeline_mode<synchronous>, transform_indices = @transform_1, window_bounds = array<i64: 576, 3>}, {pipeline_mode = #tpu.pipeline_mode<synchronous>, transform_indices = @transform_2, window_bounds = array<i64: 1, 3>}, {transform_indices = @transform_3, window_bounds = array<i64: 1, 288, 3>}]} {
    %c0 = arith.constant 0 : index
    %c0_0 = arith.constant 0 : index
    %c0_1 = arith.constant 0 : index
    %0 = vector.load %arg1[%c0, %c0_0, %c0_1] : memref<1x326x64xbf16, #tpu.memory_space<vmem>>, vector<1x288x64xbf16>
    %1 = vector.shape_cast %0 : vector<1x288x64xbf16> to vector<288x64xbf16>
    %c0_2 = arith.constant 0 : index
    %c0_3 = arith.constant 0 : index
    %2 = vector.load %arg2[%c0_2, %c0_3] : memref<576x3xbf16, #tpu.memory_space<vmem>>, vector<64x3xbf16>
    %cst = arith.constant dense<0.000000e+00> : vector<288x3xf32>
    %3 = tpu.matmul %1, %2, %cst {dimension_numbers = #tpu.dot_dimension_numbers<[1], [0], [0], [1], [0, 0, 1, 1], [], []>} : vector<288x64xbf16>, vector<64x3xbf16>, vector<288x3xf32> -> vector<288x3xf32>
    %c0_4 = arith.constant 0 : index
    %c1 = arith.constant 1 : index
    %c0_5 = arith.constant 0 : index
    %4 = vector.load %arg1[%c0_4, %c1, %c0_5] : memref<1x326x64xbf16, #tpu.memory_space<vmem>>, vector<1x288x64xbf16>
    %5 = vector.shape_cast %4 : vector<1x288x64xbf16> to vector<288x64xbf16>
    %c64 = arith.constant 64 : index
    %c0_6 = arith.constant 0 : index
    %6 = vector.load %arg2[%c64, %c0_6] : memref<576x3xbf16, #tpu.memory_space<vmem>>, vector<64x3xbf16>
    %cst_7 = arith.constant dense<0.000000e+00> : vector<288x3xf32>
    %7 = tpu.matmul %5, %6, %cst_7 {dimension_numbers = #tpu.dot_dimension_numbers<[1], [0], [0], [1], [0, 0, 1, 1], [], []>} : vector<288x64xbf16>, vector<64x3xbf16>, vector<288x3xf32> -> vector<288x3xf32>
    %8 = arith.addf %3, %7 : vector<288x3xf32>
    %c0_8 = arith.constant 0 : index
    %c2 = arith.constant 2 : index
    %c0_9 = arith.constant 0 : index
    %9 = vector.load %arg1[%c0_8, %c2, %c0_9] : memref<1x326x64xbf16, #tpu.memory_space<vmem>>, vector<1x288x64xbf16>
    %10 = vector.shape_cast %9 : vector<1x288x64xbf16> to vector<288x64xbf16>
    %c128 = arith.constant 128 : index
    %c0_10 = arith.constant 0 : index
    %11 = vector.load %arg2[%c128, %c0_10] : memref<576x3xbf16, #tpu.memory_space<vmem>>, vector<64x3xbf16>
    %cst_11 = arith.constant dense<0.000000e+00> : vector<288x3xf32>
    %12 = tpu.matmul %10, %11, %cst_11 {dimension_numbers = #tpu.dot_dimension_numbers<[1], [0], [0], [1], [0, 0, 1, 1], [], []>} : vector<288x64xbf16>, vector<64x3xbf16>, vector<288x3xf32> -> vector<288x3xf32>
    %13 = arith.addf %8, %12 : vector<288x3xf32>
    %c0_12 = arith.constant 0 : index
    %c18 = arith.constant 18 : index
    %c0_13 = arith.constant 0 : index
    %14 = vector.load %arg1[%c0_12, %c18, %c0_13] : memref<1x326x64xbf16, #tpu.memory_space<vmem>>, vector<1x288x64xbf16>
    %15 = vector.shape_cast %14 : vector<1x288x64xbf16> to vector<288x64xbf16>
    %c192 = arith.constant 192 : index
    %c0_14 = arith.constant 0 : index
    %16 = vector.load %arg2[%c192, %c0_14] : memref<576x3xbf16, #tpu.memory_space<vmem>>, vector<64x3xbf16>
    %cst_15 = arith.constant dense<0.000000e+00> : vector<288x3xf32>
    %17 = tpu.matmul %15, %16, %cst_15 {dimension_numbers = #tpu.dot_dimension_numbers<[1], [0], [0], [1], [0, 0, 1, 1], [], []>} : vector<288x64xbf16>, vector<64x3xbf16>, vector<288x3xf32> -> vector<288x3xf32>
    %18 = arith.addf %13, %17 : vector<288x3xf32>
    %c0_16 = arith.constant 0 : index
    %c19 = arith.constant 19 : index
    %c0_17 = arith.constant 0 : index
    %19 = vector.load %arg1[%c0_16, %c19, %c0_17] : memref<1x326x64xbf16, #tpu.memory_space<vmem>>, vector<1x288x64xbf16>
    %20 = vector.shape_cast %19 : vector<1x288x64xbf16> to vector<288x64xbf16>
    %c256 = arith.constant 256 : index
    %c0_18 = arith.constant 0 : index
    %21 = vector.load %arg2[%c256, %c0_18] : memref<576x3xbf16, #tpu.memory_space<vmem>>, vector<64x3xbf16>
    %cst_19 = arith.constant dense<0.000000e+00> : vector<288x3xf32>
    %22 = tpu.matmul %20, %21, %cst_19 {dimension_numbers = #tpu.dot_dimension_numbers<[1], [0], [0], [1], [0, 0, 1, 1], [], []>} : vector<288x64xbf16>, vector<64x3xbf16>, vector<288x3xf32> -> vector<288x3xf32>
    %23 = arith.addf %18, %22 : vector<288x3xf32>
    %c0_20 = arith.constant 0 : index
    %c20 = arith.constant 20 : index
    %c0_21 = arith.constant 0 : index
    %24 = vector.load %arg1[%c0_20, %c20, %c0_21] : memref<1x326x64xbf16, #tpu.memory_space<vmem>>, vector<1x288x64xbf16>
    %25 = vector.shape_cast %24 : vector<1x288x64xbf16> to vector<288x64xbf16>
    %c320 = arith.constant 320 : index
    %c0_22 = arith.constant 0 : index
    %26 = vector.load %arg2[%c320, %c0_22] : memref<576x3xbf16, #tpu.memory_space<vmem>>, vector<64x3xbf16>
    %cst_23 = arith.constant dense<0.000000e+00> : vector<288x3xf32>
    %27 = tpu.matmul %25, %26, %cst_23 {dimension_numbers = #tpu.dot_dimension_numbers<[1], [0], [0], [1], [0, 0, 1, 1], [], []>} : vector<288x64xbf16>, vector<64x3xbf16>, vector<288x3xf32> -> vector<288x3xf32>
    %28 = arith.addf %23, %27 : vector<288x3xf32>
    %c0_24 = arith.constant 0 : index
    %c36 = arith.constant 36 : index
    %c0_25 = arith.constant 0 : index
    %29 = vector.load %arg1[%c0_24, %c36, %c0_25] : memref<1x326x64xbf16, #tpu.memory_space<vmem>>, vector<1x288x64xbf16>
    %30 = vector.shape_cast %29 : vector<1x288x64xbf16> to vector<288x64xbf16>
    %c384 = arith.constant 384 : index
    %c0_26 = arith.constant 0 : index
    %31 = vector.load %arg2[%c384, %c0_26] : memref<576x3xbf16, #tpu.memory_space<vmem>>, vector<64x3xbf16>
    %cst_27 = arith.constant dense<0.000000e+00> : vector<288x3xf32>
    %32 = tpu.matmul %30, %31, %cst_27 {dimension_numbers = #tpu.dot_dimension_numbers<[1], [0], [0], [1], [0, 0, 1, 1], [], []>} : vector<288x64xbf16>, vector<64x3xbf16>, vector<288x3xf32> -> vector<288x3xf32>
    %33 = arith.addf %28, %32 : vector<288x3xf32>
    %c0_28 = arith.constant 0 : index
    %c37 = arith.constant 37 : index
    %c0_29 = arith.constant 0 : index
    %34 = vector.load %arg1[%c0_28, %c37, %c0_29] : memref<1x326x64xbf16, #tpu.memory_space<vmem>>, vector<1x288x64xbf16>
    %35 = vector.shape_cast %34 : vector<1x288x64xbf16> to vector<288x64xbf16>
    %c448 = arith.constant 448 : index
    %c0_30 = arith.constant 0 : index
    %36 = vector.load %arg2[%c448, %c0_30] : memref<576x3xbf16, #tpu.memory_space<vmem>>, vector<64x3xbf16>
    %cst_31 = arith.constant dense<0.000000e+00> : vector<288x3xf32>
    %37 = tpu.matmul %35, %36, %cst_31 {dimension_numbers = #tpu.dot_dimension_numbers<[1], [0], [0], [1], [0, 0, 1, 1], [], []>} : vector<288x64xbf16>, vector<64x3xbf16>, vector<288x3xf32> -> vector<288x3xf32>
    %38 = arith.addf %33, %37 : vector<288x3xf32>
    %c0_32 = arith.constant 0 : index
    %c38 = arith.constant 38 : index
    %c0_33 = arith.constant 0 : index
    %39 = vector.load %arg1[%c0_32, %c38, %c0_33] : memref<1x326x64xbf16, #tpu.memory_space<vmem>>, vector<1x288x64xbf16>
    %40 = vector.shape_cast %39 : vector<1x288x64xbf16> to vector<288x64xbf16>
    %c512 = arith.constant 512 : index
    %c0_34 = arith.constant 0 : index
    %41 = vector.load %arg2[%c512, %c0_34] : memref<576x3xbf16, #tpu.memory_space<vmem>>, vector<64x3xbf16>
    %cst_35 = arith.constant dense<0.000000e+00> : vector<288x3xf32>
    %42 = tpu.matmul %40, %41, %cst_35 {dimension_numbers = #tpu.dot_dimension_numbers<[1], [0], [0], [1], [0, 0, 1, 1], [], []>} : vector<288x64xbf16>, vector<64x3xbf16>, vector<288x3xf32> -> vector<288x3xf32>
    %43 = arith.addf %38, %42 : vector<288x3xf32>
    %c0_36 = arith.constant 0 : index
    %c0_37 = arith.constant 0 : index
    %44 = vector.load %arg3[%c0_36, %c0_37] : memref<1x3xf32, #tpu.memory_space<vmem>>, vector<1x3xf32>
    %45 = vector.broadcast %44 : vector<1x3xf32> to vector<288x3xf32>
    %46 = arith.addf %43, %45 : vector<288x3xf32>
    %47 = math.tanh %46 : vector<288x3xf32>
    %c0_38 = arith.constant 0 : index
    %c0_39 = arith.constant 0 : index
    %c0_40 = arith.constant 0 : index
    %48 = vector.load %arg4[%c0_38, %c0_39, %c0_40] : memref<1x288x3xf32, #tpu.memory_space<vmem>>, vector<1x288x3xf32>
    %49 = vector.shape_cast %48 : vector<1x288x3xf32> to vector<288x3xf32>
    %50 = vector.shape_cast %47 : vector<288x3xf32> to vector<1x288x3xf32>
    tpu.vector_store %arg4[%c0_38, %c0_39, %c0_40], %50 {strides = array<i32>} : memref<1x288x3xf32, #tpu.memory_space<vmem>>, vector<1x288x3xf32>,
    return
  }
  func.func @transform_0(%arg0: i32) -> (i32, i32, i32) {
    %c0_i32 = arith.constant 0 : i32
    %c0_i32_0 = arith.constant 0 : i32
    %c0_i32_1 = arith.constant 0 : i32
    return %arg0, %c0_i32, %c0_i32_0 : i32, i32, i32
  }
  func.func @transform_1(%arg0: i32) -> (i32, i32) {
    %c0_i32 = arith.constant 0 : i32
    %c0_i32_0 = arith.constant 0 : i32
    %c0_i32_1 = arith.constant 0 : i32
    return %c0_i32, %c0_i32_0 : i32, i32
  }
  func.func @transform_2(%arg0: i32) -> (i32, i32) {
    %c0_i32 = arith.constant 0 : i32
    %c0_i32_0 = arith.constant 0 : i32
    %c0_i32_1 = arith.constant 0 : i32
    return %c0_i32, %c0_i32_0 : i32, i32
  }
  func.func @transform_3(%arg0: i32) -> (i32, i32, i32) {
    %c0_i32 = arith.constant 0 : i32
    %c0_i32_0 = arith.constant 0 : i32
    %c0_i32_1 = arith.constant 0 : i32
    return %arg0, %c0_i32, %c0_i32_0 : i32, i32, i32
  }
}

</mosaic_0001>

<bundles_post_ra>
// kernel: generator_forward.4
= control target key start
LH: loop header
LB: loop body
LE: loop exit
PB: predicated region body
PF: predicated region fallthrough
CT: control target
= control target key end

     0   :  { %8 = vsyncpa [#allocation3], 0  ;;  %s615_s0 = inlined_call_operand.vmem [shape: bf16[2,32], index: 0, kind: input, shape index: {}]   ;;  %s616_s1 = inlined_call_operand.hbm [shape: bf16[32,512], index: 1, kind: input, shape index: {}]   ;;  %s617_s2 = inlined_call_operand.vmem [shape: f32[1,512], index: 2, kind: input, shape index: {}]   ;;  %s618_s3 = inlined_call_operand.vmem [shape: bf16[2,512], index: 3, kind: output, shape index: {}]  }
   0x1   :  { %10 = vsyncpa [#allocation3 + $0x1], 0  ;;  %s520_s12 = smov 0   ;;  %s522_s13 = smov 0  }
   0x2   :  { %s524_s14 = smov 0   ;;  %s526_s15 = smov 0  }
   0x3 LB: > { %s353_s16 = sadd.s32 4294967295, %s495_s15   ;;  %s540_s17 = sadd.s32 1, %s495_s15   ;;  %s495_s15 = sphi %s526_s15, %s625_s15   ;;  %s491_s14 = sphi %s524_s14, %s624_s14   ;;  %s487_s13 = sphi %s522_s13, %s623_s13   ;;  %s483_s12 = sphi %s520_s12, %s622_s12  }
   0x4   : > { %s41_s18 = ssub.s32 %s495_s15, %s540_s17  ;;  %s44_s19 = sadd.s32 1, %s491_s14 }
   0x5   : > { %p42_p0 = scmp.eq.s32.totalorder %s41_s18, 0  ;;  %p51_p1 = scmp.ne.s32.totalorder %s491_s14, %s487_s13 }
   0x6   : > { %p52_p2 = scmp.eq.s32.totalorder %s495_s15, 0  ;;  %p57_p3 = scmp.ne.s32.totalorder %s487_s13, %s483_s12 }
   0x7   : > { %s550_s20 = scalar_select %p42_p0, %s491_s14, %s44_s19  }
   0x8   : > { %p552_p4 = por %p52_p2, %p51_p1  ;;  %p58_p5 = scmp.eq.s32.totalorder %s353_s16, 0 }
   0x9   : > { %p395_p6 = scmp.lt.s32.totalorder %s495_s15, 2  ;;  %s136_s23 = sand.u32 1, %s491_s14  }
   0xa   : > { %p559_p7 = por %p58_p5, %p57_p3  ;;  %s357_s24 = sshll.u32 %s136_s23, 5 }
   0xb   : > { %s384_s25 = sshll.u32 %s495_s15, 3  ;;  %s140_s29 = scalar_lea.vmem [#allocation2], %s357_s24 }
   0xc   : > { %s145_s28 = scalar_lea.hbm %s616_s1, %s384_s25  ;;  %s148_s30 = sshll.u32 %s140_s29, 4  ;;  %s149_s30 = int_to_ptr.vmem [resolvable:$true] %s148_s30 }
   0xd   : > { %s146_s4 = sshll.u32 %s145_s28, 4  ;;  %p570_p8 = pnand %p395_p6, %p552_p4  ;;  %s147_s4 = int_to_ptr.hbm [resolvable:$true] %s146_s4 }
   0xe   : > { %s137_s6 = scalar_lea.sflag [#allocation3], %s136_s23  ;;  %s431_s7 = sshra.s32 %s147_s4, 4  ;;  %s432_s7 = int_to_ptr.hbm [resolvable:$true] %s431_s7 }
   0xf   : > { %s433_s8 = scalar_lea.hbm %s432_s7, 32  ;;  %p435_p10 = pneg %p570_p8 }
  0x10   : > { %p434_p9 = scmp.ne.s32.totalorder %s432_s7, %s433_s8  ;;  %s438_s11 = scalar_lea.hbm %s616_s1, 64 }
  0x11   : > { %p439_p13 = scmp.lt.s32.totalorder %s432_s7, %s616_s1  ;;  %p440_p0 = scmp.lt.s32.totalorder %s438_s11, %s433_s8 }
  0x12   : > { %p436_p11 = pnand %p435_p10, %p434_p9 }
  0x13   : > { %p441_p1 = por %p440_p0, %p439_p13 }
  0x14   : > { %p437_p12 = pneg %p436_p11 }
  0x16   : > { %p442_p2 = pnand %p441_p1, %p437_p12 }
  0x18   : > { %445 = shalt.err (!%p442_p2)
}
  0x19   : > { %s497_s19 = smov 256   ;;  %s498_s21 = smov 128  }
  0x1a   : > { %s499_s23 = smov 8   ;;  %p360_p3 = scmp.ge.s32.totalorder %s495_s15, 1 }
  0x1b   : > { %394 = dma.hbm_to_vmem [thread:$0]  (!%p570_p8), %s147_s4, 512, %s149_s30, %s137_s6, %s497_s19, %s498_s21, %s499_s23  }
  0x1c   : > { %p164_p4 = scmp.lt.s32.totalorder %s495_s15, 3 }
  0x1e   : > { %p165_p5 = pnand %p360_p3, %p164_p4 }
  0x1f   : > { %s170_s24 = sand.u32 (!%p165_p5), 1, %s487_s13  }
  0x20   : > { %168 = sbr.rel (%p165_p5) target bundleno = 183 (0xb7), region = 32  ;;  %s361_s25 = sshll.u32 (!%p165_p5), %s170_s24, 5 }
  0x21   : > { %s171_s26 = scalar_lea.sflag (!%p165_p5), [#allocation3], %s170_s24  ;;  %s174_s27 = scalar_lea.vmem (!%p165_p5), [#allocation2], %s361_s25 }
  0x25   : > { %478 = dma.done.wait (%p559_p7), %s171_s26, 512  }
  0x26   : > { %480 = vsyncadd (%p559_p7), %s171_s26, 4294966784  ;;  %v374_v0 = vld [vmem:[%s174_s27 + $0x10] sm:$0xf]  ;;  %v388_v1 = vld [vmem:[%s174_s27 + $0x14] sm:$0xf0]  ;;  %vm244_vm0 = vcmask 261120  }
  0x27   : > { %v387_v2 = vld [vmem:[%s174_s27 + $0x14] sm:$0xf]  ;;  %v375_v3 = vor.u32 %v388_v1, %v374_v0  ;;  %v376_v4 = vld [vmem:[%s174_s27 + $0x18] sm:$0xf0]  ;;  %v366_v5 = vld [vmem:[%s174_s27] sm:$0xf] }
  0x28   : > { %v386_v6 = vld [vmem:[%s174_s27 + $0x4] sm:$0xf0]  ;;  %v379_v7 = vor.u32 %v387_v2, %v376_v4  ;;  %v385_v8 = vld [vmem:[%s174_s27 + $0x4] sm:$0xf]  ;;  %v368_v9 = vld [vmem:[%s174_s27 + $0x8] sm:$0xf0] }
  0x29   : > { %254 = vmatpush.bf16.msra.mxu0 %v375_v3  ;;  %v367_v10 = vor.u32 %v386_v6, %v366_v5  ;;  %v371_v11 = vor.u32 %v385_v8, %v368_v9  ;;  %v213_v12 = vld [vmem:[%s615_s0] sm:$0x1]  ;;  %s362_s22 = sshll.u32 %s353_s16, 1  ;;  %vm277_vm1 = vcmask 1040384  }
  0x2a   : > { %267 = vmatpush.bf16.msra.mxu1 %v379_v7  ;;  %p203_p6 = scmp.lt.s32.totalorder %s362_s22, 3 }
  0x2c   : > { %s627_s22 = smov (!%p203_p6, %s362_s22), 3 }
  0x2d   : > { %255 = vmatpush.bf16.msra.mxu0 %v367_v10  ;;  %s205_s5 = scalar_lea.vmem %s617_s2, %s627_s22  ;;  %s210_s15 = scalar_lea.vmem %s618_s3, %s627_s22 }
  0x2e   : > { %268 = vmatpush.bf16.msra.mxu1 %v371_v11  ;;  %v218_v13 = vld [vmem:[%s205_s5] sm:$0x3] }
  0x2f   : > { %v220_v14 = vperm.slane %v218_v13, 0  ;;  %v221_v15 = vperm.slane %v218_v13, 1 }
  0x30   : > { %380 = vmatmul.msk.bf16.vlgmr.msra.gmra.mxu0 %vm244_vm0, %v213_v12 }
  0x31   : > { %381 = vmatmul.msk.bf16.vlgmr.msra.gmra.mxu1 %vm244_vm0, %v213_v12 }
  0xad   : > { %v257_v16 = vpop.f32.mrf.mxu0 }
  0xae   : > { %v258_v17 = vadd.f32 %v257_v16, %v220_v14  ;;  %v270_v18 = vpop.f32.mrf.mxu1 }
  0xaf   : > { %v271_v19 = vadd.f32 %v270_v18, %v221_v15 }
  0xb1   : > { %v274_v20 = vpack.c.bf16 %v271_v19, %v258_v17 }
  0xb3   : > { %v276_v21 = vrot.slane %v274_v20, 3 }
  0xb5   : > { %v280_v22 = vsel %vm277_vm1, %v274_v20, %v276_v21  ;;  %v259_v23 = vpop.f32.mrf.mxu0 }
  0xb6   : > { %282 = vst [vmem:[%s210_s15] sm:$0x3] %v280_v22  ;;  %v272_v24 = vpop.f32.mrf.mxu1 }
  0xb7 PF: > { %p13_p7 = scmp.ge.s32.totalorder %s540_s17, 4   ;;  %s622_s12 = smov %s487_s13 }
  0xb8   : > { %s623_s13 = smov %s491_s14  ;;  %s624_s14 = smov %s550_s20 }
  0xb9   : > { %s625_s15 = smov %s540_s17  ;;  %15 = sbr.rel (!%p13_p7) target bundleno = 3 (0x3), region = 75 }
  0xbe   :  { %303 = vsyncpa [#allocation3], 1 }
  0xbf   :  { %305 = vsyncpa [#allocation3 + $0x1], 1 }

// kernel: generator_forward.5
= control target key start
LH: loop header
LB: loop body
LE: loop exit
PB: predicated region body
PF: predicated region fallthrough
CT: control target
= control target key end

     0   :  { %8 = vsyncpa [#allocation3], 0  ;;  %s1658_s12 = smov 0   ;;  %s1772_s0 = inlined_call_operand.vmem [shape: bf16[2,38,128], index: 0, kind: input, shape index: {}]   ;;  %s1773_s1 = inlined_call_operand.hbm [shape: bf16[1152,128], index: 1, kind: input, shape index: {}]   ;;  %s1774_s2 = inlined_call_operand.vmem [shape: f32[1,128], index: 2, kind: input, shape index: {}]   ;;  %s1775_s3 = inlined_call_operand.vmem [shape: bf16[2,24,128], index: 3, kind: output, shape index: {}]  }
   0x1 LB: > { %s124_s15 = sshll.u32 %s1773_s1, 4  ;;  %s1176_s16 = sadd.s32 4294967295, %s1633_s12   ;;  %s1633_s12 = sphi %s1658_s12, %s14_s12   ;;  %s125_s15 = int_to_ptr.hbm [resolvable:$true] %s124_s15 }
   0x2   : > { %p1178_p0 = scmp.ge.s32.totalorder %s1633_s12, 1  ;;  %p113_p1 = scmp.lt.s32.totalorder %s1633_s12, 3 }
   0x3   : > { %p1579_p2 = scmp.eq.s32.totalorder %s1176_s16, 0  ;;  %s1635_s17 = smov [#allocation2]  }
   0x4   : > { %p114_p3 = pnand %p1178_p0, %p113_p1  ;;  %s126_s18 = sshll.u32 %s1635_s17, 4  ;;  %s127_s18 = int_to_ptr.vmem [resolvable:$true] %s126_s18 }
   0x5   : > { %s1636_s19 = smov 64   ;;  %s1637_s20 = smov 4  }
   0x6   : > { %p1575_p4 = pneg %p114_p3  ;;  %153 = sbr.rel (%p114_p3) target bundleno = 252 (0xfc), region = 32 }
   0x8   : > { %p1576_p5 = pnand %p1579_p2, %p1575_p4 }
   0xa   : > { %1578 = dma.hbm_to_vmem [thread:$0]  (!%p1576_p5), %s125_s15, 9216, %s127_s18, [#allocation3], %s1636_s19, %s1636_s19, %s1637_s20  }
   0xb   : > { %1628 = dma.done.wait (%p1579_p2), [#allocation3], 9216  }
   0xc   : > { %1630 = vsyncadd (%p1579_p2), [#allocation3], 4294958080  ;;  %p178_p6 = scmp.lt.s32.totalorder %s1176_s16, 1  ;;  %v1490_v0 = vld [vmem:[#allocation2 + $0x78] sm:$0xff]  ;;  %v1489_v4 = vld [vmem:[#allocation2 + $0x70] sm:$0xff]  ;;  %vm407_vm1 = vcmask 1046528  }
   0xd   : > { %v1482_v1 = vld [vmem:[#allocation2 + $0x38] sm:$0xff]  ;;  %300 = vmatpush.bf16.msra.mxu0 %v1490_v0  ;;  %v1481_v5 = vld [vmem:[#allocation2 + $0x30] sm:$0xff]  ;;  %v1488_v8 = vld [vmem:[#allocation2 + $0x68] sm:$0xff]  ;;  %vm234_vm0 = vsmask.f32 7424  ;;  %vm506_vm2 = vcmask 1044480  }
   0xe   : > { %v1498_v2 = vld [vmem:[#allocation2 + $0xb8] sm:$0xff]  ;;  %s1777_s16 = smov (!%p178_p6, %s1176_s16), 1  ;;  %369 = vmatpush.bf16.msra.mxu1 %v1482_v1  ;;  %v1497_v6 = vld [vmem:[#allocation2 + $0xb0] sm:$0xff]  ;;  %v1480_v9 = vld [vmem:[#allocation2 + $0x28] sm:$0xff]  ;;  %vm601_vm3 = vsmask.f32 4352 }
   0xf   : > { %v1506_v3 = vld [vmem:[#allocation2 + $0xf8] sm:$0xff]  ;;  %461 = vmatpush.bf16.msra.mxu2 %v1498_v2  ;;  %v1505_v7 = vld [vmem:[#allocation2 + $0xf0] sm:$0xff]  ;;  %s1569_s21 = smul.u32 20, %s1777_s16  ;;  %v1496_v10 = vld [vmem:[#allocation2 + $0xa8] sm:$0xff]  ;;  %vm809_vm4 = vcmask 1045504  }
  0x10   : > { %560 = vmatpush.bf16.msra.mxu3 %v1506_v3  ;;  %v1504_v11 = vld [vmem:[#allocation2 + $0xe8] sm:$0xff]  ;;  %v1487_v12 = vld [vmem:[#allocation2 + $0x60] sm:$0xff]  ;;  %v1486_v18 = vld [vmem:[#allocation2 + $0x58] sm:$0xff]  ;;  %vm904_vm5 = vsmask.f32 5376  ;;  %s1570_s27 = smul.u32 12, %s1777_s16 }
  0x11   : > { %301 = vmatpush.bf16.msra.mxu0 %v1489_v4  ;;  %s1675_s24 = scalar_lea.vmem %s1772_s0, %s1569_s21  ;;  %v1479_v13 = vld [vmem:[#allocation2 + $0x20] sm:$0xff]  ;;  %v1478_v19 = vld [vmem:[#allocation2 + $0x18] sm:$0xff]  ;;  %v1485_v28 = vld [vmem:[#allocation2 + $0x50] sm:$0xff] }
  0x12   : > { %370 = vmatpush.bf16.msra.mxu1 %v1481_v5  ;;  %v1495_v14 = vld [vmem:[#allocation2 + $0xa0] sm:$0xff]  ;;  %v1678_v16 = vld [vmem:[%s1675_s24 + $0x8] sm:$0xff]   ;;  %v1494_v22 = vld [vmem:[#allocation2 + $0x98] sm:$0xff]  ;;  %s187_s30 = scalar_lea.vmem %s1775_s3, %s1570_s27 }
  0x13   : > { %462 = vmatpush.bf16.msra.mxu2 %v1497_v6  ;;  %v1503_v15 = vld [vmem:[#allocation2 + $0xe0] sm:$0xff]  ;;  %v207_v17 = vld [vmem:[%s1675_s24 + $0xc] sm:$0x1]  ;;  %v1682_v20 = vunpack.c.l.b16 %v1678_v16  ;;  %v1502_v23 = vld [vmem:[#allocation2 + $0xd8] sm:$0xff] }
  0x14   : > { %561 = vmatpush.bf16.msra.mxu3 %v1505_v7  ;;  %v231_v21 = vunpack.c.l.b16 %v207_v17  ;;  %v1685_v24 = vld [vmem:[%s1675_s24] sm:$0xff]   ;;  %v483_v27 = vld [vmem:[%s1675_s24 + $0xc] sm:$0x7]  ;;  %v1477_v29 = vld [vmem:[#allocation2 + $0x10] sm:$0xff] }
  0x15   : > { %302 = vmatpush.bf16.msra.mxu0 %v1488_v8  ;;  %v387_v25 = vld [vmem:[%s1675_s24] sm:$0xe]  ;;  %v238_v31 = vshll.u32 %v1685_v24, 16  ;;  %v1493_v32 = vld [vmem:[#allocation2 + $0x90] sm:$0xff]  ;;  %v1695_v34 = vunpack.c.h.b16 %v1685_v24  ;;  %v503_v37 = vunpack.c.l.b16 %v483_v27  ;;  %v1484_v38 = vld [vmem:[#allocation2 + $0x48] sm:$0xff]  ;;  %v236_v40 = vshrl.u32 %v1685_v24, 16 }
  0x16   : > { %371 = vmatpush.bf16.msra.mxu1 %v1480_v9  ;;  %v482_v26 = vld [vmem:[%s1675_s24] sm:$0x8]  ;;  %v1691_v30 = vpack.c.b16 %v231_v21, %v1682_v20  ;;  %v1501_v33 = vld [vmem:[#allocation2 + $0xd0] sm:$0xff]  ;;  %v405_v35 = vunpack.c.l.b16 %v387_v25  ;;  %v1476_v39 = vld [vmem:[#allocation2 + $0x8] sm:$0xff]  ;;  %v318_v27 = vpack.c.b16 %v1682_v20, %v1682_v20 }
  0x17   : > { %463 = vmatpush.bf16.msra.mxu2 %v1496_v10  ;;  %v502_v36 = vunpack.c.l.b16 %v482_v26  ;;  %v240_v41 = vrot.slane %v238_v31, 1  ;;  %v1492_v43 = vld [vmem:[#allocation2 + $0x88] sm:$0xff]  ;;  %v1704_v47 = vpack.c.b16 %v503_v37, %v1682_v20  ;;  %v1483_v48 = vld [vmem:[#allocation2 + $0x40] sm:$0xff]  ;;  %v1514_v58 = vld [vmem:[#allocation2 + $0x138] sm:$0xff] }
  0x18   : > { %562 = vmatpush.bf16.msra.mxu3 %v1504_v11  ;;  %v243_v42 = vshll.u32 %v1691_v30, 16  ;;  %v1500_v44 = vld [vmem:[#allocation2 + $0xc8] sm:$0xff]  ;;  %v406_v45 = vpack.c.b16 %v1695_v34, %v405_v35  ;;  %v1475_v49 = vld [vmem:[#allocation2] sm:$0xff]  ;;  %v409_v55 = vrot.slane %v1691_v30, 1  ;;  %v1522_v59 = vld [vmem:[#allocation2 + $0x178] sm:$0xff] }
  0x19   : > { %303 = vmatpush.bf16.msra.mxu0 %v1487_v12  ;;  %v1701_v46 = vpack.c.b16 %v1695_v34, %v502_v36  ;;  %v241_v50 = vor.u32 %v240_v41, %v236_v40  ;;  %v1491_v52 = vld [vmem:[#allocation2 + $0x80] sm:$0xff]  ;;  %v508_v57 = vrot.slane %v1704_v47, 3  ;;  %v1530_v62 = vld [vmem:[#allocation2 + $0x1b8] sm:$0xff]  ;;  %v1513_v1 = vld [vmem:[#allocation2 + $0x130] sm:$0xff]  ;;  %v614_v40 = vshll.u32 %v1678_v16, 16 }
  0x1a   : > { %372 = vmatpush.bf16.msra.mxu1 %v1479_v13  ;;  %v1706_v51 = vrot.slane %v243_v42, 1  ;;  %v1499_v53 = vld [vmem:[#allocation2 + $0xc0] sm:$0xff]  ;;  %v408_v54 = vrot.slane %v406_v45, 1  ;;  %v1538_v0 = vld [vmem:[#allocation2 + $0x1f8] sm:$0xff]  ;;  %v1521_v2 = vld [vmem:[#allocation2 + $0x170] sm:$0xff] }
  0x1b   : > { %464 = vmatpush.bf16.msra.mxu2 %v1495_v14  ;;  %v507_v56 = vrot.slane %v1701_v46, 3  ;;  %v1529_v3 = vld [vmem:[#allocation2 + $0x1b0] sm:$0xff]  ;;  %v1512_v5 = vld [vmem:[#allocation2 + $0x128] sm:$0xff]  ;;  %v1511_v9 = vld [vmem:[#allocation2 + $0x120] sm:$0xff]  ;;  %v247_v14 = vshrl.u32 %v1691_v30, 16  ;;  %v603_v37 = vshrl.u32 %v1701_v46, 16 }
  0x1c   : > { %563 = vmatpush.bf16.msra.mxu3 %v1503_v15  ;;  %v246_v60 = vsel %vm234_vm0, %v241_v50, %v1706_v51  ;;  %v410_v61 = vsel %vm407_vm1, %v408_v54, %v409_v55  ;;  %v1537_v4 = vld [vmem:[#allocation2 + $0x1f0] sm:$0xff]  ;;  %v1520_v6 = vld [vmem:[#allocation2 + $0x168] sm:$0xff]  ;;  %v1519_v10 = vld [vmem:[#allocation2 + $0x160] sm:$0xff]  ;;  %v599_v15 = vunpack.c.h.b16 %v1678_v16 }
  0x1d   : > { %304 = vmatpush.bf16.msra.mxu0 %v1486_v18  ;;  %v509_v63 = vsel %vm506_vm2, %v507_v56, %v508_v57  ;;  %v1528_v7 = vld [vmem:[#allocation2 + $0x1a8] sm:$0xff]  ;;  %v779_v11 = vld [vmem:[%s1675_s24 + $0x4] sm:$0xc]  ;;  %v884_v13 = vld [vmem:[%s1675_s24 + $0x10] sm:$0x7]  ;;  %v249_v26 = vor.u32 %v247_v14, %v1706_v51 }
  0x1e   : > { %373 = vmatpush.bf16.msra.mxu1 %v1478_v19  ;;  %v1536_v8 = vld [vmem:[#allocation2 + $0x1e8] sm:$0xff]  ;;  %v1527_v17 = vld [vmem:[#allocation2 + $0x1a0] sm:$0xff]  ;;  %v1518_v25 = vld [vmem:[#allocation2 + $0x158] sm:$0xff]  ;;  %v707_v14 = vpack.c.b16 %v599_v15, %v599_v15 }
  0x1f   : > { %465 = vmatpush.bf16.msra.mxu2 %v1494_v22  ;;  %v1721_v12 = vld [vmem:[%s1675_s24 + $0x8] sm:$0xff]   ;;  %v1535_v18 = vld [vmem:[#allocation2 + $0x1e0] sm:$0xff]  ;;  %v803_v22 = vunpack.c.l.b16 %v779_v11  ;;  %v782_v31 = vld [vmem:[%s1675_s24 + $0x10] sm:$0x3] }
  0x20   : > { %564 = vmatpush.bf16.msra.mxu3 %v1502_v23  ;;  %v1553_v19 = vunpack.c.l.b16 %v1721_v12  ;;  %v1554_v21 = vunpack.c.h.b16 %v1721_v12  ;;  %v902_v23 = vunpack.c.l.b16 %v884_v13  ;;  %v1509_v35 = vld [vmem:[#allocation2 + $0x110] sm:$0xff]  ;;  %v806_v41 = vunpack.c.l.b16 %v782_v31  ;;  %v1524_v54 = vld [vmem:[#allocation2 + $0x188] sm:$0xff] }
  0x21   : > { %305 = vmatpush.bf16.msra.mxu0 %v1485_v28  ;;  %v1526_v28 = vld [vmem:[#allocation2 + $0x198] sm:$0xff]  ;;  %v1517_v36 = vld [vmem:[#allocation2 + $0x150] sm:$0xff]  ;;  %v1544_v13 = vld [vmem:[#allocation2 + $0x228] sm:$0xff] }
  0x22   : > { %374 = vmatpush.bf16.msra.mxu1 %v1477_v29  ;;  %v1534_v29 = vld [vmem:[#allocation2 + $0x1d8] sm:$0xff]  ;;  %v1525_v42 = vld [vmem:[#allocation2 + $0x190] sm:$0xff] }
  0x23   : > { %466 = vmatpush.bf16.msra.mxu2 %v1493_v32  ;;  %v1734_v32 = vpack.c.b16 %v1553_v19, %v803_v22  ;;  %v1545_v11 = vld [vmem:[#allocation2 + $0x230] sm:$0xff]  ;;  %v1540_v22 = vld [vmem:[#allocation2 + $0x208] sm:$0xff] }
  0x24   : > { %565 = vmatpush.bf16.msra.mxu3 %v1501_v33  ;;  %v1736_v33 = vpack.c.b16 %v902_v23, %v1554_v21 }
  0x25   : > { %306 = vmatpush.bf16.msra.mxu0 %v1484_v38  ;;  %v606_v38 = vshll.u32 %v1701_v46, 16  ;;  %v909_v45 = vshll.u32 %v1734_v32, 16  ;;  %v1508_v46 = vld [vmem:[#allocation2 + $0x108] sm:$0xff] }
  0x26   : > { %375 = vmatpush.bf16.msra.mxu1 %v1476_v39  ;;  %v611_v39 = vshrl.u32 %v1678_v16, 16  ;;  %v914_v30 = vshrl.u32 %v1736_v33, 16  ;;  %v917_v47 = vshll.u32 %v1736_v33, 16  ;;  %v1539_v16 = vld [vmem:[#allocation2 + $0x200] sm:$0xff]  ;;  %v1014_v15 = vrot.slane %v1736_v33, 3 }
  0x27   : > { %467 = vmatpush.bf16.msra.mxu2 %v1492_v43  ;;  %v1533_v43 = vld [vmem:[#allocation2 + $0x1d0] sm:$0xff]  ;;  %v608_v50 = vrot.slane %v606_v38, 4 }
  0x28   : > { %566 = vmatpush.bf16.msra.mxu3 %v1500_v44  ;;  %v906_v44 = vshrl.u32 %v1734_v32, 16  ;;  %v613_v51 = vrot.slane %v611_v39, 3 }
  0x29   : > { %307 = vmatpush.bf16.msra.mxu0 %v1483_v48  ;;  %v1516_v48 = vld [vmem:[#allocation2 + $0x148] sm:$0xff] }
  0x2a   : > { %376 = vmatpush.bf16.msra.mxu1 %v1475_v49  ;;  %v605_v49 = vrot.slane %v603_v37, 3  ;;  %v908_v56 = vrot.slane %v906_v44, 2 }
  0x2b   : > { %468 = vmatpush.bf16.msra.mxu2 %v1491_v52  ;;  %v616_v52 = vrot.slane %v614_v40, 4 }
  0x2c   : > { %567 = vmatpush.bf16.msra.mxu3 %v1499_v53  ;;  %308 = vmatmul.bf16.vlgmr.msra.gmra.mxu0 %v246_v60  ;;  %v808_v53 = vpack.c.b16 %v806_v41, %v1554_v21  ;;  %v1507_v60 = vld [vmem:[#allocation2 + $0x100] sm:$0xff] }
  0x2d   : > { %669 = vmatpush.bf16.msrb.mxu0 %v1514_v58  ;;  %377 = vmatmul.bf16.vlgmr.msra.gmra.mxu1 %v1685_v24  ;;  %v1510_v24 = vld [vmem:[#allocation2 + $0x118] sm:$0xff]  ;;  %v916_v58 = vrot.slane %v914_v30, 2 }
  0x2e   : > { %758 = vmatpush.bf16.msrb.mxu1 %v1522_v59  ;;  %469 = vmatmul.bf16.vlgmr.msra.gmra.mxu2 %v410_v61  ;;  %v919_v59 = vrot.slane %v917_v47, 3  ;;  %v1515_v61 = vld [vmem:[#allocation2 + $0x140] sm:$0xff] }
  0x2f   : > { %568 = vmatmul.bf16.vlgmr.msra.gmra.mxu3 %v509_v63  ;;  %863 = vmatpush.bf16.msrb.mxu2 %v1530_v62  ;;  %v1546_v62 = vld [vmem:[#allocation2 + $0x238] sm:$0xff]  ;;  %v609_v63 = vor.u32 %v608_v50, %v605_v49 }
  0x30   : > { %972 = vmatpush.bf16.msrb.mxu3 %v1538_v0  ;;  %v617_v0 = vor.u32 %v616_v52, %v613_v51 }
  0x31   : > { %670 = vmatpush.bf16.msrb.mxu0 %v1513_v1  ;;  %v1523_v1 = vld [vmem:[#allocation2 + $0x180] sm:$0xff] }
  0x32   : > { %759 = vmatpush.bf16.msrb.mxu1 %v1521_v2  ;;  %v1531_v2 = vld [vmem:[#allocation2 + $0x1c0] sm:$0xff] }
  0x33   : > { %864 = vmatpush.bf16.msrb.mxu2 %v1529_v3  ;;  %v810_v3 = vrot.slane %v1734_v32, 2 }
  0x34   : > { %973 = vmatpush.bf16.msrb.mxu3 %v1537_v4  ;;  %v811_v4 = vrot.slane %v808_v53, 2 }
  0x35   : > { %671 = vmatpush.bf16.msrb.mxu0 %v1512_v5 }
  0x36   : > { %760 = vmatpush.bf16.msrb.mxu1 %v1520_v6  ;;  %v920_v6 = vor.u32 %v919_v59, %v916_v58 }
  0x37   : > { %865 = vmatpush.bf16.msrb.mxu2 %v1528_v7  ;;  %v706_v7 = vpack.c.b16 %v1682_v20, %v1695_v34  ;;  %v1543_v20 = vld [vmem:[#allocation2 + $0x220] sm:$0xff]  ;;  %v1542_v34 = vld [vmem:[#allocation2 + $0x218] sm:$0xff] }
  0x38   : > { %974 = vmatpush.bf16.msrb.mxu3 %v1536_v8  ;;  %v618_v8 = vsel %vm601_vm3, %v609_v63, %v617_v0 }
  0x39   : > { %672 = vmatpush.bf16.msrb.mxu0 %v1511_v9  ;;  %v812_v9 = vsel %vm809_vm4, %v810_v3, %v811_v4 }
  0x3a   : > { %761 = vmatpush.bf16.msrb.mxu1 %v1519_v10 }
  0x3b   : > { %866 = vmatpush.bf16.msrb.mxu2 %v1527_v17  ;;  %v1541_v17 = vld [vmem:[#allocation2 + $0x210] sm:$0xff] }
  0x3c   : > { %975 = vmatpush.bf16.msrb.mxu3 %v1535_v18  ;;  %313 = vmatmul.bf16.gmra.mxu0 %v249_v26  ;;  %v993_v18 = vld [vmem:[%s1675_s24 + $0x4] sm:$0x8] }
  0x3d   : > { %673 = vmatpush.bf16.msrb.mxu0 %v1510_v24  ;;  %382 = vmatmul.bf16.gmra.mxu1 %v318_v27  ;;  %v1011_v21 = vunpack.c.l.b16 %v993_v18 }
  0x3e   : > { %762 = vmatpush.bf16.msrb.mxu1 %v1518_v25  ;;  %474 = vmatmul.bf16.gmra.mxu2 %v409_v55  ;;  %v1532_v55 = vld [vmem:[#allocation2 + $0x1c8] sm:$0xff] }
  0x3f   : > { %573 = vmatmul.bf16.gmra.mxu3 %v508_v57  ;;  %867 = vmatpush.bf16.msrb.mxu2 %v1526_v28  ;;  %v911_v57 = vrot.slane %v909_v45, 3  ;;  %v1012_v23 = vpack.c.b16 %v1553_v19, %v1011_v21 }
  0x40   : > { %976 = vmatpush.bf16.msrb.mxu3 %v1534_v29 }
  0x41   : > { %674 = vmatpush.bf16.msrb.mxu0 %v1509_v35  ;;  %v912_v5 = vor.u32 %v911_v57, %v908_v56  ;;  %v1013_v24 = vrot.slane %v1012_v23, 3 }
  0x42   : > { %763 = vmatpush.bf16.msrb.mxu1 %v1517_v36 }
  0x43   : > { %868 = vmatpush.bf16.msrb.mxu2 %v1525_v42  ;;  %v921_v10 = vsel %vm904_vm5, %v912_v5, %v920_v6  ;;  %v1015_v25 = vsel %vm506_vm2, %v1013_v24, %v1014_v15 }
  0x44   : > { %977 = vmatpush.bf16.msrb.mxu3 %v1533_v43 }
  0x45   : > { %675 = vmatpush.bf16.msrb.mxu0 %v1508_v46 }
  0x46   : > { %764 = vmatpush.bf16.msrb.mxu1 %v1516_v48 }
  0x47   : > { %869 = vmatpush.bf16.msrb.mxu2 %v1524_v54 }
  0x48   : > { %978 = vmatpush.bf16.msrb.mxu3 %v1532_v55 }
  0x49   : > { %676 = vmatpush.bf16.msrb.mxu0 %v1507_v60 }
  0x4a   : > { %765 = vmatpush.bf16.msrb.mxu1 %v1515_v61 }
  0x4b   : > { %870 = vmatpush.bf16.msrb.mxu2 %v1523_v1 }
  0x4c   : > { %979 = vmatpush.bf16.msrb.mxu3 %v1531_v2  ;;  %677 = vmatmul.bf16.vlgmr.msrb.gmra.mxu0 %v618_v8  ;;  %v1592_v8 = vld [vmem:[%s1774_s2] ss:$0 sm:$0xff] }
  0x4d   : > { %1066 = vmatpush.bf16.msra.mxu0 %v1546_v62  ;;  %766 = vmatmul.bf16.vlgmr.msrb.gmra.mxu1 %v706_v7 }
  0x4e   : > { %1561 = vmatpush.bf16.msra.mxu1 %v1546_v62  ;;  %871 = vmatmul.bf16.vlgmr.msrb.gmra.mxu2 %v812_v9 }
  0x4f   : > { %980 = vmatmul.bf16.vlgmr.msrb.gmra.mxu3 %v921_v10 }
  0x51   : > { %1067 = vmatpush.bf16.msra.mxu0 %v1545_v11 }
  0x52   : > { %1562 = vmatpush.bf16.msra.mxu1 %v1545_v11 }
  0x55   : > { %1068 = vmatpush.bf16.msra.mxu0 %v1544_v13 }
  0x56   : > { %1563 = vmatpush.bf16.msra.mxu1 %v1544_v13 }
  0x59   : > { %1069 = vmatpush.bf16.msra.mxu0 %v1543_v20 }
  0x5a   : > { %1564 = vmatpush.bf16.msra.mxu1 %v1543_v20 }
  0x5c   : > { %682 = vmatmul.bf16.gmra.mxu0 %v617_v0 }
  0x5d   : > { %1070 = vmatpush.bf16.msra.mxu0 %v1542_v34  ;;  %771 = vmatmul.bf16.gmra.mxu1 %v707_v14 }
  0x5e   : > { %1565 = vmatpush.bf16.msra.mxu1 %v1542_v34  ;;  %876 = vmatmul.bf16.gmra.mxu2 %v811_v4 }
  0x5f   : > { %985 = vmatmul.bf16.gmra.mxu3 %v920_v6 }
  0x61   : > { %1071 = vmatpush.bf16.msra.mxu0 %v1541_v17 }
  0x62   : > { %1566 = vmatpush.bf16.msra.mxu1 %v1541_v17 }
  0x65   : > { %1072 = vmatpush.bf16.msra.mxu0 %v1540_v22 }
  0x66   : > { %1567 = vmatpush.bf16.msra.mxu1 %v1540_v22 }
  0x69   : > { %1073 = vmatpush.bf16.msra.mxu0 %v1539_v16 }
  0x6a   : > { %1568 = vmatpush.bf16.msra.mxu1 %v1539_v16 }
  0x6c   : > { %1074 = vmatmul.bf16.vlgmr.msra.gmra.mxu0 %v1015_v25 }
  0x6d   : > { %1079 = vmatmul.bf16.vlgmr.msra.gmra.mxu1 %v1014_v15 }
  0xa9   : > { %v309_v26 = vpop.f32.mrf.mxu0 }
  0xaa   : > { %v378_v27 = vpop.f32.mrf.mxu1 }
  0xab   : > { %v379_v48 = vadd.f32 %v378_v27, %v309_v26 }
  0xb1   : > { %v470_v28 = vpop.f32.mrf.mxu2  ;;  %v311_v31 = vpop.f32.mrf.mxu0 }
  0xb2   : > { %v569_v29 = vpop.f32.mrf.mxu3  ;;  %v380_v32 = vpop.f32.mrf.mxu1  ;;  %v479_v54 = vadd.f32 %v470_v28, %v379_v48 }
  0xb3   : > { %v381_v56 = vadd.f32 %v380_v32, %v311_v31 }
  0xb4   : > { %v578_v57 = vadd.f32 %v569_v29, %v479_v54 }
  0xb9   : > { %v472_v12 = vpop.f32.mrf.mxu2  ;;  %v314_v35 = vpop.f32.mrf.mxu0 }
  0xba   : > { %v571_v19 = vpop.f32.mrf.mxu3  ;;  %v383_v36 = vpop.f32.mrf.mxu1  ;;  %v480_v59 = vadd.f32 %v472_v12, %v381_v56 }
  0xbb   : > { %v384_v46 = vadd.f32 %v383_v36, %v314_v35 }
  0xbc   : > { %v579_v2 = vadd.f32 %v571_v19, %v480_v59 }
  0xc1   : > { %v475_v37 = vpop.f32.mrf.mxu2  ;;  %v316_v39 = vpop.f32.mrf.mxu0 }
  0xc2   : > { %v574_v38 = vpop.f32.mrf.mxu3  ;;  %v385_v33 = vpop.f32.mrf.mxu1  ;;  %v481_v49 = vadd.f32 %v475_v37, %v384_v46 }
  0xc4   : > { %v580_v55 = vadd.f32 %v574_v38, %v481_v49 }
  0xc9   : > { %v477_v40 = vpop.f32.mrf.mxu2  ;;  %v678_v42 = vpop.f32.mrf.mxu0 }
  0xca   : > { %v576_v41 = vpop.f32.mrf.mxu3  ;;  %v767_v43 = vpop.f32.mrf.mxu1  ;;  %v687_v60 = vadd.f32 %v678_v42, %v578_v57 }
  0xcc   : > { %v776_v3 = vadd.f32 %v767_v43, %v687_v60 }
  0xd1   : > { %v872_v44 = vpop.f32.mrf.mxu2  ;;  %v680_v30 = vpop.f32.mrf.mxu0 }
  0xd2   : > { %v981_v45 = vpop.f32.mrf.mxu3  ;;  %v769_v47 = vpop.f32.mrf.mxu1  ;;  %v881_v5 = vadd.f32 %v872_v44, %v776_v3  ;;  %v688_v6 = vadd.f32 %v680_v30, %v579_v2 }
  0xd4   : > { %v777_v20 = vadd.f32 %v769_v47, %v688_v6  ;;  %v990_v34 = vadd.f32 %v981_v45, %v881_v5 }
  0xd9   : > { %v874_v50 = vpop.f32.mrf.mxu2  ;;  %v683_v52 = vpop.f32.mrf.mxu0 }
  0xda   : > { %v983_v51 = vpop.f32.mrf.mxu3  ;;  %v772_v53 = vpop.f32.mrf.mxu1  ;;  %v689_v58 = vadd.f32 %v683_v52, %v580_v55  ;;  %v882_v17 = vadd.f32 %v874_v50, %v777_v20 }
  0xdc   : > { %v778_v1 = vadd.f32 %v772_v53, %v689_v58  ;;  %v991_v23 = vadd.f32 %v983_v51, %v882_v17 }
  0xe1   : > { %v877_v61 = vpop.f32.mrf.mxu2  ;;  %v685_v63 = vpop.f32.mrf.mxu0 }
  0xe2   : > { %v986_v62 = vpop.f32.mrf.mxu3  ;;  %v774_v0 = vpop.f32.mrf.mxu1  ;;  %v883_v4 = vadd.f32 %v877_v61, %v778_v1 }
  0xe4   : > { %v992_v7 = vadd.f32 %v986_v62, %v883_v4 }
  0xe9   : > { %v879_v9 = vpop.f32.mrf.mxu2  ;;  %v1075_v11 = vpop.f32.mrf.mxu0 }
  0xea   : > { %v988_v10 = vpop.f32.mrf.mxu3  ;;  %v1080_v13 = vpop.f32.mrf.mxu1  ;;  %v1084_v18 = vadd.f32 %v1075_v11, %v990_v34 }
  0xeb   : > { %v1086_v14 = vadd.f32 %v1080_v13, %v992_v7 }
  0xec   : > { %v1091_v16 = vadd.f32 %v1592_v8, %v1084_v18 }
  0xed   : > { %v1093_v21 = vadd.f32 %v1592_v8, %v1086_v14 }
  0xee   : > { %v1097_v28 = vmul.f32 0.2, %v1091_v16  ;;  %vm1094_vm7 = vcmp.ge.f32.partialorder %v1091_v16, 0.0 }
  0xef   : > { %vm1096_vm6 = vcmp.ge.f32.partialorder %v1093_v21, 0.0  ;;  %v1099_v22 = vmul.f32 0.2, %v1093_v21 }
  0xf0   : > { %v1100_v32 = vsel %vm1094_vm7, %v1091_v16, %v1097_v28 }
  0xf1   : > { %v1102_v24 = vsel %vm1096_vm6, %v1093_v21, %v1099_v22  ;;  %v1077_v25 = vpop.f32.mrf.mxu0 }
  0xf2   : > { %v1105_v15 = vpack.c.bf16 %v1102_v24, %v1102_v24  ;;  %v1082_v26 = vpop.f32.mrf.mxu1  ;;  %v1085_v27 = vadd.f32 %v1077_v25, %v991_v23 }
  0xf4   : > { %1108 = vst [vmem:[%s187_s30 + $0x8] sm:$0xf] %v1105_v15  ;;  %v1092_v29 = vadd.f32 %v1592_v8, %v1085_v27 }
  0xf6   : > { %vm1095_vm8 = vcmp.ge.f32.partialorder %v1092_v29, 0.0  ;;  %v1098_v31 = vmul.f32 0.2, %v1092_v29 }
  0xf8   : > { %v1101_v12 = vsel %vm1095_vm8, %v1092_v29, %v1098_v31 }
  0xf9   : > { %v1558_v19 = vpack.c.bf16 %v1101_v12, %v1100_v32 }
  0xfb   : > { %1559 = vst [vmem:[%s187_s30] sm:$0xff] %v1558_v19  }
  0xfc PF: > { %s14_s12 = sadd.s32 1, %s1633_s12  }
  0xfd   : > { %p11_p7 = scmp.ge.s32.totalorder %s14_s12, 4  }
  0xff   :  { %13 = sbr.rel (!%p11_p7) target bundleno = 1 (0x1), region = 67 }
 0x104   :  { %1130 = vsyncpa [#allocation3], 1 }
 0x105   :  { %1132 = vsyncpa [#allocation3 + $0x1], 1 }

// kernel: generator_forward.6
= control target key start
LH: loop header
LB: loop body
LE: loop exit
PB: predicated region body
PF: predicated region fallthrough
CT: control target
= control target key end

     0   :  { %s2127_s12 = smov 0   ;;  %s2641_s0 = inlined_call_operand.vmem [shape: bf16[2,102,128], index: 0, kind: input, shape index: {}]   ;;  %s2642_s1 = inlined_call_operand.vmem [shape: bf16[1152,64], index: 1, kind: input, shape index: {}]   ;;  %s2643_s2 = inlined_call_operand.vmem [shape: f32[1,64], index: 2, kind: input, shape index: {}]   ;;  %s2644_s3 = inlined_call_operand.vmem [shape: bf16[2,80,64], index: 3, kind: output, shape index: {}]  }
   0x1 LB: > { %s1636_s13 = sadd.s32 4294967295, %s2105_s12   ;;  %p1640_p0 = scmp.ge.s32.totalorder %s2105_s12, 1  ;;  %s2105_s12 = sphi %s2127_s12, %s13_s12  }
   0x2   : > { %p137_p1 = scmp.lt.s32.totalorder %s2105_s12, 3 }
   0x4   : > { %p138_p2 = pnand %p1640_p0, %p137_p1 }
   0x5   : > { %p161_p3 = scmp.lt.s32.totalorder (!%p138_p2), %s1636_s13, 1 }
   0x6   : > { %141 = sbr.rel (%p138_p2) target bundleno = 376 (0x178), region = 32 }
   0xb   : > { %v2000_v0 = vld [vmem:[%s2642_s1 + $0x78] sm:$0xff]  ;;  %v1999_v1 = vld [vmem:[%s2642_s1 + $0x70] sm:$0xff]  ;;  %s2646_s13 = smov (!%p161_p3, %s1636_s13), 1  ;;  %v1998_v4 = vld [vmem:[%s2642_s1 + $0x68] sm:$0xff]  ;;  %vm242_vm0 = vsmask.f32 7424 }
   0xc   : > { %340 = vmatpush.bf16.msra.mxu0 %v2000_v0  ;;  %2072 = vmatpush.bf16.msra.mxu1 %v2000_v0  ;;  %v2020_v2 = vld [vmem:[%s2642_s1 + $0xf8] sm:$0xff]  ;;  %v2019_v3 = vld [vmem:[%s2642_s1 + $0xf0] sm:$0xff]  ;;  %s2088_s24 = smul.u32 52, %s2646_s13  ;;  %v2018_v5 = vld [vmem:[%s2642_s1 + $0xe8] sm:$0xff]  ;;  %vm481_vm1 = vcmask 1046528   ;;  %vm944_vm4 = vcmask 1045504  }
   0xd   : > { %2073 = vmatpush.bf16.msra.mxu2 %v2000_v0  ;;  %709 = vmatpush.bf16.msra.mxu3 %v2020_v2  ;;  %v1997_v6 = vld [vmem:[%s2642_s1 + $0x60] sm:$0xff]  ;;  %v1996_v9 = vld [vmem:[%s2642_s1 + $0x58] sm:$0xff]  ;;  %v1995_v17 = vld [vmem:[%s2642_s1 + $0x50] sm:$0xff]  ;;  %vm773_vm2 = vsmask.f32 6400  ;;  %vm1407_vm5 = vcmask 1044480  }
   0xe   : > { %s2162_s4 = scalar_lea.vmem %s2641_s0, %s2088_s24  ;;  %v2017_v7 = vld [vmem:[%s2642_s1 + $0xe0] sm:$0xff]  ;;  %v2016_v14 = vld [vmem:[%s2642_s1 + $0xd8] sm:$0xff]  ;;  %v2015_v24 = vld [vmem:[%s2642_s1 + $0xd0] sm:$0xff]  ;;  %vm1236_vm3 = vsmask.f32 5376  ;;  %s2089_s18 = smul.u32 40, %s2646_s13 }
   0xf   : > { %v197_v8 = vld [vmem:[%s2162_s4 + $0x28] sm:$0x1]  ;;  %v2172_v10 = vld [vmem:[%s2162_s4] sm:$0xff]   ;;  %v2175_v11 = vld [vmem:[%s2162_s4 + $0x10] sm:$0xff]  ;;  %vm1570_vm7 = vcmask 519168  }
  0x10   : > { %341 = vmatpush.bf16.msra.mxu0 %v1999_v1  ;;  %2074 = vmatpush.bf16.msra.mxu1 %v1999_v1  ;;  %v2178_v12 = vld [vmem:[%s2162_s4 + $0x20] sm:$0xff]  ;;  %v235_v13 = vunpack.c.l.b16 %v197_v8  ;;  %v2184_v15 = vld [vmem:[%s2162_s4 + $0x8] sm:$0xff]  ;;  %v246_v16 = vshll.u32 %v2172_v10, 16  ;;  %v2191_v18 = vld [vmem:[%s2162_s4 + $0x18] sm:$0xff]  ;;  %v259_v19 = vshll.u32 %v2175_v11, 16  ;;  %v244_v25 = vshrl.u32 %v2172_v10, 16  ;;  %s2599_s21 = scalar_lea.vmem %s2644_s3, %s2089_s18 }
  0x11   : > { %2075 = vmatpush.bf16.msra.mxu2 %v1999_v1  ;;  %710 = vmatpush.bf16.msra.mxu3 %v2019_v3  ;;  %v275_v21 = vshll.u32 %v2178_v12, 16  ;;  %v590_v22 = vld [vmem:[%s2162_s4 + $0x4] sm:$0xe]  ;;  %v2199_v23 = vld [vmem:[%s2162_s4 + $0x8] sm:$0xff]   ;;  %v251_v27 = vshll.u32 %v2184_v15, 16  ;;  %v263_v28 = vshrl.u32 %v2175_v11, 16 }
  0x12   : > { %v2194_v20 = vpack.c.b16 %v235_v13, %v235_v13  ;;  %v248_v26 = vrot.slane %v246_v16, 1  ;;  %v1994_v29 = vld [vmem:[%s2642_s1 + $0x48] sm:$0xff]  ;;  %v2210_v30 = vrot.slane %v259_v19, 1  ;;  %v267_v31 = vshll.u32 %v2191_v18, 16  ;;  %v1993_v39 = vld [vmem:[%s2642_s1 + $0x40] sm:$0xff]  ;;  %v1992_v45 = vld [vmem:[%s2642_s1 + $0x38] sm:$0xff] }
  0x13   : > { %v628_v32 = vunpack.c.l.b16 %v590_v22  ;;  %v629_v33 = vunpack.c.l.b16 %v2199_v23  ;;  %v2214_v34 = vrot.slane %v275_v21, 1  ;;  %v279_v35 = vshrl.u32 %v2178_v12, 16  ;;  %v2014_v37 = vld [vmem:[%s2642_s1 + $0xc8] sm:$0xff]  ;;  %v2008_v48 = vld [vmem:[%s2642_s1 + $0xb8] sm:$0xff]  ;;  %v2013_v52 = vld [vmem:[%s2642_s1 + $0xc0] sm:$0xff] }
  0x14   : > { %342 = vmatpush.bf16.msra.mxu0 %v1998_v4  ;;  %2076 = vmatpush.bf16.msra.mxu1 %v1998_v4  ;;  %v283_v36 = vshll.u32 %v2194_v20, 16  ;;  %v253_v38 = vrot.slane %v251_v27, 1  ;;  %v249_v40 = vor.u32 %v248_v26, %v244_v25  ;;  %v265_v41 = vor.u32 %v263_v28, %v2210_v30  ;;  %v2226_v43 = vld [vmem:[%s2162_s4 + $0xc] sm:$0xff]  ;;  %v2028_v49 = vld [vmem:[%s2642_s1 + $0x138] sm:$0xff]  ;;  %v1989_v3 = vld [vmem:[%s2642_s1 + $0x20] sm:$0xff] }
  0x15   : > { %2077 = vmatpush.bf16.msra.mxu2 %v1998_v4  ;;  %711 = vmatpush.bf16.msra.mxu3 %v2018_v5  ;;  %v269_v42 = vrot.slane %v267_v31, 1  ;;  %v2230_v44 = vpack.c.b16 %v629_v33, %v628_v32  ;;  %v281_v46 = vor.u32 %v279_v35, %v2214_v34  ;;  %v646_v54 = vrot.slane %v2226_v43, 1  ;;  %v1991_v56 = vld [vmem:[%s2642_s1 + $0x30] sm:$0xff]  ;;  %v2056_v57 = vld [vmem:[%s2642_s1 + $0x1f8] sm:$0xff]  ;;  %v1990_v61 = vld [vmem:[%s2642_s1 + $0x28] sm:$0xff] }
  0x16   : > { %v285_v47 = vrot.slane %v283_v36, 1  ;;  %v254_v50 = vsel %vm242_vm0, %v249_v40, %v253_v38  ;;  %v2007_v58 = vld [vmem:[%s2642_s1 + $0xb0] sm:$0xff]  ;;  %v2006_v63 = vld [vmem:[%s2642_s1 + $0xa8] sm:$0xff]  ;;  %v255_v1 = vshrl.u32 %v2184_v15, 16  ;;  %v271_v2 = vshrl.u32 %v2191_v18, 16  ;;  %v2005_v4 = vld [vmem:[%s2642_s1 + $0xa0] sm:$0xff] }
  0x17   : > { %v270_v51 = vsel %vm242_vm0, %v265_v41, %v269_v42  ;;  %v645_v53 = vrot.slane %v2230_v44, 1  ;;  %v2027_v59 = vld [vmem:[%s2642_s1 + $0x130] sm:$0xff]  ;;  %v2026_v0 = vld [vmem:[%s2642_s1 + $0x128] sm:$0xff]  ;;  %v2025_v5 = vld [vmem:[%s2642_s1 + $0x120] sm:$0xff]  ;;  %v775_v27 = vshrl.u32 %v2230_v44, 16  ;;  %v786_v31 = vshll.u32 %v2226_v43, 16 }
  0x18   : > { %343 = vmatpush.bf16.msra.mxu0 %v1997_v6  ;;  %2078 = vmatpush.bf16.msra.mxu1 %v1997_v6  ;;  %v286_v55 = vsel %vm242_vm0, %v281_v46, %v285_v47  ;;  %v2055_v62 = vld [vmem:[%s2642_s1 + $0x1f0] sm:$0xff]  ;;  %v2004_v13 = vld [vmem:[%s2642_s1 + $0x98] sm:$0xff]  ;;  %v2069_v25 = vld [vmem:[%s2162_s4] sm:$0xf0]  ;;  %v483_v46 = vrot.slane %v2184_v15, 1 }
  0x19   : > { %2079 = vmatpush.bf16.msra.mxu2 %v1997_v6  ;;  %712 = vmatpush.bf16.msra.mxu3 %v2017_v7  ;;  %v647_v60 = vsel %vm481_vm1, %v645_v53, %v646_v54  ;;  %v257_v6 = vor.u32 %v255_v1, %v253_v38  ;;  %v273_v7 = vor.u32 %v271_v2, %v269_v42  ;;  %v2287_v8 = vld [vmem:[%s2162_s4 + $0x14] sm:$0xff]  ;;  %v2070_v26 = vld [vmem:[%s2162_s4] sm:$0xe]  ;;  %v2054_v28 = vld [vmem:[%s2642_s1 + $0x1e8] sm:$0xff]  ;;  %v777_v38 = vrot.slane %v775_v27, 1 }
  0x1a   : > { %v648_v19 = vrot.slane %v2287_v8, 1  ;;  %v1987_v21 = vld [vmem:[%s2642_s1 + $0x10] sm:$0xff]  ;;  %v2002_v35 = vld [vmem:[%s2642_s1 + $0x88] sm:$0xff]  ;;  %v788_v41 = vrot.slane %v786_v31, 2  ;;  %v1985_v42 = vld [vmem:[%s2642_s1] sm:$0xff] }
  0x1b   : > { %v262_v16 = vsel %vm242_vm0, %v257_v6, %v2210_v30  ;;  %v2003_v22 = vld [vmem:[%s2642_s1 + $0x90] sm:$0xff]  ;;  %v783_v30 = vshrl.u32 %v2226_v43, 16  ;;  %v2022_v36 = vld [vmem:[%s2642_s1 + $0x108] sm:$0xff]  ;;  %v2021_v47 = vld [vmem:[%s2642_s1 + $0x100] sm:$0xff] }
  0x1c   : > { %344 = vmatpush.bf16.msra.mxu0 %v1996_v9  ;;  %2080 = vmatpush.bf16.msra.mxu1 %v1996_v9  ;;  %v649_v32 = vsel %vm481_vm1, %v646_v54, %v648_v19  ;;  %v2353_v53 = vld [vmem:[%s2162_s4 + $0x1c] sm:$0xff]  ;;  %v2031_v27 = vld [vmem:[%s2642_s1 + $0x150] sm:$0xff] }
  0x1d   : > { %2081 = vmatpush.bf16.msra.mxu2 %v1996_v9  ;;  %713 = vmatpush.bf16.msra.mxu3 %v2016_v14  ;;  %v1988_v9 = vld [vmem:[%s2642_s1 + $0x18] sm:$0xff]  ;;  %v785_v40 = vrot.slane %v783_v30, 1  ;;  %v2033_v6 = vld [vmem:[%s2642_s1 + $0x160] sm:$0xff]  ;;  %v2059_v31 = vld [vmem:[%s2642_s1 + $0x210] sm:$0xff] }
  0x1e   : > { %v2024_v14 = vld [vmem:[%s2642_s1 + $0x118] sm:$0xff] }
  0x1f   : > { %v2052_v2 = vld [vmem:[%s2642_s1 + $0x1d8] sm:$0xff] }
  0x20   : > { %345 = vmatpush.bf16.msra.mxu0 %v1995_v17  ;;  %2082 = vmatpush.bf16.msra.mxu1 %v1995_v17 }
  0x21   : > { %2083 = vmatpush.bf16.msra.mxu2 %v1995_v17  ;;  %714 = vmatpush.bf16.msra.mxu3 %v2015_v24  ;;  %v278_v17 = vsel %vm242_vm0, %v273_v7, %v2214_v34  ;;  %v2023_v24 = vld [vmem:[%s2642_s1 + $0x110] sm:$0xff]  ;;  %v1986_v34 = vld [vmem:[%s2642_s1 + $0x8] sm:$0xff]  ;;  %v2061_v7 = vld [vmem:[%s2642_s1 + $0x220] sm:$0xff] }
  0x24   : > { %346 = vmatpush.bf16.msra.mxu0 %v1994_v29  ;;  %2084 = vmatpush.bf16.msra.mxu1 %v1994_v29 }
  0x25   : > { %2085 = vmatpush.bf16.msra.mxu2 %v1994_v29  ;;  %715 = vmatpush.bf16.msra.mxu3 %v2014_v37  ;;  %v778_v29 = vshll.u32 %v2230_v44, 16  ;;  %v2071_v37 = vor.u32 %v2070_v26, %v2069_v25  ;;  %v2001_v44 = vld [vmem:[%s2642_s1 + $0x80] sm:$0xff]  ;;  %v2060_v25 = vld [vmem:[%s2642_s1 + $0x218] sm:$0xff]  ;;  %v2051_v26 = vld [vmem:[%s2642_s1 + $0x1d0] sm:$0xff] }
  0x28   : > { %347 = vmatpush.bf16.msra.mxu0 %v1993_v39  ;;  %2086 = vmatpush.bf16.msra.mxu1 %v1993_v39 }
  0x29   : > { %2087 = vmatpush.bf16.msra.mxu2 %v1993_v39  ;;  %716 = vmatpush.bf16.msra.mxu3 %v2013_v52  ;;  %v780_v39 = vrot.slane %v778_v29, 2  ;;  %v2064_v52 = vld [vmem:[%s2642_s1 + $0x238] sm:$0xff]  ;;  %v804_v29 = vshll.u32 %v2353_v53, 16 }
  0x2b   : > { %348 = vmatmul.bf16.vlgmr.msra.gmra.mxu0 %v254_v50  ;;  %358 = vmatmul.bf16.vlgmr.msra.gmra.mxu1 %v270_v51  ;;  %v781_v50 = vor.u32 %v780_v39, %v777_v38  ;;  %v789_v51 = vor.u32 %v788_v41, %v785_v40  ;;  %v487_v38 = vrot.slane %v2191_v18, 1 }
  0x2c   : > { %427 = vmatpush.bf16.msrb.mxu1 %v1992_v45  ;;  %880 = vmatpush.bf16.msrb.mxu0 %v2028_v49  ;;  %v482_v45 = vrot.slane %v2071_v37, 1  ;;  %v2036_v49 = vld [vmem:[%s2642_s1 + $0x178] sm:$0xff] }
  0x2d   : > { %546 = vmatpush.bf16.msrb.mxu2 %v2008_v48  ;;  %1343 = vmatpush.bf16.msrb.mxu3 %v2056_v57  ;;  %v2048_v48 = vld [vmem:[%s2642_s1 + $0x1b8] sm:$0xff]  ;;  %v2035_v57 = vld [vmem:[%s2642_s1 + $0x170] sm:$0xff] }
  0x2e   : > { %368 = vmatmul.bf16.vlgmr.msra.gmra.mxu2 %v286_v55  ;;  %717 = vmatmul.bf16.vlgmr.msra.gmra.mxu3 %v647_v60  ;;  %v484_v54 = vsel %vm481_vm1, %v482_v45, %v483_v46  ;;  %v790_v55 = vsel %vm773_vm2, %v781_v50, %v789_v51  ;;  %v2053_v60 = vld [vmem:[%s2642_s1 + $0x1e0] sm:$0xff] }
  0x30   : > { %428 = vmatpush.bf16.msrb.mxu1 %v1991_v56  ;;  %881 = vmatpush.bf16.msrb.mxu0 %v2027_v59  ;;  %v2047_v56 = vld [vmem:[%s2642_s1 + $0x1b0] sm:$0xff] }
  0x31   : > { %547 = vmatpush.bf16.msrb.mxu2 %v2007_v58  ;;  %1344 = vmatpush.bf16.msrb.mxu3 %v2055_v62  ;;  %v650_v58 = vrot.slane %v2353_v53, 1  ;;  %v2063_v59 = vld [vmem:[%s2642_s1 + $0x230] sm:$0xff]  ;;  %v795_v62 = vshll.u32 %v2287_v8, 16 }
  0x33   : > { %v651_v1 = vsel %vm481_vm1, %v648_v19, %v650_v58 }
  0x34   : > { %429 = vmatpush.bf16.msrb.mxu1 %v1990_v61  ;;  %882 = vmatpush.bf16.msrb.mxu0 %v2026_v0  ;;  %v792_v61 = vshrl.u32 %v2287_v8, 16  ;;  %v2034_v0 = vld [vmem:[%s2642_s1 + $0x168] sm:$0xff] }
  0x35   : > { %548 = vmatpush.bf16.msrb.mxu2 %v2006_v63  ;;  %1345 = vmatpush.bf16.msrb.mxu3 %v2054_v28  ;;  %v2046_v63 = vld [vmem:[%s2642_s1 + $0x1a8] sm:$0xff]  ;;  %v801_v28 = vshrl.u32 %v2353_v53, 16 }
  0x38   : > { %430 = vmatpush.bf16.msrb.mxu1 %v1989_v3  ;;  %883 = vmatpush.bf16.msrb.mxu0 %v2025_v5  ;;  %v794_v3 = vrot.slane %v792_v61, 1  ;;  %v2045_v5 = vld [vmem:[%s2642_s1 + $0x1a0] sm:$0xff] }
  0x39   : > { %549 = vmatpush.bf16.msrb.mxu2 %v2005_v4  ;;  %1346 = vmatpush.bf16.msrb.mxu3 %v2053_v60  ;;  %v797_v4 = vrot.slane %v795_v62, 2  ;;  %v753_v60 = vld [vmem:[%s2162_s4 + $0x2c] sm:$0x3] }
  0x3b   : > { %353 = vmatmul.bf16.gmra.mxu0 %v262_v16  ;;  %363 = vmatmul.bf16.gmra.mxu1 %v278_v17  ;;  %v2402_v16 = vld [vmem:[%s2162_s4 + $0x24] sm:$0xff]  ;;  %v2032_v17 = vld [vmem:[%s2642_s1 + $0x158] sm:$0xff] }
  0x3c   : > { %431 = vmatpush.bf16.msrb.mxu1 %v1988_v9  ;;  %884 = vmatpush.bf16.msrb.mxu0 %v2024_v14  ;;  %v485_v9 = vrot.slane %v2175_v11, 1  ;;  %v2044_v14 = vld [vmem:[%s2642_s1 + $0x198] sm:$0xff]  ;;  %v813_v50 = vshll.u32 %v2402_v16, 16 }
  0x3d   : > { %550 = vmatpush.bf16.msrb.mxu2 %v2004_v13  ;;  %1347 = vmatpush.bf16.msrb.mxu3 %v2052_v2  ;;  %v798_v13 = vor.u32 %v797_v4, %v794_v3  ;;  %v771_v2 = vunpack.c.l.b16 %v753_v60 }
  0x3e   : > { %722 = vmatmul.bf16.gmra.mxu3 %v649_v32  ;;  %v486_v19 = vsel %vm481_vm1, %v483_v46, %v485_v9  ;;  %v600_v32 = vld [vmem:[%s2162_s4 + $0x2c] sm:$0x1]  ;;  %v488_v41 = vsel %vm481_vm1, %v485_v9, %v487_v38  ;;  %v2057_v9 = vld [vmem:[%s2642_s1 + $0x200] sm:$0xff] }
  0x3f   : > { %v638_v37 = vunpack.c.l.b16 %v600_v32 }
  0x40   : > { %432 = vmatpush.bf16.msrb.mxu1 %v1987_v21  ;;  %885 = vmatpush.bf16.msrb.mxu0 %v2023_v24  ;;  %v799_v21 = vsel %vm773_vm2, %v789_v51, %v798_v13  ;;  %v2043_v24 = vld [vmem:[%s2642_s1 + $0x190] sm:$0xff]  ;;  %v2041_v51 = vld [vmem:[%s2642_s1 + $0x180] sm:$0xff] }
  0x41   : > { %551 = vmatpush.bf16.msrb.mxu2 %v2003_v22  ;;  %v652_v22 = vrot.slane %v2402_v16, 1  ;;  %1348 = vmatpush.bf16.msrb.mxu3 %v2051_v26  ;;  %v644_v40 = vpack.c.b16 %v638_v37, %v638_v37  ;;  %v1387_v37 = vld [vmem:[%s2162_s4 + $0x8] sm:$0x8] }
  0x43   : > { %v653_v30 = vsel %vm481_vm1, %v650_v58, %v652_v22  ;;  %v654_v45 = vrot.slane %v644_v40, 1 }
  0x44   : > { %433 = vmatpush.bf16.msrb.mxu1 %v1986_v34  ;;  %886 = vmatpush.bf16.msrb.mxu0 %v2022_v36  ;;  %v2050_v34 = vld [vmem:[%s2642_s1 + $0x1c8] sm:$0xff]  ;;  %v806_v36 = vrot.slane %v804_v29, 2 }
  0x45   : > { %552 = vmatpush.bf16.msrb.mxu2 %v2002_v35  ;;  %v803_v35 = vrot.slane %v801_v28, 1  ;;  %1349 = vmatpush.bf16.msrb.mxu3 %v2050_v34 }
  0x47   : > { %v807_v39 = vor.u32 %v806_v36, %v803_v35  ;;  %v924_v35 = vld [vmem:[%s2162_s4 + $0x4] sm:$0xc] }
  0x48   : > { %434 = vmatpush.bf16.msrb.mxu1 %v1985_v42  ;;  %887 = vmatpush.bf16.msrb.mxu0 %v2021_v47  ;;  %v1053_v42 = vld [vmem:[%s2162_s4 + $0x8] sm:$0xc]  ;;  %v1092_v47 = vunpack.c.h.b16 %v2199_v23 }
  0x49   : > { %553 = vmatpush.bf16.msrb.mxu2 %v2001_v44  ;;  %v808_v44 = vsel %vm773_vm2, %v798_v13, %v807_v39  ;;  %v1091_v46 = vunpack.c.l.b16 %v1053_v42 }
  0x4b   : > { %435 = vmatmul.bf16.vlgmr.msrb.gmra.mxu1 %v2172_v10  ;;  %888 = vmatmul.bf16.vlgmr.msrb.gmra.mxu0 %v790_v55  ;;  %v2062_v10 = vld [vmem:[%s2642_s1 + $0x228] sm:$0xff]  ;;  %v2029_v55 = vld [vmem:[%s2642_s1 + $0x140] sm:$0xff] }
  0x4c   : > { %1009 = vmatpush.bf16.msra.mxu1 %v2036_v49  ;;  %1472 = vmatpush.bf16.msra.mxu0 %v2064_v52  ;;  %v810_v49 = vshrl.u32 %v2402_v16, 16  ;;  %v2058_v52 = vld [vmem:[%s2642_s1 + $0x208] sm:$0xff] }
  0x4d   : > { %1172 = vmatpush.bf16.msra.mxu2 %v2048_v48  ;;  %v2030_v48 = vld [vmem:[%s2642_s1 + $0x148] sm:$0xff] }
  0x4e   : > { %554 = vmatmul.bf16.vlgmr.msrb.gmra.mxu2 %v484_v54  ;;  %727 = vmatmul.bf16.gmra.mxu3 %v651_v1  ;;  %v2049_v54 = vld [vmem:[%s2642_s1 + $0x1c0] sm:$0xff]  ;;  %v812_v58 = vrot.slane %v810_v49, 1  ;;  %v489_v1 = vrot.slane %v2178_v12, 1  ;;  %v946_v49 = vrot.slane %v2226_v43, 2  ;;  %v2514_v43 = vld [vmem:[%s2162_s4 + $0x28] sm:$0xff] }
  0x4f   : > { %1350 = vmatpush.bf16.msrb.mxu3 %v2049_v54 }
  0x50   : > { %1010 = vmatpush.bf16.msra.mxu1 %v2035_v57  ;;  %1473 = vmatpush.bf16.msra.mxu0 %v2063_v59  ;;  %v2465_v57 = vpack.c.b16 %v1092_v47, %v1091_v46  ;;  %v815_v59 = vrot.slane %v813_v50, 2 }
  0x51   : > { %1173 = vmatpush.bf16.msra.mxu2 %v2047_v56  ;;  %v2461_v56 = vld [vmem:[%s2162_s4 + $0x10] sm:$0xff] }
  0x52   : > { %v1238_v61 = vshrl.u32 %v2465_v57, 16  ;;  %v1241_v62 = vshll.u32 %v2465_v57, 16  ;;  %v1109_v46 = vrot.slane %v2461_v56, 2 }
  0x54   : > { %1011 = vmatpush.bf16.msra.mxu1 %v2034_v0  ;;  %1474 = vmatpush.bf16.msra.mxu0 %v2062_v10  ;;  %v1249_v0 = vshll.u32 %v2461_v56, 16  ;;  %v816_v10 = vor.u32 %v815_v59, %v812_v58  ;;  %v1240_v3 = vrot.slane %v1238_v61, 2  ;;  %v1243_v4 = vrot.slane %v1241_v62, 3 }
  0x55   : > { %1174 = vmatpush.bf16.msra.mxu2 %v2046_v63  ;;  %v1246_v63 = vshrl.u32 %v2461_v56, 16  ;;  %v948_v59 = vrot.slane %v2287_v8, 2 }
  0x56   : > { %v817_v13 = vsel %vm773_vm2, %v807_v39, %v816_v10  ;;  %v1405_v39 = vunpack.c.l.b16 %v1387_v37 }
  0x58   : > { %1012 = vmatpush.bf16.msra.mxu1 %v2033_v6  ;;  %1475 = vmatpush.bf16.msra.mxu0 %v2061_v7  ;;  %v1251_v6 = vrot.slane %v1249_v0, 3  ;;  %v490_v7 = vsel %vm481_vm1, %v487_v38, %v489_v1  ;;  %v942_v38 = vunpack.c.l.b16 %v924_v35  ;;  %v1406_v42 = vpack.c.b16 %v1092_v47, %v1405_v39  ;;  %v1216_v0 = vld [vmem:[%s2162_s4 + $0x30] sm:$0x7] }
  0x59   : > { %1175 = vmatpush.bf16.msra.mxu2 %v2045_v5  ;;  %v1248_v5 = vrot.slane %v1246_v63, 2  ;;  %v952_v39 = vrot.slane %v2402_v16, 2 }
  0x5a   : > { %v1408_v50 = vrot.slane %v1406_v42, 3 }
  0x5b   : > { %440 = vmatmul.bf16.gmra.mxu1 %v2184_v15  ;;  %893 = vmatmul.bf16.gmra.mxu0 %v799_v21  ;;  %v2042_v15 = vld [vmem:[%s2642_s1 + $0x188] sm:$0xff] }
  0x5c   : > { %1013 = vmatpush.bf16.msra.mxu1 %v2032_v17  ;;  %1476 = vmatpush.bf16.msra.mxu0 %v2060_v25  ;;  %v1244_v17 = vor.u32 %v1243_v4, %v1240_v3  ;;  %v2485_v25 = vld [vmem:[%s2162_s4 + $0x18] sm:$0xff] }
  0x5d   : > { %1176 = vmatpush.bf16.msra.mxu2 %v2044_v14  ;;  %v2478_v14 = vpack.c.b16 %v771_v2, %v771_v2  ;;  %v1255_v28 = vshrl.u32 %v2485_v25, 16  ;;  %v1258_v29 = vshll.u32 %v2485_v25, 16  ;;  %v1111_v58 = vrot.slane %v2485_v25, 2 }
  0x5e   : > { %559 = vmatmul.bf16.gmra.mxu2 %v486_v19  ;;  %732 = vmatmul.bf16.gmra.mxu3 %v653_v30  ;;  %v1252_v19 = vor.u32 %v1251_v6, %v1248_v5  ;;  %v1411_v60 = vrot.slane %v2485_v25, 3  ;;  %v949_v2 = vsel %vm944_vm4, %v946_v49, %v948_v59  ;;  %v1234_v5 = vunpack.c.l.b16 %v1216_v0 }
  0x5f   : > { %v819_v21 = vshrl.u32 %v2478_v14, 16  ;;  %v1112_v63 = vsel %vm944_vm4, %v1109_v46, %v1111_v58 }
  0x60   : > { %1014 = vmatpush.bf16.msra.mxu1 %v2031_v27  ;;  %1477 = vmatpush.bf16.msra.mxu0 %v2059_v31  ;;  %v1260_v31 = vrot.slane %v1258_v29, 3  ;;  %v2528_v6 = vpack.c.b16 %v1234_v5, %v1234_v5 }
  0x61   : > { %1177 = vmatpush.bf16.msra.mxu2 %v2043_v24  ;;  %v1253_v24 = vsel %vm1236_vm3, %v1244_v17, %v1252_v19  ;;  %v821_v26 = vrot.slane %v819_v21, 1 }
  0x62   : > { %v1285_v17 = vshll.u32 %v2528_v6, 16 }
  0x64   : > { %1015 = vmatpush.bf16.msra.mxu1 %v2030_v48  ;;  %1478 = vmatpush.bf16.msra.mxu0 %v2058_v52 }
  0x65   : > { %1178 = vmatpush.bf16.msra.mxu2 %v2042_v15  ;;  %v1257_v15 = vrot.slane %v1255_v28, 2 }
  0x67   : > { %v1261_v36 = vor.u32 %v1260_v31, %v1257_v15 }
  0x68   : > { %1016 = vmatpush.bf16.msra.mxu1 %v2029_v55  ;;  %1479 = vmatpush.bf16.msra.mxu0 %v2057_v9 }
  0x69   : > { %1179 = vmatpush.bf16.msra.mxu2 %v2041_v51  ;;  %v1262_v40 = vsel %vm1236_vm3, %v1252_v19, %v1261_v36 }
  0x6b   : > { %445 = vmatmul.bf16.gmra.mxu1 %v2175_v11  ;;  %898 = vmatmul.bf16.gmra.mxu0 %v808_v44  ;;  %v655_v11 = vsel %vm481_vm1, %v652_v22, %v654_v45  ;;  %v822_v22 = vshll.u32 %v2478_v14, 16 }
  0x6d   : > { %v824_v27 = vrot.slane %v822_v22, 2  ;;  %v950_v22 = vrot.slane %v2353_v53, 2 }
  0x6e   : > { %564 = vmatmul.bf16.gmra.mxu2 %v488_v41  ;;  %737 = vmatmul.bf16.gmra.mxu3 %v655_v11  ;;  %v2497_v41 = vld [vmem:[%s2162_s4 + $0x20] sm:$0xff] }
  0x6f   : > { %v825_v30 = vor.u32 %v824_v27, %v821_v26  ;;  %v1264_v44 = vshrl.u32 %v2497_v41, 16  ;;  %v1267_v45 = vshll.u32 %v2497_v41, 16  ;;  %v1113_v19 = vrot.slane %v2497_v41, 2 }
  0x70   : > { %v1287_v26 = vrot.slane %v1285_v17, 3 }
  0x71   : > { %v826_v34 = vsel %vm773_vm2, %v816_v10, %v825_v30  ;;  %v1266_v51 = vrot.slane %v1264_v44, 2  ;;  %v1269_v52 = vrot.slane %v1267_v45, 3  ;;  %v1114_v27 = vsel %vm944_vm4, %v1111_v58, %v1113_v19 }
  0x72   : > { %v953_v45 = vsel %vm944_vm4, %v950_v22, %v952_v39 }
  0x73   : > { %v1270_v11 = vor.u32 %v1269_v52, %v1266_v51 }
  0x75   : > { %v1271_v55 = vsel %vm1236_vm3, %v1261_v36, %v1270_v11  ;;  %v1115_v36 = vrot.slane %v2514_v43, 2 }
  0x7b   : > { %450 = vmatmul.bf16.gmra.mxu1 %v2191_v18  ;;  %903 = vmatmul.bf16.gmra.mxu0 %v817_v13  ;;  %v491_v18 = vrot.slane %v2194_v20, 1  ;;  %v943_v20 = vpack.c.b16 %v629_v33, %v942_v38  ;;  %v1409_v33 = vrot.slane %v2461_v56, 3  ;;  %v1273_v56 = vshrl.u32 %v2514_v43, 16 }
  0x7c   : > { %v1282_v13 = vshrl.u32 %v2528_v6, 16 }
  0x7d   : > { %v492_v32 = vsel %vm481_vm1, %v489_v1, %v491_v18  ;;  %v945_v48 = vrot.slane %v943_v20, 2  ;;  %v1410_v54 = vsel %vm1407_vm5, %v1408_v50, %v1409_v33  ;;  %v1275_v61 = vrot.slane %v1273_v56, 2  ;;  %v1063_v20 = vld [vmem:[%s2162_s4 + $0x30] sm:$0x3] }
  0x7e   : > { %569 = vmatmul.bf16.gmra.mxu2 %v490_v7  ;;  %1351 = vmatmul.bf16.vlgmr.msrb.gmra.mxu3 %v1253_v24  ;;  %v1412_v3 = vsel %vm1407_vm5, %v1409_v33, %v1411_v60  ;;  %v1413_v24 = vrot.slane %v2497_v41, 3  ;;  %v1284_v25 = vrot.slane %v1282_v13, 2  ;;  %v951_v18 = vsel %vm944_vm4, %v948_v59, %v950_v22 }
  0x7f   : > { %v947_v47 = vsel %vm944_vm4, %v945_v48, %v946_v49  ;;  %v1116_v41 = vsel %vm944_vm4, %v1113_v19, %v1115_v36  ;;  %v1101_v48 = vunpack.c.l.b16 %v1063_v20  ;;  %v954_v56 = vrot.slane %v2478_v14, 2 }
  0x80   : > { %v1414_v30 = vsel %vm1407_vm5, %v1411_v60, %v1413_v24  ;;  %v1288_v15 = vor.u32 %v1287_v26, %v1284_v25 }
  0x81   : > { %v1107_v16 = vpack.c.b16 %v1101_v48, %v1101_v48 }
  0x8b   : > { %455 = vmatmul.bf16.gmra.mxu1 %v2178_v12  ;;  %908 = vmatmul.bf16.gmra.mxu0 %v826_v34  ;;  %v1108_v12 = vrot.slane %v2465_v57, 2  ;;  %v1276_v57 = vshll.u32 %v2514_v43, 16 }
  0x8d   : > { %v1110_v23 = vsel %vm944_vm4, %v1108_v12, %v1109_v46  ;;  %v1278_v62 = vrot.slane %v1276_v57, 3  ;;  %v1417_v57 = vrot.slane %v2528_v6, 3 }
  0x8e   : > { %574 = vmatmul.bf16.gmra.mxu2 %v492_v32  ;;  %1356 = vmatmul.bf16.gmra.mxu3 %v1262_v40  ;;  %v1415_v40 = vrot.slane %v2514_v43, 3 }
  0x8f   : > { %v1279_v4 = vor.u32 %v1278_v62, %v1275_v61 }
  0x90   : > { %v1416_v12 = vsel %vm1407_vm5, %v1413_v24, %v1415_v40  ;;  %v1418_v0 = vsel %vm1407_vm5, %v1415_v40, %v1417_v57 }
  0x91   : > { %v1280_v8 = vsel %vm1236_vm3, %v1270_v11, %v1279_v4  ;;  %v1289_v53 = vsel %vm1236_vm3, %v1279_v4, %v1288_v15  ;;  %v1117_v11 = vrot.slane %v1107_v16, 2 }
  0x93   : > { %v1118_v59 = vsel %vm944_vm4, %v1115_v36, %v1117_v11 }
  0x9b   : > { %1017 = vmatmul.bf16.vlgmr.msra.gmra.mxu1 %v947_v47  ;;  %1480 = vmatmul.bf16.vlgmr.msra.gmra.mxu0 %v1410_v54 }
  0x9e   : > { %1180 = vmatmul.bf16.vlgmr.msra.gmra.mxu2 %v1110_v23  ;;  %1361 = vmatmul.bf16.gmra.mxu3 %v1271_v55 }
  0xa8   : > { %v349_v1 = vpop.f32.mrf.mxu0  ;;  %v2523_v10 = vpop.f32.mrf.mxu1 }
  0xab   : > { %1022 = vmatmul.bf16.gmra.mxu1 %v949_v2  ;;  %1485 = vmatmul.bf16.gmra.mxu0 %v1412_v3 }
  0xae   : > { %1185 = vmatmul.bf16.gmra.mxu2 %v1112_v63  ;;  %1366 = vmatmul.bf16.gmra.mxu3 %v1280_v8  ;;  %v955_v63 = vsel %vm944_vm4, %v952_v39, %v954_v56 }
  0xb0   : > { %v351_v7 = vpop.f32.mrf.mxu0  ;;  %v2530_v9 = vpop.f32.mrf.mxu1 }
  0xb1   : > { %v718_v21 = vpop.f32.mrf.mxu3  ;;  %v2542_v31 = vpop.f32.mrf.mxu2 }
  0xb8   : > { %v354_v28 = vpop.f32.mrf.mxu0  ;;  %v2538_v29 = vpop.f32.mrf.mxu1 }
  0xb9   : > { %v720_v32 = vpop.f32.mrf.mxu3  ;;  %v2548_v38 = vpop.f32.mrf.mxu2 }
  0xbb   : > { %1027 = vmatmul.bf16.gmra.mxu1 %v951_v18  ;;  %1490 = vmatmul.bf16.gmra.mxu0 %v1414_v30 }
  0xbe   : > { %1190 = vmatmul.bf16.gmra.mxu2 %v1114_v27  ;;  %1371 = vmatmul.bf16.gmra.mxu3 %v1289_v53 }
  0xc0   : > { %v356_v34 = vpop.f32.mrf.mxu0  ;;  %v2545_v35 = vpop.f32.mrf.mxu1 }
  0xc1   : > { %v723_v37 = vpop.f32.mrf.mxu3 }
  0xc8   : > { %v436_v42 = vpop.f32.mrf.mxu1  ;;  %v889_v44 = vpop.f32.mrf.mxu0 }
  0xc9   : > { %v437_v46 = vadd.f32 %v436_v42, %v349_v1  ;;  %v725_v49 = vpop.f32.mrf.mxu3 }
  0xcb   : > { %1032 = vmatmul.bf16.gmra.mxu1 %v953_v45  ;;  %1495 = vmatmul.bf16.gmra.mxu0 %v1416_v12 }
  0xce   : > { %1195 = vmatmul.bf16.gmra.mxu2 %v1116_v41 }
  0xd0   : > { %v438_v52 = vpop.f32.mrf.mxu1  ;;  %v891_v23 = vpop.f32.mrf.mxu0 }
  0xd1   : > { %v555_v50 = vpop.f32.mrf.mxu2  ;;  %v439_v47 = vadd.f32 %v438_v52, %v351_v7  ;;  %v728_v55 = vpop.f32.mrf.mxu3 }
  0xd2   : > { %v580_v33 = vadd.f32 %v555_v50, %v437_v46 }
  0xd4   : > { %v743_v51 = vadd.f32 %v718_v21, %v580_v33 }
  0xd6   : > { %v2556_v54 = vadd.f32 %v889_v44, %v743_v51 }
  0xd8   : > { %v441_v61 = vpop.f32.mrf.mxu1  ;;  %v894_v62 = vpop.f32.mrf.mxu0 }
  0xd9   : > { %v557_v43 = vpop.f32.mrf.mxu2  ;;  %v442_v1 = vadd.f32 %v441_v61, %v354_v28  ;;  %v730_v3 = vpop.f32.mrf.mxu3 }
  0xda   : > { %v581_v58 = vadd.f32 %v557_v43, %v439_v47 }
  0xdb   : > { %1037 = vmatmul.bf16.gmra.mxu1 %v955_v63  ;;  %1500 = vmatmul.bf16.gmra.mxu0 %v1418_v0 }
  0xdc   : > { %v744_v60 = vadd.f32 %v720_v32, %v581_v58 }
  0xde   : > { %1200 = vmatmul.bf16.gmra.mxu2 %v1118_v59  ;;  %v2563_v2 = vadd.f32 %v891_v23, %v744_v60 }
  0xe0   : > { %v443_v8 = vpop.f32.mrf.mxu1  ;;  %v896_v6 = vpop.f32.mrf.mxu0 }
  0xe1   : > { %v560_v14 = vpop.f32.mrf.mxu2  ;;  %v444_v7 = vadd.f32 %v443_v8, %v356_v34  ;;  %v733_v17 = vpop.f32.mrf.mxu3 }
  0xe2   : > { %v582_v4 = vadd.f32 %v560_v14, %v442_v1 }
  0xe4   : > { %v745_v5 = vadd.f32 %v723_v37, %v582_v4 }
  0xe6   : > { %v2565_v13 = vadd.f32 %v894_v62, %v745_v5 }
  0xe8   : > { %v446_v24 = vpop.f32.mrf.mxu1  ;;  %v899_v25 = vpop.f32.mrf.mxu0 }
  0xe9   : > { %v562_v19 = vpop.f32.mrf.mxu2  ;;  %v447_v26 = vadd.f32 %v446_v24, %v2523_v10  ;;  %v735_v30 = vpop.f32.mrf.mxu3 }
  0xea   : > { %v583_v21 = vadd.f32 %v562_v19, %v444_v7 }
  0xec   : > { %v746_v22 = vadd.f32 %v725_v49, %v583_v21 }
  0xee   : > { %v2568_v27 = vadd.f32 %v896_v6, %v746_v22 }
  0xf0   : > { %v448_v32 = vpop.f32.mrf.mxu1  ;;  %v901_v53 = vpop.f32.mrf.mxu0 }
  0xf1   : > { %v565_v28 = vpop.f32.mrf.mxu2  ;;  %v449_v34 = vadd.f32 %v448_v32, %v2530_v9  ;;  %v738_v41 = vpop.f32.mrf.mxu3 }
  0xf2   : > { %v584_v18 = vadd.f32 %v565_v28, %v447_v26 }
  0xf4   : > { %v747_v15 = vadd.f32 %v728_v55, %v584_v18 }
  0xf6   : > { %v2571_v36 = vadd.f32 %v899_v25, %v747_v15 }
  0xf8   : > { %v451_v20 = vpop.f32.mrf.mxu1  ;;  %v904_v42 = vpop.f32.mrf.mxu0 }
  0xf9   : > { %v567_v37 = vpop.f32.mrf.mxu2  ;;  %v452_v10 = vadd.f32 %v451_v20, %v2538_v29  ;;  %v740_v9 = vpop.f32.mrf.mxu3 }
  0xfa   : > { %v585_v39 = vadd.f32 %v567_v37, %v449_v34 }
  0xfc   : > { %v748_v40 = vadd.f32 %v730_v3, %v585_v39 }
  0xfe   : > { %v2574_v44 = vadd.f32 %v901_v53, %v748_v40 }
 0x100   : > { %v453_v48 = vpop.f32.mrf.mxu1  ;;  %v906_v49 = vpop.f32.mrf.mxu0 }
 0x101   : > { %v570_v45 = vpop.f32.mrf.mxu2  ;;  %v454_v50 = vadd.f32 %v453_v48, %v2545_v35  ;;  %v1352_v55 = vpop.f32.mrf.mxu3 }
 0x102   : > { %v586_v12 = vadd.f32 %v570_v45, %v452_v10 }
 0x104   : > { %v749_v46 = vadd.f32 %v733_v17, %v586_v12 }
 0x106   : > { %v2577_v33 = vadd.f32 %v904_v42, %v749_v46 }
 0x108   : > { %v456_v23 = vpop.f32.mrf.mxu1  ;;  %v909_v47 = vpop.f32.mrf.mxu0 }
 0x109   : > { %v572_v16 = vpop.f32.mrf.mxu2  ;;  %v457_v11 = vadd.f32 %v456_v23, %v2542_v31  ;;  %v1354_v63 = vpop.f32.mrf.mxu3 }
 0x10a   : > { %v587_v51 = vadd.f32 %v572_v16, %v454_v50 }
 0x10c   : > { %v750_v52 = vadd.f32 %v735_v30, %v587_v51 }
 0x10e   : > { %v2580_v29 = vadd.f32 %v906_v49, %v750_v52 }
 0x110   : > { %v458_v58 = vpop.f32.mrf.mxu1  ;;  %v911_v59 = vpop.f32.mrf.mxu0 }
 0x111   : > { %v575_v43 = vpop.f32.mrf.mxu2  ;;  %v459_v35 = vadd.f32 %v458_v58, %v2548_v38  ;;  %v2591_v38 = vld [vmem:[%s2643_s2] ss:$0 sm:$0xff]  ;;  %v1357_v6 = vpop.f32.mrf.mxu3 }
 0x112   : > { %v588_v56 = vadd.f32 %v575_v43, %v457_v11 }
 0x114   : > { %v751_v57 = vadd.f32 %v738_v41, %v588_v56 }
 0x116   : > { %v2583_v60 = vadd.f32 %v909_v47, %v751_v57 }
 0x118   : > { %v1018_v1 = vpop.f32.mrf.mxu1  ;;  %v1481_v3 = vpop.f32.mrf.mxu0 }
 0x119   : > { %v577_v61 = vpop.f32.mrf.mxu2  ;;  %v1043_v31 = vadd.f32 %v1018_v1, %v2556_v54  ;;  %v1359_v53 = vpop.f32.mrf.mxu3 }
 0x11a   : > { %v589_v62 = vadd.f32 %v577_v61, %v459_v35 }
 0x11c   : > { %v752_v0 = vadd.f32 %v740_v9, %v589_v62 }
 0x11e   : > { %v2586_v14 = vadd.f32 %v911_v59, %v752_v0 }
 0x120   : > { %v1020_v7 = vpop.f32.mrf.mxu1  ;;  %v1483_v17 = vpop.f32.mrf.mxu0 }
 0x121   : > { %v1181_v4 = vpop.f32.mrf.mxu2  ;;  %v1044_v21 = vadd.f32 %v1020_v7, %v2563_v2  ;;  %v1362_v49 = vpop.f32.mrf.mxu3 }
 0x122   : > { %v1206_v5 = vadd.f32 %v1181_v4, %v1043_v31 }
 0x124   : > { %v1377_v8 = vadd.f32 %v1352_v55, %v1206_v5 }
 0x126   : > { %v1506_v19 = vadd.f32 %v1481_v3, %v1377_v8 }
 0x128   : > { %v1520_v22 = vadd.f32 %v2591_v38, %v1506_v19  ;;  %v1023_v30 = vpop.f32.mrf.mxu1  ;;  %v1486_v15 = vpop.f32.mrf.mxu0 }
 0x129   : > { %v1183_v54 = vpop.f32.mrf.mxu2  ;;  %v1045_v32 = vadd.f32 %v1023_v30, %v2565_v13  ;;  %v1364_v58 = vpop.f32.mrf.mxu3 }
 0x12a   : > { %vm1530_vm6 = vcmp.ge.f32.partialorder %v1520_v22, 0.0  ;;  %v1540_v24 = vmul.f32 0.2, %v1520_v22  ;;  %v1207_v25 = vadd.f32 %v1183_v54, %v1044_v21 }
 0x12c   : > { %v1550_v26 = vsel %vm1530_vm6, %v1520_v22, %v1540_v24  ;;  %v1378_v28 = vadd.f32 %v1354_v63, %v1207_v25 }
 0x12d   : > { %v1560_v18 = vpack.c.bf16 %v1550_v26, %v1550_v26 }
 0x12e   : > { %v1507_v2 = vadd.f32 %v1483_v17, %v1378_v28 }
 0x12f   : > { %1571 = vst.msk [vmem:[%s2599_s21] sm:$0xf] %vm1570_vm7, %v1560_v18 }
 0x130   : > { %v1521_v34 = vadd.f32 %v2591_v38, %v1507_v2  ;;  %v1025_v10 = vpop.f32.mrf.mxu1  ;;  %v1488_v45 = vpop.f32.mrf.mxu0 }
 0x131   : > { %v1186_v37 = vpop.f32.mrf.mxu2  ;;  %v1046_v46 = vadd.f32 %v1025_v10, %v2568_v27  ;;  %v1367_v7 = vpop.f32.mrf.mxu3 }
 0x132   : > { %vm1531_vm8 = vcmp.ge.f32.partialorder %v1521_v34, 0.0  ;;  %v1541_v39 = vmul.f32 0.2, %v1521_v34  ;;  %v1208_v40 = vadd.f32 %v1186_v37, %v1045_v32 }
 0x134   : > { %v1551_v41 = vsel %vm1531_vm8, %v1521_v34, %v1541_v39  ;;  %v1379_v20 = vadd.f32 %v1357_v6, %v1208_v40 }
 0x135   : > { %v1561_v42 = vpack.c.bf16 %v1551_v41, %v1551_v41 }
 0x136   : > { %v1508_v12 = vadd.f32 %v1486_v15, %v1379_v20 }
 0x137   : > { %1572 = vst.msk [vmem:[%s2599_s21 + $0x4] sm:$0xf] %vm1570_vm7, %v1561_v42 }
 0x138   : > { %v1522_v13 = vadd.f32 %v2591_v38, %v1508_v12  ;;  %v1028_v23 = vpop.f32.mrf.mxu1  ;;  %v1491_v47 = vpop.f32.mrf.mxu0 }
 0x139   : > { %v1188_v48 = vpop.f32.mrf.mxu2  ;;  %v1047_v55 = vadd.f32 %v1028_v23, %v2571_v36 }
 0x13a   : > { %vm1532_vm9 = vcmp.ge.f32.partialorder %v1522_v13, 0.0  ;;  %v1542_v50 = vmul.f32 0.2, %v1522_v13  ;;  %v1209_v9 = vadd.f32 %v1188_v48, %v1046_v46 }
 0x13c   : > { %v1552_v16 = vsel %vm1532_vm9, %v1522_v13, %v1542_v50  ;;  %v1380_v51 = vadd.f32 %v1359_v53, %v1209_v9 }
 0x13d   : > { %v1562_v52 = vpack.c.bf16 %v1552_v16, %v1552_v16 }
 0x13e   : > { %v1509_v11 = vadd.f32 %v1488_v45, %v1380_v51 }
 0x13f   : > { %1573 = vst.msk [vmem:[%s2599_s21 + $0x8] sm:$0xf] %vm1570_vm7, %v1562_v52 }
 0x140   : > { %v1523_v27 = vadd.f32 %v2591_v38, %v1509_v11  ;;  %v1030_v62 = vpop.f32.mrf.mxu1  ;;  %v1493_v63 = vpop.f32.mrf.mxu0 }
 0x141   : > { %v1191_v43 = vpop.f32.mrf.mxu2  ;;  %v1048_v1 = vadd.f32 %v1030_v62, %v2574_v44 }
 0x142   : > { %vm1533_vm10 = vcmp.ge.f32.partialorder %v1523_v27, 0.0  ;;  %v1543_v56 = vmul.f32 0.2, %v1523_v27  ;;  %v1210_v57 = vadd.f32 %v1191_v43, %v1047_v55 }
 0x144   : > { %v1553_v59 = vsel %vm1533_vm10, %v1523_v27, %v1543_v56  ;;  %v1381_v35 = vadd.f32 %v1362_v49, %v1210_v57 }
 0x145   : > { %v1563_v61 = vpack.c.bf16 %v1553_v59, %v1553_v59 }
 0x146   : > { %v1510_v0 = vadd.f32 %v1491_v47, %v1381_v35 }
 0x147   : > { %1574 = vst.msk [vmem:[%s2599_s21 + $0xc] sm:$0xf] %vm1570_vm7, %v1563_v61 }
 0x148   : > { %v1524_v36 = vadd.f32 %v2591_v38, %v1510_v0  ;;  %v1033_v17 = vpop.f32.mrf.mxu1  ;;  %v1496_v44 = vpop.f32.mrf.mxu0 }
 0x149   : > { %v1193_v3 = vpop.f32.mrf.mxu2  ;;  %v1049_v21 = vadd.f32 %v1033_v17, %v2577_v33  ;;  %v1369_v33 = vpop.f32.mrf.mxu3 }
 0x14a   : > { %vm1534_vm11 = vcmp.ge.f32.partialorder %v1524_v36, 0.0  ;;  %v1544_v31 = vmul.f32 0.2, %v1524_v36  ;;  %v1211_v4 = vadd.f32 %v1193_v3, %v1048_v1 }
 0x14c   : > { %v1554_v5 = vsel %vm1534_vm11, %v1524_v36, %v1544_v31  ;;  %v1382_v8 = vadd.f32 %v1364_v58, %v1211_v4 }
 0x14d   : > { %v1564_v6 = vpack.c.bf16 %v1554_v5, %v1554_v5 }
 0x14e   : > { %v1511_v19 = vadd.f32 %v1493_v63, %v1382_v8 }
 0x14f   : > { %1575 = vst.msk [vmem:[%s2599_s21 + $0x10] sm:$0xf] %vm1570_vm7, %v1564_v6 }
 0x150   : > { %v1525_v22 = vadd.f32 %v2591_v38, %v1511_v19  ;;  %v1035_v30 = vpop.f32.mrf.mxu1  ;;  %v1498_v53 = vpop.f32.mrf.mxu0 }
 0x151   : > { %v1196_v54 = vpop.f32.mrf.mxu2  ;;  %v1050_v2 = vadd.f32 %v1035_v30, %v2580_v29  ;;  %v1372_v12 = vpop.f32.mrf.mxu3 }
 0x152   : > { %vm1535_vm12 = vcmp.ge.f32.partialorder %v1525_v22, 0.0  ;;  %v1545_v24 = vmul.f32 0.2, %v1525_v22  ;;  %v1212_v25 = vadd.f32 %v1196_v54, %v1049_v21 }
 0x154   : > { %v1555_v26 = vsel %vm1535_vm12, %v1525_v22, %v1545_v24  ;;  %v1383_v28 = vadd.f32 %v1367_v7, %v1212_v25 }
 0x155   : > { %v1565_v18 = vpack.c.bf16 %v1555_v26, %v1555_v26 }
 0x156   : > { %v1512_v15 = vadd.f32 %v1496_v44, %v1383_v28 }
 0x157   : > { %1576 = vst.msk [vmem:[%s2599_s21 + $0x14] sm:$0xf] %vm1570_vm7, %v1565_v18 }
 0x158   : > { %v1526_v32 = vadd.f32 %v2591_v38, %v1512_v15  ;;  %v1038_v42 = vpop.f32.mrf.mxu1  ;;  %v1501_v49 = vpop.f32.mrf.mxu0 }
 0x159   : > { %v1198_v34 = vpop.f32.mrf.mxu2  ;;  %v1051_v45 = vadd.f32 %v1038_v42, %v2583_v60  ;;  %v1374_v27 = vpop.f32.mrf.mxu3 }
 0x15a   : > { %vm1536_vm13 = vcmp.ge.f32.partialorder %v1526_v32, 0.0  ;;  %v1546_v37 = vmul.f32 0.2, %v1526_v32  ;;  %v1213_v39 = vadd.f32 %v1198_v34, %v1050_v2 }
 0x15c   : > { %v1556_v40 = vsel %vm1536_vm13, %v1526_v32, %v1546_v37  ;;  %v1384_v41 = vadd.f32 %v1369_v33, %v1213_v39 }
 0x15d   : > { %v1566_v20 = vpack.c.bf16 %v1556_v40, %v1556_v40 }
 0x15e   : > { %v1513_v10 = vadd.f32 %v1498_v53, %v1384_v41 }
 0x15f   : > { %1577 = vst.msk [vmem:[%s2599_s21 + $0x18] sm:$0xf] %vm1570_vm7, %v1566_v20 }
 0x160   : > { %v1527_v29 = vadd.f32 %v2591_v38, %v1513_v10  ;;  %v1040_v51 = vpop.f32.mrf.mxu1  ;;  %v1503_v58 = vpop.f32.mrf.mxu0 }
 0x161   : > { %v1201_v46 = vpop.f32.mrf.mxu2  ;;  %v1052_v23 = vadd.f32 %v1040_v51, %v2586_v14 }
 0x162   : > { %vm1537_vm14 = vcmp.ge.f32.partialorder %v1527_v29, 0.0  ;;  %v1547_v13 = vmul.f32 0.2, %v1527_v29  ;;  %v1214_v48 = vadd.f32 %v1201_v46, %v1051_v45 }
 0x164   : > { %v1557_v50 = vsel %vm1537_vm14, %v1527_v29, %v1547_v13  ;;  %v1385_v9 = vadd.f32 %v1372_v12, %v1214_v48 }
 0x165   : > { %v1567_v16 = vpack.c.bf16 %v1557_v50, %v1557_v50 }
 0x166   : > { %v1514_v52 = vadd.f32 %v1501_v49, %v1385_v9 }
 0x167   : > { %1578 = vst.msk [vmem:[%s2599_s21 + $0x1c] sm:$0xf] %vm1570_vm7, %v1567_v16 }
 0x168   : > { %v1528_v60 = vadd.f32 %v2591_v38, %v1514_v52 }
 0x169   : > { %v1203_v47 = vpop.f32.mrf.mxu2 }
 0x16a   : > { %vm1538_vm15 = vcmp.ge.f32.partialorder %v1528_v60, 0.0  ;;  %v1548_v11 = vmul.f32 0.2, %v1528_v60  ;;  %v1215_v55 = vadd.f32 %v1203_v47, %v1052_v23 }
 0x16c   : > { %v1558_v43 = vsel %vm1538_vm15, %v1528_v60, %v1548_v11  ;;  %v1386_v56 = vadd.f32 %v1374_v27, %v1215_v55 }
 0x16d   : > { %v1568_v57 = vpack.c.bf16 %v1558_v43, %v1558_v43 }
 0x16e   : > { %v1515_v59 = vadd.f32 %v1503_v58, %v1386_v56 }
 0x16f   : > { %1579 = vst.msk [vmem:[%s2599_s21 + $0x20] sm:$0xf] %vm1570_vm7, %v1568_v57 }
 0x170   : > { %v1529_v35 = vadd.f32 %v2591_v38, %v1515_v59 }
 0x172   : > { %vm1539_vm0 = vcmp.ge.f32.partialorder %v1529_v35, 0.0  ;;  %v1549_v14 = vmul.f32 0.2, %v1529_v35 }
 0x174   : > { %v1559_v61 = vsel %vm1539_vm0, %v1529_v35, %v1549_v14 }
 0x175   : > { %v1569_v62 = vpack.c.bf16 %v1559_v61, %v1559_v61 }
 0x177   : > { %1580 = vst.msk [vmem:[%s2599_s21 + $0x24] sm:$0xf] %vm1570_vm7, %v1569_v62 }
 0x178 PF: > { %s13_s12 = sadd.s32 1, %s2105_s12  }
 0x179   : > { %p10_p4 = scmp.ge.s32.totalorder %s13_s12, 4  }
 0x17b   :  { %12 = sbr.rel (!%p10_p4) target bundleno = 1 (0x1), region = 62 }

// kernel: generator_forward.7
= control target key start
LH: loop header
LB: loop body
LE: loop exit
PB: predicated region body
PF: predicated region fallthrough
CT: control target
= control target key end

     0   :  { %s4086_s12 = smov 0   ;;  %s5260_s0 = inlined_call_operand.vmem [shape: bf16[2,326,64], index: 0, kind: input, shape index: {}]   ;;  %s5261_s1 = inlined_call_operand.vmem [shape: bf16[576,3], index: 1, kind: input, shape index: {}]   ;;  %s5262_s2 = inlined_call_operand.vmem [shape: f32[1,3], index: 2, kind: input, shape index: {}]   ;;  %s5263_s3 = inlined_call_operand.vmem [shape: f32[2,288,3], index: 3, kind: output, shape index: {}]  }
   0x1 LB: > { %s3329_s13 = sadd.s32 4294967295, %s4064_s12   ;;  %p3333_p0 = scmp.ge.s32.totalorder %s4064_s12, 1  ;;  %s4064_s12 = sphi %s4086_s12, %s13_s12  }
   0x2   : > { %p137_p1 = scmp.lt.s32.totalorder %s4064_s12, 3 }
   0x4   : > { %p138_p2 = pnand %p3333_p0, %p137_p1 }
   0x6   : > { %141 = sbr.rel (%p138_p2) target bundleno = 823 (0x337), region = 32 }
   0xb   : > { %v3872_v0 = vld [vmem:[%s5261_s1 + $0x38] sm:$0xff]  ;;  %p161_p3 = scmp.lt.s32.totalorder %s3329_s13, 1  ;;  %v3871_v1 = vld [vmem:[%s5261_s1 + $0x30] sm:$0xff]  ;;  %v3870_v2 = vld [vmem:[%s5261_s1 + $0x28] sm:$0xff]  ;;  %vm318_vm0 = vsmask.f32 7424 }
   0xc   : > { %3942 = vmatpush.bf16.msra.mxu1 %v3872_v0  ;;  %3943 = vmatpush.bf16.msra.mxu2 %v3872_v0  ;;  %v3869_v13 = vld [vmem:[%s5261_s1 + $0x20] sm:$0xff]  ;;  %v3876_v21 = vld [vmem:[%s5261_s1 + $0x58] sm:$0xff]  ;;  %vm491_vm1 = vcmask 523264   ;;  %v3875_v35 = vld [vmem:[%s5261_s1 + $0x50] sm:$0xff]  ;;  %vm816_vm2 = vcmask 1046528   ;;  %vm1863_vm5 = vcmask 1045504  }
   0xd   : > { %s5287_s13 = smov (!%p161_p3, %s3329_s13), 1  ;;  %550 = vmatpush.bf16.msra.mxu0 %v3872_v0  ;;  %3944 = vmatpush.bf16.msra.mxu3 %v3872_v0  ;;  %v3868_v25 = vld [vmem:[%s5261_s1 + $0x18] sm:$0xff]  ;;  %v3867_v37 = vld [vmem:[%s5261_s1 + $0x10] sm:$0xff]  ;;  %v3874_v48 = vld [vmem:[%s5261_s1 + $0x48] sm:$0xff]  ;;  %vm1467_vm3 = vsmask.f32 6400 }
   0xe   : > { %s3954_s18 = smul.u32 164, %s5287_s13  ;;  %v3901_v26 = vld [vmem:[%s5261_s1 + $0x98] sm:$0xff]  ;;  %v3900_v38 = vld [vmem:[%s5261_s1 + $0x90] sm:$0xff]  ;;  %v3866_v49 = vld [vmem:[%s5261_s1 + $0x8] sm:$0xff]  ;;  %vm2514_vm4 = vsmask.f32 5376 }
   0xf   : > { %v3897_v44 = vld [vmem:[%s5261_s1 + $0x78] sm:$0xff]  ;;  %v3896_v51 = vld [vmem:[%s5261_s1 + $0x70] sm:$0xff]  ;;  %vm2910_vm6 = vcmask 1044480   ;;  %s3955_s19 = smul.u32 288, %s5287_s13  ;;  %vm3237_vm7 = vcmask 23552  }
  0x10   : > { %3945 = vmatpush.bf16.msra.mxu1 %v3871_v1  ;;  %3946 = vmatpush.bf16.msra.mxu2 %v3871_v1  ;;  %s4109_s23 = scalar_lea.vmem %s5260_s0, %s3954_s18 }
  0x11   : > { %551 = vmatpush.bf16.msra.mxu0 %v3871_v1  ;;  %v4112_v3 = vld [vmem:[%s4109_s23 + $0x28] sm:$0xff]  ;;  %v4115_v4 = vld [vmem:[%s4109_s23 + $0x30] sm:$0xff]  ;;  %3947 = vmatpush.bf16.msra.mxu3 %v3871_v1  ;;  %v4121_v6 = vld [vmem:[%s4109_s23 + $0x58] sm:$0xff]  ;;  %s4955_s22 = scalar_lea.vmem %s5263_s3, %s3955_s19 }
  0x12   : > { %v4118_v5 = vld [vmem:[%s4109_s23 + $0x50] sm:$0xff]  ;;  %v4124_v7 = vld [vmem:[%s4109_s23] sm:$0xff]   ;;  %v4127_v8 = vld [vmem:[%s4109_s23 + $0x8] sm:$0xff]  ;;  %v359_v9 = vshll.u32 %v4112_v3, 16  ;;  %v363_v10 = vshrl.u32 %v4112_v3, 16  ;;  %v367_v11 = vshll.u32 %v4115_v4, 16 }
  0x13   : > { %v399_v12 = vshll.u32 %v4118_v5, 16  ;;  %v403_v14 = vshrl.u32 %v4118_v5, 16  ;;  %v407_v15 = vshll.u32 %v4121_v6, 16  ;;  %v320_v16 = vshrl.u32 %v4124_v7, 16  ;;  %v3862_v30 = vld [vmem:[%s4109_s23 + $0x78] sm:$0xff]  ;;  %v4158_v31 = vld [vmem:[%s4109_s23 + $0x80] sm:$0xff] }
  0x14   : > { %3948 = vmatpush.bf16.msra.mxu1 %v3870_v2  ;;  %3949 = vmatpush.bf16.msra.mxu2 %v3870_v2  ;;  %v322_v17 = vshll.u32 %v4124_v7, 16  ;;  %v4140_v18 = vrot.slane %v359_v9, 1  ;;  %v369_v19 = vrot.slane %v367_v11, 1  ;;  %v327_v22 = vshll.u32 %v4127_v8, 16  ;;  %v4177_v42 = vld [vmem:[%s4109_s23 + $0x38] sm:$0xff]  ;;  %v4180_v43 = vld [vmem:[%s4109_s23 + $0x60] sm:$0xff] }
  0x15   : > { %552 = vmatpush.bf16.msra.mxu0 %v3870_v2  ;;  %v4142_v20 = vrot.slane %v399_v12, 1  ;;  %3950 = vmatpush.bf16.msra.mxu3 %v3870_v2  ;;  %v409_v23 = vrot.slane %v407_v15, 1  ;;  %v439_v39 = vshll.u32 %v3862_v30, 16  ;;  %v443_v40 = vshrl.u32 %v3862_v30, 16  ;;  %v4186_v45 = vld [vmem:[%s4109_s23 + $0x10] sm:$0xff]  ;;  %v4209_v59 = vld [vmem:[%s4109_s23 + $0x88] sm:$0xff] }
  0x16   : > { %v324_v24 = vrot.slane %v322_v17, 1  ;;  %v365_v27 = vor.u32 %v363_v10, %v4140_v18  ;;  %v329_v29 = vrot.slane %v327_v22, 1  ;;  %v447_v41 = vshll.u32 %v4158_v31, 16  ;;  %v4212_v0 = vld [vmem:[%s4109_s23 + $0x48] sm:$0xff]  ;;  %v4223_v15 = vld [vmem:[%s4109_s23 + $0x40] sm:$0xff] }
  0x17   : > { %v405_v28 = vor.u32 %v403_v14, %v4142_v20  ;;  %v4188_v46 = vrot.slane %v439_v39, 1  ;;  %v371_v52 = vshrl.u32 %v4115_v4, 16  ;;  %v375_v53 = vshll.u32 %v4177_v42, 16 }
  0x18   : > { %3951 = vmatpush.bf16.msra.mxu1 %v3869_v13  ;;  %3952 = vmatpush.bf16.msra.mxu2 %v3869_v13  ;;  %v325_v32 = vor.u32 %v324_v24, %v320_v16  ;;  %v370_v33 = vsel %vm318_vm0, %v365_v27, %v369_v19  ;;  %v449_v47 = vrot.slane %v447_v41, 1  ;;  %v411_v54 = vshrl.u32 %v4121_v6, 16  ;;  %v4226_v16 = vld [vmem:[%s4109_s23 + $0x68] sm:$0xff]  ;;  %v4243_v27 = vld [vmem:[%s4109_s23 + $0x18] sm:$0xff] }
  0x19   : > { %553 = vmatpush.bf16.msra.mxu0 %v3869_v13  ;;  %v410_v34 = vsel %vm318_vm0, %v405_v28, %v409_v23  ;;  %3953 = vmatpush.bf16.msra.mxu3 %v3869_v13  ;;  %v445_v50 = vor.u32 %v443_v40, %v4188_v46  ;;  %v415_v55 = vshll.u32 %v4180_v43, 16  ;;  %v331_v56 = vshrl.u32 %v4127_v8, 16  ;;  %v3895_v24 = vld [vmem:[%s5261_s1 + $0x68] sm:$0xff] }
  0x1a   : > { %v330_v36 = vsel %vm318_vm0, %v325_v32, %v329_v29  ;;  %v335_v57 = vshll.u32 %v4186_v45, 16  ;;  %v373_v60 = vor.u32 %v371_v52, %v369_v19  ;;  %v377_v61 = vrot.slane %v375_v53, 1 }
  0x1b   : > { %3425 = vmatmul.msk.bf16.vlgmr.msra.gmra.mxu1 %vm491_vm1, %v370_v33  ;;  %3430 = vmatmul.msk.bf16.vlgmr.msra.gmra.mxu2 %vm491_vm1, %v410_v34  ;;  %v450_v58 = vsel %vm318_vm0, %v445_v50, %v449_v47  ;;  %v413_v62 = vor.u32 %v411_v54, %v409_v23  ;;  %v417_v63 = vrot.slane %v415_v55, 1  ;;  %v333_v1 = vor.u32 %v331_v56, %v329_v29  ;;  %v3899_v23 = vld [vmem:[%s5261_s1 + $0x88] sm:$0xff] }
  0x1c   : > { %936 = vmatpush.bf16.msrb.mxu2 %v3876_v21  ;;  %709 = vmatpush.bf16.msrb.mxu1 %v3868_v25  ;;  %v337_v2 = vrot.slane %v335_v57, 1  ;;  %v451_v9 = vshrl.u32 %v4158_v31, 16  ;;  %v455_v10 = vshll.u32 %v4209_v59, 16  ;;  %v378_v11 = vsel %vm318_vm0, %v373_v60, %v377_v61  ;;  %v216_v21 = vld [vmem:[%s4109_s23 + $0x90] sm:$0x1]  ;;  %v3873_v25 = vld [vmem:[%s5261_s1 + $0x40] sm:$0xff] }
  0x1d   : > { %1720 = vmatpush.bf16.msrb.mxu0 %v3901_v26  ;;  %1324 = vmatpush.bf16.msrb.mxu3 %v3897_v44  ;;  %v418_v12 = vsel %vm318_vm0, %v413_v62, %v417_v63  ;;  %v391_v13 = vshll.u32 %v4212_v0, 16  ;;  %v395_v26 = vshrl.u32 %v4212_v0, 16  ;;  %v379_v29 = vshrl.u32 %v4177_v42, 16  ;;  %v3865_v60 = vld [vmem:[%s5261_s1] sm:$0xff] }
  0x1e   : > { %3420 = vmatmul.msk.bf16.vlgmr.msra.gmra.mxu0 %vm491_vm1, %v330_v36  ;;  %3435 = vmatmul.msk.bf16.vlgmr.msra.gmra.mxu3 %vm491_vm1, %v450_v58  ;;  %v338_v14 = vsel %vm318_vm0, %v333_v1, %v337_v2  ;;  %v453_v17 = vor.u32 %v451_v9, %v449_v47  ;;  %v457_v19 = vrot.slane %v455_v10, 1  ;;  %v298_v31 = vunpack.c.l.b16 %v216_v21  ;;  %v3898_v1 = vld [vmem:[%s5261_s1 + $0x80] sm:$0xff] }
  0x1f   : > { %v4230_v22 = vrot.slane %v391_v13, 1  ;;  %v383_v32 = vshll.u32 %v4223_v15, 16  ;;  %v419_v33 = vshrl.u32 %v4180_v43, 16  ;;  %v423_v34 = vshll.u32 %v4226_v16, 16 }
  0x20   : > { %937 = vmatpush.bf16.msrb.mxu2 %v3875_v35  ;;  %710 = vmatpush.bf16.msrb.mxu1 %v3867_v37  ;;  %v458_v30 = vsel %vm318_vm0, %v453_v17, %v457_v19  ;;  %v4252_v35 = vld [vmem:[%s4109_s23 + $0x20] sm:$0xff]  ;;  %v339_v37 = vshrl.u32 %v4186_v45, 16  ;;  %v381_v39 = vor.u32 %v379_v29, %v377_v61  ;;  %v4261_v40 = vpack.c.b16 %v298_v31, %v298_v31  ;;  %v4277_v61 = vld [vmem:[%s4109_s23 + $0x70] sm:$0xff] }
  0x21   : > { %1721 = vmatpush.bf16.msrb.mxu0 %v3900_v38  ;;  %1325 = vmatpush.bf16.msrb.mxu3 %v3896_v51  ;;  %v397_v28 = vor.u32 %v395_v26, %v4230_v22  ;;  %v343_v38 = vshll.u32 %v4243_v27, 16  ;;  %v385_v41 = vrot.slane %v383_v32, 1  ;;  %v421_v44 = vor.u32 %v419_v33, %v417_v63  ;;  %v3894_v63 = vld [vmem:[%s5261_s1 + $0x60] sm:$0xff]  ;;  %v3926_v33 = vld [vmem:[%s5261_s1 + $0xd8] sm:$0xff] }
  0x22   : > { %v425_v47 = vrot.slane %v423_v34, 1  ;;  %v463_v51 = vshll.u32 %v4261_v40, 16  ;;  %v355_v55 = vshrl.u32 %v4252_v35, 16  ;;  %v427_v10 = vshrl.u32 %v4226_v16, 16  ;;  %v3905_v34 = vld [vmem:[%s5261_s1 + $0xb8] sm:$0xff] }
  0x23   : > { %v4256_v36 = vsel %vm318_vm0, %v397_v28, %v4142_v20  ;;  %v345_v50 = vrot.slane %v343_v38, 1  ;;  %v459_v20 = vshrl.u32 %v4209_v59, 16  ;;  %v386_v52 = vsel %vm318_vm0, %v381_v39, %v385_v41 }
  0x24   : > { %938 = vmatpush.bf16.msrb.mxu2 %v3874_v48  ;;  %711 = vmatpush.bf16.msrb.mxu1 %v3866_v49  ;;  %v351_v48 = vshll.u32 %v4252_v35, 16  ;;  %v341_v49 = vor.u32 %v339_v37, %v337_v2  ;;  %v426_v53 = vsel %vm318_vm0, %v421_v44, %v425_v47  ;;  %v465_v59 = vrot.slane %v463_v51, 1  ;;  %v3934_v37 = vld [vmem:[%s5261_s1 + $0x118] sm:$0xff] }
  0x25   : > { %1722 = vmatpush.bf16.msrb.mxu0 %v3899_v23  ;;  %1326 = vmatpush.bf16.msrb.mxu3 %v3895_v24  ;;  %v461_v58 = vor.u32 %v459_v20, %v457_v19  ;;  %v387_v2 = vshrl.u32 %v4223_v15, 16  ;;  %v347_v13 = vshrl.u32 %v4243_v27, 16  ;;  %v429_v21 = vor.u32 %v427_v10, %v425_v47  ;;  %v3878_v44 = vld [vmem:[%s4109_s23 + $0x18] sm:$0xff] }
  0x26   : > { %v353_v54 = vrot.slane %v351_v48, 1  ;;  %v346_v56 = vsel %vm318_vm0, %v341_v49, %v345_v50  ;;  %v435_v39 = vshrl.u32 %v4277_v61, 16  ;;  %v1208_v48 = vrot.slane %v3878_v44, 1  ;;  %v3939_v49 = vld [vmem:[%s4109_s23] sm:$0xf0] }
  0x27   : > { %v466_v9 = vsel %vm318_vm0, %v461_v58, %v465_v59  ;;  %v389_v19 = vor.u32 %v387_v2, %v385_v41  ;;  %v349_v24 = vor.u32 %v347_v13, %v345_v50  ;;  %v3940_v50 = vld [vmem:[%s4109_s23] sm:$0xe]  ;;  %v818_v59 = vrot.slane %v4127_v8, 1 }
  0x28   : > { %939 = vmatpush.bf16.msrb.mxu2 %v3873_v25  ;;  %v357_v57 = vor.u32 %v355_v55, %v353_v54  ;;  %712 = vmatpush.bf16.msrb.mxu1 %v3865_v60  ;;  %v3877_v25 = vld [vmem:[%s4109_s23 + $0x10] sm:$0xff]  ;;  %v3941_v55 = vor.u32 %v3940_v50, %v3939_v49  ;;  %v1486_v10 = vshrl.u32 %v3878_v44, 16  ;;  %v824_v49 = vrot.slane %v4252_v35, 1 }
  0x29   : > { %1327 = vmatpush.bf16.msrb.mxu3 %v3894_v63  ;;  %1723 = vmatpush.bf16.msrb.mxu0 %v3898_v1  ;;  %v394_v28 = vsel %vm318_vm0, %v389_v19, %v4230_v22  ;;  %v1206_v32 = vrot.slane %v3877_v25, 1  ;;  %v3930_v22 = vld [vmem:[%s5261_s1 + $0xf8] sm:$0xff]  ;;  %v3879_v63 = vld [vmem:[%s4109_s23 + $0x20] sm:$0xff]  ;;  %v820_v19 = vrot.slane %v4186_v45, 1 }
  0x2a   : > { %v362_v62 = vsel %vm318_vm0, %v357_v57, %v4140_v18  ;;  %v431_v18 = vshll.u32 %v4277_v61, 16  ;;  %v1488_v13 = vrot.slane %v1486_v10, 1 }
  0x2b   : > { %3426 = vmatmul.msk.bf16.gmra.mxu1 %vm491_vm1, %v378_v11  ;;  %3431 = vmatmul.msk.bf16.gmra.mxu2 %vm491_vm1, %v418_v12  ;;  %v1067_v11 = vld [vmem:[%s4109_s23 + $0x8] sm:$0xe]  ;;  %v4293_v12 = vld [vmem:[%s4109_s23 + $0xc] sm:$0xf] }
  0x2c   : > { %v5264_v17 = vunpack.c.l.b16 %v4293_v12  ;;  %v433_v23 = vrot.slane %v431_v18, 1  ;;  %2371 = vmatpush.bf16.msra.mxu2 %v3926_v33  ;;  %1983 = vmatpush.bf16.msra.mxu1 %v3905_v34  ;;  %v1489_v18 = vshll.u32 %v3878_v44, 16 }
  0x2d   : > { %2767 = vmatpush.bf16.msra.mxu3 %v3930_v22  ;;  %3030 = vmatpush.bf16.msra.mxu0 %v3934_v37  ;;  %v3881_v22 = vld [vmem:[%s4109_s23 + $0x30] sm:$0xff] }
  0x2e   : > { %3421 = vmatmul.msk.bf16.gmra.mxu0 %vm491_vm1, %v338_v14  ;;  %3436 = vmatmul.msk.bf16.gmra.mxu3 %vm491_vm1, %v458_v30  ;;  %v1149_v14 = vunpack.c.l.b16 %v1067_v11  ;;  %v434_v29 = vsel %vm318_vm0, %v429_v21, %v433_v23  ;;  %v354_v30 = vsel %vm318_vm0, %v349_v24, %v353_v54  ;;  %v437_v41 = vor.u32 %v435_v39, %v433_v23  ;;  %v3880_v23 = vld [vmem:[%s4109_s23 + $0x28] sm:$0xff] }
  0x2f   : > { %v1209_v54 = vsel %vm816_vm2, %v1206_v32, %v1208_v48  ;;  %v1214_v37 = vrot.slane %v3881_v22, 1  ;;  %v1507_v39 = vshll.u32 %v3880_v23, 16 }
  0x30   : > { %v1186_v26 = vpack.c.b16 %v5264_v17, %v1149_v14  ;;  %v442_v47 = vsel %vm318_vm0, %v437_v41, %v4188_v46  ;;  %v1491_v14 = vrot.slane %v1489_v18, 2  ;;  %v3883_v18 = vld [vmem:[%s4109_s23 + $0x40] sm:$0xff] }
  0x32   : > { %v1205_v31 = vrot.slane %v1186_v26, 1  ;;  %v1469_v20 = vshrl.u32 %v1186_v26, 16  ;;  %v1472_v51 = vshll.u32 %v1186_v26, 16  ;;  %v1492_v21 = vor.u32 %v1491_v14, %v1488_v13 }
  0x33   : > { %v1495_v26 = vshrl.u32 %v3879_v63, 16 }
  0x34   : > { %v1207_v38 = vsel %vm816_vm2, %v1205_v31, %v1206_v32  ;;  %v1474_v46 = vrot.slane %v1472_v51, 2  ;;  %v822_v32 = vrot.slane %v4243_v27, 1  ;;  %v3882_v51 = vld [vmem:[%s4109_s23 + $0x38] sm:$0xff] }
  0x36   : > { %v823_v34 = vsel %vm816_vm2, %v820_v19, %v822_v32 }
  0x3b   : > { %3427 = vmatmul.msk.bf16.gmra.mxu1 %vm491_vm1, %v386_v52  ;;  %3432 = vmatmul.msk.bf16.gmra.mxu2 %vm491_vm1, %v426_v53  ;;  %v1477_v52 = vshrl.u32 %v3877_v25, 16  ;;  %v1480_v53 = vshll.u32 %v3877_v25, 16  ;;  %v1212_v25 = vrot.slane %v3880_v23, 1 }
  0x3d   : > { %v1479_v57 = vrot.slane %v1477_v52, 1  ;;  %v1482_v58 = vrot.slane %v1480_v53, 2  ;;  %v1215_v41 = vsel %vm816_vm2, %v1212_v25, %v1214_v37  ;;  %v825_v53 = vsel %vm816_vm2, %v822_v32, %v824_v49 }
  0x3e   : > { %3422 = vmatmul.msk.bf16.gmra.mxu0 %vm491_vm1, %v346_v56  ;;  %3437 = vmatmul.msk.bf16.gmra.mxu3 %vm491_vm1, %v466_v9  ;;  %v1471_v56 = vrot.slane %v1469_v20, 1  ;;  %v1210_v9 = vrot.slane %v3879_v63, 1  ;;  %v3904_v20 = vld [vmem:[%s5261_s1 + $0xb0] sm:$0xff] }
  0x3f   : > { %1984 = vmatpush.bf16.msra.mxu1 %v3904_v20 }
  0x40   : > { %v1475_v60 = vor.u32 %v1474_v46, %v1471_v56  ;;  %v1211_v11 = vsel %vm816_vm2, %v1208_v48, %v1210_v9  ;;  %v3925_v48 = vld [vmem:[%s5261_s1 + $0xd0] sm:$0xff]  ;;  %v1216_v56 = vrot.slane %v3882_v51, 1 }
  0x41   : > { %2372 = vmatpush.bf16.msra.mxu2 %v3925_v48  ;;  %v3933_v46 = vld [vmem:[%s5261_s1 + $0x110] sm:$0xff] }
  0x42   : > { %3031 = vmatpush.bf16.msra.mxu0 %v3933_v46 }
  0x4b   : > { %3428 = vmatmul.msk.bf16.gmra.mxu1 %vm491_vm1, %v394_v28  ;;  %3433 = vmatmul.msk.bf16.gmra.mxu2 %vm491_vm1, %v434_v29  ;;  %v1498_v28 = vshll.u32 %v3879_v63, 16  ;;  %v1213_v29 = vsel %vm816_vm2, %v1210_v9, %v1212_v25 }
  0x4d   : > { %v1500_v31 = vrot.slane %v1498_v28, 2 }
  0x4e   : > { %3423 = vmatmul.msk.bf16.gmra.mxu0 %vm491_vm1, %v354_v30  ;;  %3590 = vmatmul.msk.bf16.vlgmr.msrb.gmra.mxu3 %vm491_vm1, %v1207_v38  ;;  %v1497_v30 = vrot.slane %v1495_v26, 1  ;;  %v1504_v38 = vshrl.u32 %v3880_v23, 16  ;;  %v1522_v23 = vshrl.u32 %v3882_v51, 16 }
  0x50   : > { %v1501_v33 = vor.u32 %v1500_v31, %v1497_v30  ;;  %v1506_v44 = vrot.slane %v1504_v38, 1  ;;  %v1524_v30 = vrot.slane %v1522_v23, 1  ;;  %v828_v31 = vrot.slane %v4115_v4, 1 }
  0x5b   : > { %3429 = vmatmul.msk.bf16.gmra.mxu1 %vm491_vm1, %v4256_v36  ;;  %3434 = vmatmul.msk.bf16.gmra.mxu2 %vm491_vm1, %v442_v47  ;;  %v817_v36 = vrot.slane %v3941_v55, 1  ;;  %v1509_v47 = vrot.slane %v1507_v39, 2 }
  0x5d   : > { %v819_v1 = vsel %vm816_vm2, %v817_v36, %v818_v59  ;;  %v1510_v50 = vor.u32 %v1509_v47, %v1506_v44  ;;  %v1531_v44 = vshrl.u32 %v3883_v18, 16  ;;  %v1534_v47 = vshll.u32 %v3883_v18, 16 }
  0x5e   : > { %3424 = vmatmul.msk.bf16.gmra.mxu0 %vm491_vm1, %v362_v62  ;;  %3591 = vmatmul.msk.bf16.gmra.mxu3 %vm491_vm1, %v1209_v54  ;;  %v1483_v62 = vor.u32 %v1482_v58, %v1479_v57  ;;  %v1513_v57 = vshrl.u32 %v3881_v22, 16  ;;  %v1516_v58 = vshll.u32 %v3881_v22, 16 }
  0x5f   : > { %v1511_v55 = vsel %vm1467_vm3, %v1501_v33, %v1510_v50 }
  0x60   : > { %v1484_v2 = vsel %vm1467_vm3, %v1475_v60, %v1483_v62  ;;  %v1493_v24 = vsel %vm1467_vm3, %v1483_v62, %v1492_v21  ;;  %v1515_v62 = vrot.slane %v1513_v57, 1  ;;  %v1518_v63 = vrot.slane %v1516_v58, 2  ;;  %v3885_v57 = vld [vmem:[%s4109_s23 + $0x50] sm:$0xff] }
  0x6b   : > { %3454 = vmatmul.msk.bf16.vlgmr.msrb.gmra.mxu1 %vm491_vm1, %v4124_v7  ;;  %3488 = vmatmul.msk.bf16.vlgmr.msrb.gmra.mxu2 %vm491_vm1, %v819_v1  ;;  %v821_v7 = vsel %vm816_vm2, %v818_v59, %v820_v19  ;;  %v1217_v59 = vsel %vm816_vm2, %v1214_v37, %v1216_v56  ;;  %v826_v1 = vrot.slane %v4112_v3, 1 }
  0x6d   : > { %v827_v13 = vsel %vm816_vm2, %v824_v49, %v826_v1  ;;  %v829_v37 = vsel %vm816_vm2, %v826_v1, %v828_v31  ;;  %v1222_v1 = vrot.slane %v3885_v57, 1 }
  0x6e   : > { %3624 = vmatmul.msk.bf16.vlgmr.msrb.gmra.mxu0 %vm491_vm1, %v1484_v2  ;;  %3592 = vmatmul.msk.bf16.gmra.mxu3 %vm491_vm1, %v1211_v11  ;;  %v1519_v2 = vor.u32 %v1518_v63, %v1515_v62 }
  0x70   : > { %v1520_v19 = vsel %vm1467_vm3, %v1510_v50, %v1519_v2 }
  0x7b   : > { %3455 = vmatmul.msk.bf16.gmra.mxu1 %vm491_vm1, %v4127_v8  ;;  %3489 = vmatmul.msk.bf16.gmra.mxu2 %vm491_vm1, %v821_v7  ;;  %v1502_v8 = vsel %vm1467_vm3, %v1492_v21, %v1501_v33  ;;  %v1218_v21 = vrot.slane %v3883_v18, 1  ;;  %v1525_v7 = vshll.u32 %v3882_v51, 16  ;;  %v1533_v51 = vrot.slane %v1531_v44, 1 }
  0x7d   : > { %v1219_v26 = vsel %vm816_vm2, %v1216_v56, %v1218_v21 }
  0x7e   : > { %3625 = vmatmul.msk.bf16.gmra.mxu0 %vm491_vm1, %v1493_v24  ;;  %3593 = vmatmul.msk.bf16.gmra.mxu3 %vm491_vm1, %v1213_v29 }
  0x8b   : > { %3456 = vmatmul.msk.bf16.gmra.mxu1 %vm491_vm1, %v4186_v45  ;;  %3490 = vmatmul.msk.bf16.gmra.mxu2 %vm491_vm1, %v823_v34  ;;  %v3929_v45 = vld [vmem:[%s5261_s1 + $0xf0] sm:$0xff]  ;;  %v3884_v34 = vld [vmem:[%s4109_s23 + $0x48] sm:$0xff] }
  0x8c   : > { %2768 = vmatpush.bf16.msra.mxu3 %v3929_v45  ;;  %v1543_v18 = vshll.u32 %v3884_v34, 16 }
  0x8e   : > { %3626 = vmatmul.msk.bf16.gmra.mxu0 %vm491_vm1, %v1502_v8  ;;  %3594 = vmatmul.msk.bf16.gmra.mxu3 %vm491_vm1, %v1215_v41  ;;  %v1220_v41 = vrot.slane %v3884_v34, 1 }
  0x90   : > { %v1221_v49 = vsel %vm816_vm2, %v1218_v21, %v1220_v41  ;;  %v1223_v21 = vsel %vm816_vm2, %v1220_v41, %v1222_v1 }
  0x98   : > { %v4375_v52 = vpop.f32.mrf.mxu1 }
  0x9b   : > { %v4378_v54 = vpop.f32.mrf.mxu0  ;;  %3457 = vmatmul.msk.bf16.gmra.mxu1 %vm491_vm1, %v4243_v27  ;;  %3491 = vmatmul.msk.bf16.gmra.mxu2 %vm491_vm1, %v825_v53  ;;  %v830_v53 = vrot.slane %v4177_v42, 1 }
  0x9e   : > { %3627 = vmatmul.msk.bf16.gmra.mxu0 %vm491_vm1, %v1511_v55  ;;  %v4388_v36 = vpop.f32.mrf.mxu2  ;;  %3595 = vmatmul.msk.bf16.gmra.mxu3 %vm491_vm1, %v1217_v59  ;;  %v831_v59 = vsel %vm816_vm2, %v828_v31, %v830_v53 }
  0xa0   : > { %v4391_v60 = vpop.f32.mrf.mxu1 }
  0xa1   : > { %v4397_v9 = vpop.f32.mrf.mxu3 }
  0xa2   : > { %5266 = vst [vmem:[#allocation2_spill] sm:$0xff] %v4397_v9 }
  0xa3   : > { %v4393_v27 = vpop.f32.mrf.mxu0 }
  0xa6   : > { %v4399_v10 = vpop.f32.mrf.mxu2 }
  0xa8   : > { %v4402_v11 = vpop.f32.mrf.mxu1 }
  0xa9   : > { %v4412_v24 = vpop.f32.mrf.mxu3 }
  0xaa   : > { %5267 = vst [vmem:[#allocation3_spill] sm:$0xff] %v4412_v24 }
  0xab   : > { %v4405_v14 = vpop.f32.mrf.mxu0  ;;  %3458 = vmatmul.msk.bf16.gmra.mxu1 %vm491_vm1, %v4252_v35  ;;  %3492 = vmatmul.msk.bf16.gmra.mxu2 %vm491_vm1, %v827_v13  ;;  %v1527_v35 = vrot.slane %v1525_v7, 2 }
  0xad   : > { %v1528_v32 = vor.u32 %v1527_v35, %v1524_v30  ;;  %v832_v30 = vrot.slane %v4223_v15, 1 }
  0xae   : > { %3628 = vmatmul.msk.bf16.gmra.mxu0 %vm491_vm1, %v1520_v19  ;;  %v4414_v25 = vpop.f32.mrf.mxu2  ;;  %3596 = vmatmul.msk.bf16.gmra.mxu3 %vm491_vm1, %v1219_v26 }
  0xaf   : > { %v1529_v39 = vsel %vm1467_vm3, %v1519_v2, %v1528_v32  ;;  %v1540_v2 = vshrl.u32 %v3884_v34, 16  ;;  %v3886_v34 = vld [vmem:[%s4109_s23 + $0x58] sm:$0xff] }
  0xb0   : > { %v4417_v28 = vpop.f32.mrf.mxu1 }
  0xb1   : > { %v4423_v33 = vpop.f32.mrf.mxu3  ;;  %v1542_v26 = vrot.slane %v1540_v2, 1 }
  0xb2   : > { %5268 = vst [vmem:[#allocation4_spill] sm:$0xff] %v4423_v33 }
  0xb3   : > { %v4419_v29 = vpop.f32.mrf.mxu0 }
  0xb6   : > { %v4425_v22 = vpop.f32.mrf.mxu2 }
  0xb8   : > { %v4428_v8 = vpop.f32.mrf.mxu1 }
  0xb9   : > { %v4438_v48 = vpop.f32.mrf.mxu3 }
  0xba   : > { %5269 = vst [vmem:[#allocation5_spill] sm:$0xff] %v4438_v48 }
  0xbb   : > { %v4431_v38 = vpop.f32.mrf.mxu0  ;;  %3459 = vmatmul.msk.bf16.gmra.mxu1 %vm491_vm1, %v4112_v3  ;;  %3493 = vmatmul.msk.bf16.gmra.mxu2 %vm491_vm1, %v829_v37  ;;  %v1536_v3 = vrot.slane %v1534_v47, 2  ;;  %v1224_v47 = vrot.slane %v3886_v34, 1 }
  0xbd   : > { %v1537_v55 = vor.u32 %v1536_v3, %v1533_v51  ;;  %v3928_v51 = vld [vmem:[%s5261_s1 + $0xe8] sm:$0xff]  ;;  %v1549_v3 = vshrl.u32 %v3885_v57, 16 }
  0xbe   : > { %3629 = vmatmul.msk.bf16.gmra.mxu0 %vm491_vm1, %v1529_v39  ;;  %v4440_v45 = vpop.f32.mrf.mxu2  ;;  %3597 = vmatmul.msk.bf16.gmra.mxu3 %vm491_vm1, %v1221_v49  ;;  %v833_v39 = vsel %vm816_vm2, %v830_v53, %v832_v30  ;;  %v3924_v49 = vld [vmem:[%s5261_s1 + $0xc8] sm:$0xff]  ;;  %v1552_v53 = vshll.u32 %v3885_v57, 16 }
  0xbf   : > { %v1538_v63 = vsel %vm1467_vm3, %v1528_v32, %v1537_v55  ;;  %2373 = vmatpush.bf16.msra.mxu2 %v3924_v49  ;;  %2769 = vmatpush.bf16.msra.mxu3 %v3928_v51  ;;  %v3932_v57 = vld [vmem:[%s5261_s1 + $0x108] sm:$0xff]  ;;  %v3887_v49 = vld [vmem:[%s4109_s23 + $0x60] sm:$0xff] }
  0xc0   : > { %v4443_v50 = vpop.f32.mrf.mxu1  ;;  %3032 = vmatpush.bf16.msra.mxu0 %v3932_v57 }
  0xc1   : > { %v4449_v56 = vpop.f32.mrf.mxu3 }
  0xc2   : > { %5270 = vst [vmem:[#allocation6_spill] sm:$0xff] %v4449_v56 }
  0xc3   : > { %v4445_v20 = vpop.f32.mrf.mxu0 }
  0xc6   : > { %v4451_v46 = vpop.f32.mrf.mxu2 }
  0xc8   : > { %v4454_v58 = vpop.f32.mrf.mxu1 }
  0xc9   : > { %v4464_v13 = vpop.f32.mrf.mxu3 }
  0xca   : > { %5271 = vst [vmem:[#allocation7_spill] sm:$0xff] %v4464_v13 }
  0xcb   : > { %v4457_v62 = vpop.f32.mrf.mxu0  ;;  %3460 = vmatmul.msk.bf16.gmra.mxu1 %vm491_vm1, %v4115_v4  ;;  %3494 = vmatmul.msk.bf16.gmra.mxu2 %vm491_vm1, %v831_v59  ;;  %v1545_v4 = vrot.slane %v1543_v18, 2  ;;  %v1551_v18 = vrot.slane %v1549_v3, 1 }
  0xcd   : > { %v1546_v35 = vor.u32 %v1545_v4, %v1542_v26  ;;  %v3903_v26 = vld [vmem:[%s5261_s1 + $0xa8] sm:$0xff] }
  0xce   : > { %3630 = vmatmul.msk.bf16.gmra.mxu0 %vm491_vm1, %v1538_v63  ;;  %v4466_v19 = vpop.f32.mrf.mxu2  ;;  %3598 = vmatmul.msk.bf16.gmra.mxu3 %vm491_vm1, %v1223_v21  ;;  %v1554_v21 = vrot.slane %v1552_v53, 2 }
  0xcf   : > { %v1547_v44 = vsel %vm1467_vm3, %v1537_v55, %v1546_v35  ;;  %1985 = vmatpush.bf16.msra.mxu1 %v3903_v26  ;;  %v1561_v26 = vshll.u32 %v3886_v34, 16 }
  0xd0   : > { %v4469_v23 = vpop.f32.mrf.mxu1  ;;  %v1555_v4 = vor.u32 %v1554_v21, %v1551_v18  ;;  %v1558_v21 = vshrl.u32 %v3886_v34, 16 }
  0xd1   : > { %v1329_v31 = vpop.f32.mrf.mxu3 }
  0xd2   : > { %v1556_v17 = vsel %vm1467_vm3, %v1546_v35, %v1555_v4  ;;  %v1560_v24 = vrot.slane %v1558_v21, 1 }
  0xd3   : > { %v4471_v7 = vpop.f32.mrf.mxu0 }
  0xd6   : > { %v4475_v32 = vpop.f32.mrf.mxu2 }
  0xd8   : > { %v4478_v37 = vpop.f32.mrf.mxu1 }
  0xd9   : > { %v1331_v59 = vpop.f32.mrf.mxu3 }
  0xdb   : > { %v4481_v41 = vpop.f32.mrf.mxu0  ;;  %3461 = vmatmul.msk.bf16.gmra.mxu1 %vm491_vm1, %v4177_v42  ;;  %3495 = vmatmul.msk.bf16.gmra.mxu2 %vm491_vm1, %v833_v39  ;;  %v1225_v42 = vsel %vm816_vm2, %v1222_v1, %v1224_v47  ;;  %v834_v1 = vrot.slane %v4212_v0, 1 }
  0xdd   : > { %v835_v3 = vsel %vm816_vm2, %v832_v30, %v834_v1 }
  0xde   : > { %3631 = vmatmul.msk.bf16.gmra.mxu0 %vm491_vm1, %v1547_v44  ;;  %v4494_v55 = vpop.f32.mrf.mxu2  ;;  %3599 = vmatmul.msk.bf16.gmra.mxu3 %vm491_vm1, %v1225_v42  ;;  %v1226_v42 = vrot.slane %v3887_v49, 1 }
  0xe0   : > { %v4497_v63 = vpop.f32.mrf.mxu1  ;;  %v1227_v30 = vsel %vm816_vm2, %v1224_v47, %v1226_v42 }
  0xe1   : > { %v1334_v39 = vpop.f32.mrf.mxu3 }
  0xe3   : > { %v4499_v2 = vpop.f32.mrf.mxu0 }
  0xe6   : > { %v4509_v44 = vpop.f32.mrf.mxu2 }
  0xe7   : > { %5272 = vst [vmem:[#allocation8_spill] sm:$0xff] %v4509_v44 }
  0xe8   : > { %v714_v51 = vpop.f32.mrf.mxu1 }
  0xe9   : > { %v715_v18 = vadd.f32 %v714_v51, %v4378_v54  ;;  %v1336_v57 = vpop.f32.mrf.mxu3 }
  0xeb   : > { %v1725_v53 = vpop.f32.mrf.mxu0  ;;  %3462 = vmatmul.msk.bf16.gmra.mxu1 %vm491_vm1, %v4223_v15  ;;  %3496 = vmatmul.msk.bf16.gmra.mxu2 %vm491_vm1, %v835_v3  ;;  %v1563_v15 = vrot.slane %v1561_v26, 2 }
  0xed   : > { %v1564_v34 = vor.u32 %v1563_v15, %v1560_v24  ;;  %v1570_v24 = vshll.u32 %v3887_v49, 16 }
  0xee   : > { %3632 = vmatmul.msk.bf16.gmra.mxu0 %vm491_vm1, %v1556_v17  ;;  %v941_v13 = vpop.f32.mrf.mxu2  ;;  %3600 = vmatmul.msk.bf16.gmra.mxu3 %vm491_vm1, %v1227_v30  ;;  %v836_v17 = vrot.slane %v4118_v5, 1 }
  0xef   : > { %v1031_v56 = vadd.f32 %v941_v13, %v715_v18  ;;  %v3888_v13 = vld [vmem:[%s4109_s23 + $0x68] sm:$0xff]  ;;  %v1565_v21 = vsel %vm1467_vm3, %v1555_v4, %v1564_v34  ;;  %v1572_v15 = vrot.slane %v1570_v24, 2 }
  0xf0   : > { %v716_v48 = vpop.f32.mrf.mxu1  ;;  %v837_v47 = vsel %vm816_vm2, %v834_v1, %v836_v17 }
  0xf1   : > { %v1419_v35 = vadd.f32 %v1329_v31, %v1031_v56  ;;  %v717_v54 = vadd.f32 %v716_v48, %v4393_v27  ;;  %v1339_v51 = vpop.f32.mrf.mxu3 }
  0xf3   : > { %v1727_v33 = vpop.f32.mrf.mxu0  ;;  %v4521_v3 = vadd.f32 %v1725_v53, %v1419_v35  ;;  %v1228_v53 = vrot.slane %v3888_v13, 1 }
  0xf5   : > { %v1229_v4 = vsel %vm816_vm2, %v1226_v42, %v1228_v53 }
  0xf6   : > { %v943_v9 = vpop.f32.mrf.mxu2 }
  0xf7   : > { %v1032_v44 = vadd.f32 %v943_v9, %v717_v54  ;;  %v1567_v9 = vshrl.u32 %v3887_v49, 16  ;;  %v838_v54 = vrot.slane %v4121_v6, 1 }
  0xf8   : > { %v719_v18 = vpop.f32.mrf.mxu1 }
  0xf9   : > { %v1420_v56 = vadd.f32 %v1331_v59, %v1032_v44  ;;  %v720_v27 = vadd.f32 %v719_v18, %v4405_v14  ;;  %v1341_v48 = vpop.f32.mrf.mxu3  ;;  %v1569_v35 = vrot.slane %v1567_v9, 1  ;;  %v839_v42 = vsel %vm816_vm2, %v836_v17, %v838_v54 }
  0xfb   : > { %v1730_v31 = vpop.f32.mrf.mxu0  ;;  %3463 = vmatmul.msk.bf16.gmra.mxu1 %vm491_vm1, %v4212_v0  ;;  %3497 = vmatmul.msk.bf16.gmra.mxu2 %vm491_vm1, %v837_v47  ;;  %v4531_v26 = vadd.f32 %v1727_v33, %v1420_v56  ;;  %v1573_v49 = vor.u32 %v1572_v15, %v1569_v35 }
  0xfd   : > { %v1574_v9 = vsel %vm1467_vm3, %v1564_v34, %v1573_v49 }
  0xfe   : > { %3633 = vmatmul.msk.bf16.gmra.mxu0 %vm491_vm1, %v1565_v21  ;;  %v946_v1 = vpop.f32.mrf.mxu2  ;;  %3601 = vmatmul.msk.bf16.gmra.mxu3 %vm491_vm1, %v1229_v4  ;;  %v3889_v21 = vld [vmem:[%s4109_s23 + $0x70] sm:$0xff]  ;;  %v1579_v4 = vshll.u32 %v3888_v13, 16 }
  0xff   : > { %v1033_v59 = vadd.f32 %v946_v1, %v720_v27 }
 0x100   : > { %v721_v44 = vpop.f32.mrf.mxu1 }
 0x101   : > { %v1421_v30 = vadd.f32 %v1334_v39, %v1033_v59  ;;  %v722_v14 = vadd.f32 %v721_v44, %v4419_v29  ;;  %v1344_v18 = vpop.f32.mrf.mxu3  ;;  %v1576_v59 = vshrl.u32 %v3888_v13, 16 }
 0x103   : > { %v1732_v0 = vpop.f32.mrf.mxu0  ;;  %v4537_v33 = vadd.f32 %v1730_v31, %v1421_v30  ;;  %v1230_v31 = vrot.slane %v3889_v21, 1  ;;  %v1578_v15 = vrot.slane %v1576_v59, 1 }
 0x105   : > { %v1231_v34 = vsel %vm816_vm2, %v1228_v53, %v1230_v31 }
 0x106   : > { %v948_v47 = vpop.f32.mrf.mxu2 }
 0x107   : > { %v1034_v56 = vadd.f32 %v948_v47, %v722_v14  ;;  %v1581_v14 = vrot.slane %v1579_v4, 2  ;;  %v840_v47 = vrot.slane %v4180_v43, 1 }
 0x108   : > { %v724_v27 = vpop.f32.mrf.mxu1 }
 0x109   : > { %v1422_v39 = vadd.f32 %v1336_v57, %v1034_v56  ;;  %v725_v29 = vadd.f32 %v724_v27, %v4431_v38  ;;  %v1346_v44 = vpop.f32.mrf.mxu3  ;;  %v1582_v13 = vor.u32 %v1581_v14, %v1578_v15  ;;  %v841_v53 = vsel %vm816_vm2, %v838_v54, %v840_v47 }
 0x10b   : > { %v1735_v1 = vpop.f32.mrf.mxu0  ;;  %3464 = vmatmul.msk.bf16.gmra.mxu1 %vm491_vm1, %v4118_v5  ;;  %3498 = vmatmul.msk.bf16.gmra.mxu2 %vm491_vm1, %v839_v42  ;;  %v4547_v24 = vadd.f32 %v1732_v0, %v1422_v39  ;;  %v3890_v39 = vld [vmem:[%s4109_s23 + $0x78] sm:$0xff]  ;;  %v1583_v59 = vsel %vm1467_vm3, %v1573_v49, %v1582_v13 }
 0x10e   : > { %3634 = vmatmul.msk.bf16.gmra.mxu0 %vm491_vm1, %v1574_v9  ;;  %v951_v17 = vpop.f32.mrf.mxu2  ;;  %3602 = vmatmul.msk.bf16.gmra.mxu3 %vm491_vm1, %v1231_v34 }
 0x10f   : > { %v1035_v57 = vadd.f32 %v951_v17, %v725_v29  ;;  %v1585_v17 = vshrl.u32 %v3889_v21, 16 }
 0x110   : > { %v726_v30 = vpop.f32.mrf.mxu1 }
 0x111   : > { %v1423_v35 = vadd.f32 %v1339_v51, %v1035_v57  ;;  %v727_v38 = vadd.f32 %v726_v30, %v4445_v20  ;;  %v1349_v56 = vpop.f32.mrf.mxu3  ;;  %v1588_v57 = vshll.u32 %v3889_v21, 16  ;;  %v1587_v15 = vrot.slane %v1585_v17, 1 }
 0x113   : > { %v1737_v5 = vpop.f32.mrf.mxu0  ;;  %v4553_v0 = vadd.f32 %v1735_v1, %v1423_v35  ;;  %v1232_v1 = vrot.slane %v3890_v39, 1  ;;  %v1590_v14 = vrot.slane %v1588_v57, 2 }
 0x115   : > { %v1233_v30 = vsel %vm816_vm2, %v1230_v31, %v1232_v1 }
 0x116   : > { %v953_v27 = vpop.f32.mrf.mxu2 }
 0x117   : > { %v1036_v42 = vadd.f32 %v953_v27, %v727_v38  ;;  %v1591_v38 = vor.u32 %v1590_v14, %v1587_v15 }
 0x118   : > { %v729_v9 = vpop.f32.mrf.mxu1 }
 0x119   : > { %v1424_v51 = vadd.f32 %v1341_v48, %v1036_v42  ;;  %v730_v20 = vadd.f32 %v729_v9, %v4457_v62  ;;  %v1351_v34 = vpop.f32.mrf.mxu3  ;;  %v3927_v62 = vld [vmem:[%s5261_s1 + $0xe0] sm:$0xff]  ;;  %v1592_v57 = vsel %vm1467_vm3, %v1582_v13, %v1591_v38  ;;  %v1594_v13 = vshrl.u32 %v3890_v39, 16 }
 0x11a   : > { %2770 = vmatpush.bf16.msra.mxu3 %v3927_v62 }
 0x11b   : > { %v1740_v29 = vpop.f32.mrf.mxu0  ;;  %3465 = vmatmul.msk.bf16.gmra.mxu1 %vm491_vm1, %v4121_v6  ;;  %3499 = vmatmul.msk.bf16.gmra.mxu2 %vm491_vm1, %v841_v53  ;;  %v4563_v4 = vadd.f32 %v1737_v5, %v1424_v51  ;;  %v3923_v5 = vld [vmem:[%s5261_s1 + $0xc0] sm:$0xff] }
 0x11c   : > { %2374 = vmatpush.bf16.msra.mxu2 %v3923_v5  ;;  %v3891_v53 = vld [vmem:[%s4109_s23 + $0x80] sm:$0xff]  ;;  %v1596_v5 = vrot.slane %v1594_v13, 1 }
 0x11d   : > { %v1603_v13 = vshrl.u32 %v3891_v53, 16 }
 0x11e   : > { %3635 = vmatmul.msk.bf16.gmra.mxu0 %vm491_vm1, %v1583_v59  ;;  %v956_v54 = vpop.f32.mrf.mxu2  ;;  %3603 = vmatmul.msk.bf16.gmra.mxu3 %vm491_vm1, %v1233_v30 }
 0x11f   : > { %v1037_v48 = vadd.f32 %v956_v54, %v730_v20 }
 0x120   : > { %v731_v49 = vpop.f32.mrf.mxu1 }
 0x121   : > { %v1425_v35 = vadd.f32 %v1344_v18, %v1037_v48  ;;  %v842_v18 = vrot.slane %v4226_v16, 1  ;;  %v732_v31 = vadd.f32 %v731_v49, %v4471_v7  ;;  %v1354_v27 = vpop.f32.mrf.mxu3  ;;  %v1234_v7 = vrot.slane %v3891_v53, 1 }
 0x122   : > { %v1597_v48 = vshll.u32 %v3890_v39, 16 }
 0x123   : > { %v1742_v6 = vpop.f32.mrf.mxu0  ;;  %v4575_v21 = vadd.f32 %v1740_v29, %v1425_v35  ;;  %v843_v59 = vsel %vm816_vm2, %v840_v47, %v842_v18  ;;  %v3902_v29 = vld [vmem:[%s5261_s1 + $0xa0] sm:$0xff]  ;;  %v1235_v35 = vsel %vm816_vm2, %v1232_v1, %v1234_v7 }
 0x124   : > { %1986 = vmatpush.bf16.msra.mxu1 %v3902_v29  ;;  %v1599_v62 = vrot.slane %v1597_v48, 2  ;;  %v1606_v48 = vshll.u32 %v3891_v53, 16 }
 0x126   : > { %v958_v42 = vpop.f32.mrf.mxu2 }
 0x127   : > { %v1038_v9 = vadd.f32 %v958_v42, %v732_v31  ;;  %v1600_v42 = vor.u32 %v1599_v62, %v1596_v5  ;;  %v4037_v5 = vld [vmem:[%s4109_s23 + $0x78] sm:$0xff] }
 0x128   : > { %v734_v51 = vpop.f32.mrf.mxu1  ;;  %v846_v62 = vrot.slane %v4037_v5, 1 }
 0x129   : > { %v1426_v20 = vadd.f32 %v1346_v44, %v1038_v9  ;;  %v3931_v44 = vld [vmem:[%s5261_s1 + $0x100] sm:$0xff]  ;;  %v735_v47 = vadd.f32 %v734_v51, %v4481_v41  ;;  %v1356_v30 = vpop.f32.mrf.mxu3  ;;  %v844_v41 = vrot.slane %v4277_v61, 1 }
 0x12a   : > { %3033 = vmatpush.bf16.msra.mxu0 %v3931_v44  ;;  %v1601_v44 = vsel %vm1467_vm3, %v1591_v38, %v1600_v42 }
 0x12b   : > { %v1745_v17 = vpop.f32.mrf.mxu0  ;;  %3466 = vmatmul.msk.bf16.gmra.mxu1 %vm491_vm1, %v4180_v43  ;;  %3500 = vmatmul.msk.bf16.gmra.mxu2 %vm491_vm1, %v843_v59  ;;  %v4588_v54 = vadd.f32 %v1742_v6, %v1426_v20  ;;  %v3892_v20 = vld [vmem:[%s4109_s23 + $0x88] sm:$0xff]  ;;  %v845_v1 = vsel %vm816_vm2, %v842_v18, %v844_v41 }
 0x12e   : > { %3636 = vmatmul.msk.bf16.gmra.mxu0 %vm491_vm1, %v1592_v57  ;;  %v961_v49 = vpop.f32.mrf.mxu2  ;;  %3604 = vmatmul.msk.bf16.gmra.mxu3 %vm491_vm1, %v1235_v35 }
 0x12f   : > { %v1039_v43 = vadd.f32 %v961_v49, %v735_v47 }
 0x130   : > { %v736_v6 = vpop.f32.mrf.mxu1 }
 0x131   : > { %v1427_v15 = vadd.f32 %v1349_v56, %v1039_v43  ;;  %v737_v39 = vadd.f32 %v736_v6, %v4499_v2  ;;  %v1359_v9 = vpop.f32.mrf.mxu3  ;;  %v1605_v6 = vrot.slane %v1603_v13, 1  ;;  %v1612_v13 = vshrl.u32 %v3892_v20, 16 }
 0x133   : > { %v1747_v14 = vpop.f32.mrf.mxu0  ;;  %v4597_v31 = vadd.f32 %v1745_v17, %v1427_v15  ;;  %v1236_v17 = vrot.slane %v3892_v20, 1  ;;  %v1608_v15 = vrot.slane %v1606_v48, 2 }
 0x135   : > { %v1237_v38 = vsel %vm816_vm2, %v1234_v7, %v1236_v17  ;;  %v1609_v53 = vor.u32 %v1608_v15, %v1605_v6  ;;  %v847_v7 = vsel %vm816_vm2, %v844_v41, %v846_v62  ;;  %v1615_v41 = vshll.u32 %v3892_v20, 16  ;;  %v4038_v20 = vld [vmem:[%s4109_s23 + $0x80] sm:$0xff] }
 0x136   : > { %v963_v51 = vpop.f32.mrf.mxu2  ;;  %v848_v15 = vrot.slane %v4038_v20, 1 }
 0x137   : > { %v1040_v59 = vadd.f32 %v963_v51, %v737_v39 }
 0x138   : > { %v739_v57 = vpop.f32.mrf.mxu1 }
 0x139   : > { %v1428_v56 = vadd.f32 %v1351_v34, %v1040_v59  ;;  %v740_v2 = vadd.f32 %v739_v57, %v4375_v52  ;;  %v1361_v18 = vpop.f32.mrf.mxu3  ;;  %v3893_v57 = vld [vmem:[%s4109_s23 + $0x90] sm:$0xff] }
 0x13b   : > { %v1750_v29 = vpop.f32.mrf.mxu0  ;;  %3467 = vmatmul.msk.bf16.gmra.mxu1 %vm491_vm1, %v4226_v16  ;;  %3501 = vmatmul.msk.bf16.gmra.mxu2 %vm491_vm1, %v845_v1  ;;  %v4607_v47 = vadd.f32 %v1747_v14, %v1428_v56 }
 0x13e   : > { %3637 = vmatmul.msk.bf16.gmra.mxu0 %vm491_vm1, %v1601_v44  ;;  %v966_v34 = vpop.f32.mrf.mxu2  ;;  %3605 = vmatmul.msk.bf16.gmra.mxu3 %vm491_vm1, %v1237_v38  ;;  %v1610_v44 = vsel %vm1467_vm3, %v1600_v42, %v1609_v53 }
 0x13f   : > { %v1041_v49 = vadd.f32 %v966_v34, %v740_v2 }
 0x140   : > { %v741_v43 = vpop.f32.mrf.mxu1 }
 0x141   : > { %v1429_v16 = vadd.f32 %v1354_v27, %v1041_v49  ;;  %v742_v52 = vadd.f32 %v741_v43, %v4391_v60  ;;  %v1364_v39 = vpop.f32.mrf.mxu3 }
 0x143   : > { %v1752_v35 = vpop.f32.mrf.mxu0  ;;  %v4613_v14 = vadd.f32 %v1750_v29, %v1429_v16  ;;  %v1238_v29 = vrot.slane %v3893_v57, 1  ;;  %v1614_v16 = vrot.slane %v1612_v13, 1 }
 0x145   : > { %v1239_v42 = vsel %vm816_vm2, %v1236_v17, %v1238_v29 }
 0x146   : > { %v968_v51 = vpop.f32.mrf.mxu2 }
 0x147   : > { %v1042_v59 = vadd.f32 %v968_v51, %v742_v52 }
 0x148   : > { %v744_v1 = vpop.f32.mrf.mxu1 }
 0x149   : > { %v1430_v27 = vadd.f32 %v1356_v30, %v1042_v59  ;;  %v745_v2 = vadd.f32 %v744_v1, %v4402_v11  ;;  %v4627_v30 = vpop.f32.mrf.mxu3 }
 0x14b   : > { %v1755_v56 = vpop.f32.mrf.mxu0  ;;  %3468 = vmatmul.msk.bf16.gmra.mxu1 %vm491_vm1, %v4277_v61  ;;  %3502 = vmatmul.msk.bf16.gmra.mxu2 %vm491_vm1, %v847_v7  ;;  %v4623_v60 = vadd.f32 %v1752_v35, %v1430_v27  ;;  %v1103_v61 = vld [vmem:[%s4109_s23 + $0x98] sm:$0x1]  ;;  %v1617_v35 = vrot.slane %v1615_v41, 2  ;;  %v849_v27 = vsel %vm816_vm2, %v846_v62, %v848_v15  ;;  %v2114_v41 = vld [vmem:[%s4109_s23 + $0x10] sm:$0xc]  ;;  %v1621_v62 = vshrl.u32 %v3893_v57, 16 }
 0x14c   : > { %v1185_v6 = vunpack.c.l.b16 %v1103_v61 }
 0x14d   : > { %v1618_v51 = vor.u32 %v1617_v35, %v1614_v16 }
 0x14e   : > { %3638 = vmatmul.msk.bf16.gmra.mxu0 %vm491_vm1, %v1610_v44  ;;  %v971_v48 = vpop.f32.mrf.mxu2  ;;  %3606 = vmatmul.msk.bf16.gmra.mxu3 %vm491_vm1, %v1239_v42 }
 0x14f   : > { %v1043_v34 = vadd.f32 %v971_v48, %v745_v2  ;;  %v1619_v13 = vsel %vm1467_vm3, %v1609_v53, %v1618_v51  ;;  %v2196_v48 = vunpack.c.l.b16 %v2114_v41  ;;  %v1624_v53 = vshll.u32 %v3893_v57, 16  ;;  %v1455_v57 = vld [vmem:[%s4109_s23 + $0x98] sm:$0x3] }
 0x150   : > { %v746_v49 = vpop.f32.mrf.mxu1 }
 0x151   : > { %v1431_v38 = vadd.f32 %v1359_v9, %v1043_v34  ;;  %v747_v52 = vadd.f32 %v746_v49, %v4417_v28  ;;  %v4636_v59 = vpop.f32.mrf.mxu3  ;;  %v1204_v9 = vpack.c.b16 %v1185_v6, %v1185_v6 }
 0x153   : > { %v1757_v43 = vpop.f32.mrf.mxu0  ;;  %v4632_v11 = vadd.f32 %v1755_v56, %v1431_v38  ;;  %v4642_v56 = vld [vmem:[%s4109_s23 + $0x14] sm:$0xf]  ;;  %v1240_v34 = vrot.slane %v1204_v9, 1 }
 0x154   : > { %v5265_v28 = vunpack.c.l.b16 %v4642_v56 }
 0x155   : > { %v1241_v16 = vsel %vm816_vm2, %v1238_v29, %v1240_v34  ;;  %v4039_v29 = vld [vmem:[%s4109_s23 + $0x88] sm:$0xff]  ;;  %v1465_v34 = vunpack.c.l.b16 %v1455_v57 }
 0x156   : > { %v973_v17 = vpop.f32.mrf.mxu2  ;;  %v4655_v38 = vpack.c.b16 %v5265_v28, %v2196_v48 }
 0x157   : > { %v1044_v1 = vadd.f32 %v973_v17, %v747_v52  ;;  %v1623_v17 = vrot.slane %v1621_v62, 1 }
 0x158   : > { %v749_v7 = vpop.f32.mrf.mxu1  ;;  %v2519_v9 = vshll.u32 %v4655_v38, 16 }
 0x159   : > { %v1432_v44 = vadd.f32 %v1361_v18, %v1044_v1  ;;  %v750_v18 = vadd.f32 %v749_v7, %v4428_v8  ;;  %v4651_v49 = vpop.f32.mrf.mxu3  ;;  %v1626_v8 = vrot.slane %v1624_v53, 2  ;;  %v2516_v1 = vshrl.u32 %v4655_v38, 16 }
 0x15b   : > { %v1760_v2 = vpop.f32.mrf.mxu0  ;;  %3469 = vmatmul.msk.bf16.gmra.mxu1 %vm491_vm1, %v4037_v5  ;;  %3503 = vmatmul.msk.bf16.gmra.mxu2 %vm491_vm1, %v849_v27  ;;  %v4647_v42 = vadd.f32 %v1757_v43, %v1432_v44  ;;  %v4659_v43 = vld [vmem:[%s4109_s23 + $0x18] sm:$0xff]  ;;  %v1627_v41 = vor.u32 %v1626_v8, %v1623_v17  ;;  %v2518_v62 = vrot.slane %v2516_v1, 2 }
 0x15c   : > { %v2524_v7 = vshrl.u32 %v4659_v43, 16  ;;  %v2527_v27 = vshll.u32 %v4659_v43, 16 }
 0x15d   : > { %5273 = vst [vmem:[#allocation9_spill] sm:$0xff] %v4647_v42 }
 0x15e   : > { %3639 = vmatmul.msk.bf16.gmra.mxu0 %vm491_vm1, %v1619_v13  ;;  %v976_v61 = vpop.f32.mrf.mxu2  ;;  %3607 = vmatmul.msk.bf16.gmra.mxu3 %vm491_vm1, %v1241_v16  ;;  %v850_v13 = vrot.slane %v4039_v29, 1  ;;  %v2529_v16 = vrot.slane %v2527_v27, 3 }
 0x15f   : > { %v1045_v5 = vadd.f32 %v976_v61, %v750_v18  ;;  %v2521_v61 = vrot.slane %v2519_v9, 3 }
 0x160   : > { %v751_v35 = vpop.f32.mrf.mxu1  ;;  %v851_v42 = vsel %vm816_vm2, %v848_v15, %v850_v13 }
 0x161   : > { %v1433_v6 = vadd.f32 %v1364_v39, %v1045_v5  ;;  %v752_v39 = vadd.f32 %v751_v35, %v4443_v50  ;;  %v4671_v48 = vpop.f32.mrf.mxu3  ;;  %v2526_v5 = vrot.slane %v2524_v7, 2  ;;  %v4676_v50 = vpack.c.b16 %v1465_v34, %v1465_v34 }
 0x162   : > { %v2522_v35 = vor.u32 %v2521_v61, %v2518_v62 }
 0x163   : > { %v1762_v52 = vpop.f32.mrf.mxu0  ;;  %v4667_v44 = vadd.f32 %v1760_v2, %v1433_v6  ;;  %v2530_v17 = vor.u32 %v2529_v16, %v2526_v5 }
 0x165   : > { %5274 = vst [vmem:[#allocation10_spill] sm:$0xff] %v4667_v44  ;;  %v1628_v44 = vsel %vm1467_vm3, %v1618_v51, %v1627_v41  ;;  %v1633_v51 = vshll.u32 %v4676_v50, 16 }
 0x166   : > { %v978_v18 = vpop.f32.mrf.mxu2 }
 0x167   : > { %v1046_v53 = vadd.f32 %v978_v18, %v752_v39  ;;  %v1635_v39 = vrot.slane %v1633_v51, 2  ;;  %v852_v18 = vrot.slane %v4261_v40, 1  ;;  %v2898_v40 = vld [vmem:[%s4109_s23 + $0x10] sm:$0x8] }
 0x168   : > { %v754_v28 = vpop.f32.mrf.mxu1 }
 0x169   : > { %v1434_v2 = vadd.f32 %v4627_v30, %v1046_v53  ;;  %v755_v15 = vadd.f32 %v754_v28, %v4454_v58  ;;  %v1630_v30 = vshrl.u32 %v4676_v50, 16  ;;  %v4686_v57 = vpop.f32.mrf.mxu3 }
 0x16b   : > { %v1765_v6 = vpop.f32.mrf.mxu0  ;;  %3470 = vmatmul.msk.bf16.gmra.mxu1 %vm491_vm1, %v4038_v20  ;;  %3504 = vmatmul.msk.bf16.gmra.mxu2 %vm491_vm1, %v851_v42  ;;  %v4680_v8 = vadd.f32 %v1762_v52, %v1434_v2  ;;  %v2531_v20 = vsel %vm2514_vm4, %v2522_v35, %v2530_v17  ;;  %v4690_v42 = vld [vmem:[%s4109_s23 + $0x20] sm:$0xff] }
 0x16c   : > { %v2533_v58 = vshrl.u32 %v4690_v42, 16  ;;  %v2536_v28 = vshll.u32 %v4690_v42, 16 }
 0x16e   : > { %3640 = vmatmul.msk.bf16.gmra.mxu0 %vm491_vm1, %v1628_v44  ;;  %v981_v1 = vpop.f32.mrf.mxu2  ;;  %v1632_v44 = vrot.slane %v1630_v30, 1  ;;  %3794 = vmatmul.msk.bf16.vlgmr.msra.gmra.mxu3 %vm491_vm1, %v2531_v20  ;;  %v2535_v16 = vrot.slane %v2533_v58, 2  ;;  %v2538_v2 = vrot.slane %v2536_v28, 3  ;;  %v5275_v58 = vunpack.c.l.b16 %v4293_v12 }
 0x16f   : > { %v1047_v9 = vadd.f32 %v981_v1, %v755_v15  ;;  %v853_v15 = vsel %vm816_vm2, %v850_v13, %v852_v18  ;;  %v1851_v1 = vld [vmem:[%s4109_s23 + $0x8] sm:$0xc]  ;;  %v2252_v12 = vrot.slane %v4655_v38, 2 }
 0x170   : > { %v756_v7 = vpop.f32.mrf.mxu1  ;;  %v1636_v53 = vor.u32 %v1635_v39, %v1632_v44  ;;  %v1861_v20 = vunpack.c.l.b16 %v1851_v1  ;;  %v4717_v39 = vld [vmem:[%s4109_s23 + $0x28] sm:$0xff] }
 0x171   : > { %v1435_v52 = vadd.f32 %v4636_v59, %v1047_v9  ;;  %v757_v62 = vadd.f32 %v756_v7, %v4469_v23  ;;  %v4700_v61 = vpop.f32.mrf.mxu3  ;;  %v2539_v23 = vor.u32 %v2538_v2, %v2535_v16  ;;  %v2908_v7 = vunpack.c.l.b16 %v2898_v40  ;;  %v4040_v16 = vld [vmem:[%s4109_s23 + $0x10] sm:$0xff] }
 0x172   : > { %v1865_v2 = vrot.slane %v4040_v16, 2 }
 0x173   : > { %v1767_v27 = vpop.f32.mrf.mxu0  ;;  %v4696_v34 = vadd.f32 %v1765_v6, %v1435_v52  ;;  %v1637_v6 = vsel %vm1467_vm3, %v1627_v41, %v1636_v53  ;;  %v2540_v44 = vsel %vm2514_vm4, %v2530_v17, %v2539_v23  ;;  %v2542_v53 = vshrl.u32 %v4717_v39, 16 }
 0x175   : > { %v2544_v40 = vrot.slane %v2542_v53, 2 }
 0x176   : > { %v983_v59 = vpop.f32.mrf.mxu2 }
 0x177   : > { %v1048_v5 = vadd.f32 %v983_v59, %v757_v62  ;;  %v5276_v62 = vunpack.c.l.b16 %v4642_v56  ;;  %v2545_v59 = vshll.u32 %v4717_v39, 16 }
 0x178   : > { %v759_v35 = vpop.f32.mrf.mxu1 }
 0x179   : > { %v1436_v30 = vadd.f32 %v4651_v49, %v1048_v5  ;;  %v760_v13 = vadd.f32 %v759_v35, %v4478_v37  ;;  %v4713_v49 = vpop.f32.mrf.mxu3  ;;  %v2909_v37 = vpack.c.b16 %v5276_v62, %v2908_v7  ;;  %v2253_v35 = vrot.slane %v4659_v43, 2 }
 0x17b   : > { %v1770_v51 = vpop.f32.mrf.mxu0  ;;  %3471 = vmatmul.msk.bf16.gmra.mxu1 %vm491_vm1, %v4039_v29  ;;  %3505 = vmatmul.msk.bf16.gmra.mxu2 %vm491_vm1, %v853_v15  ;;  %v4709_v9 = vadd.f32 %v1767_v27, %v1436_v30  ;;  %v1862_v27 = vpack.c.b16 %v5275_v58, %v1861_v20  ;;  %v2911_v56 = vrot.slane %v2909_v37, 3  ;;  %v2912_v15 = vrot.slane %v4659_v43, 3 }
 0x17c   : > { %v2254_v38 = vsel %vm1863_vm5, %v2252_v12, %v2253_v35  ;;  %v2255_v12 = vrot.slane %v4690_v42, 2 }
 0x17d   : > { %v1864_v17 = vrot.slane %v1862_v27, 2 }
 0x17e   : > { %3641 = vmatmul.msk.bf16.gmra.mxu0 %vm491_vm1, %v1637_v6  ;;  %v986_v52 = vpop.f32.mrf.mxu2  ;;  %3795 = vmatmul.msk.bf16.gmra.mxu3 %vm491_vm1, %v2540_v44 }
 0x17f   : > { %v1049_v41 = vadd.f32 %v986_v52, %v760_v13  ;;  %v1866_v13 = vsel %vm1863_vm5, %v1864_v17, %v1865_v2 }
 0x180   : > { %v761_v29 = vpop.f32.mrf.mxu1 }
 0x181   : > { %v1437_v28 = vadd.f32 %v4671_v48, %v1049_v41  ;;  %v762_v48 = vadd.f32 %v761_v29, %v4497_v63  ;;  %v1384_v30 = vpop.f32.mrf.mxu3  ;;  %v2913_v63 = vsel %vm2910_vm6, %v2911_v56, %v2912_v15 }
 0x183   : > { %v1772_v18 = vpop.f32.mrf.mxu0  ;;  %v4727_v5 = vadd.f32 %v1770_v51, %v1437_v28  ;;  %v2547_v51 = vrot.slane %v2545_v59, 3  ;;  %v4746_v28 = vld [vmem:[%s4109_s23 + $0x30] sm:$0xff] }
 0x184   : > { %v2554_v59 = vshll.u32 %v4746_v28, 16 }
 0x185   : > { %v2548_v43 = vor.u32 %v2547_v51, %v2544_v40 }
 0x186   : > { %v988_v6 = vpop.f32.mrf.mxu2  ;;  %v2556_v40 = vrot.slane %v2554_v59, 3  ;;  %v2257_v59 = vrot.slane %v4717_v39, 2 }
 0x187   : > { %v1050_v1 = vadd.f32 %v988_v6, %v762_v48  ;;  %v2914_v48 = vrot.slane %v4690_v42, 3 }
 0x188   : > { %v764_v20 = vpop.f32.mrf.mxu1 }
 0x189   : > { %v1438_v7 = vadd.f32 %v4686_v57, %v1050_v1  ;;  %v765_v44 = vadd.f32 %v764_v20, %v4388_v36  ;;  %v1386_v29 = vpop.f32.mrf.mxu3  ;;  %v2549_v57 = vsel %vm2514_vm4, %v2539_v23, %v2548_v43  ;;  %v4041_v36 = vld [vmem:[%s4109_s23 + $0x18] sm:$0xff] }
 0x18a   : > { %v1867_v16 = vrot.slane %v4041_v36, 2 }
 0x18b   : > { %v1775_v52 = vpop.f32.mrf.mxu0  ;;  %3658 = vmatmul.msk.bf16.vlgmr.msra.gmra.mxu1 %vm491_vm1, %v1866_v13  ;;  %3760 = vmatmul.msk.bf16.vlgmr.msra.gmra.mxu2 %vm491_vm1, %v2254_v38  ;;  %v4740_v41 = vadd.f32 %v1772_v18, %v1438_v7  ;;  %v2551_v18 = vshrl.u32 %v4746_v28, 16  ;;  %v2256_v13 = vsel %vm1863_vm5, %v2253_v35, %v2255_v12 }
 0x18c   : > { %v1868_v20 = vsel %vm1863_vm5, %v1865_v2, %v1867_v16 }
 0x18d   : > { %v2553_v1 = vrot.slane %v2551_v18, 2  ;;  %v4042_v18 = vld [vmem:[%s4109_s23 + $0x20] sm:$0xff] }
 0x18e   : > { %3828 = vmatmul.msk.bf16.vlgmr.msra.gmra.mxu0 %vm491_vm1, %v2913_v63  ;;  %v991_v58 = vpop.f32.mrf.mxu2  ;;  %3796 = vmatmul.msk.bf16.gmra.mxu3 %vm491_vm1, %v2549_v57 }
 0x18f   : > { %v1051_v27 = vadd.f32 %v991_v58, %v765_v44  ;;  %v4770_v58 = vld [vmem:[%s4109_s23 + $0x38] sm:$0xff] }
 0x190   : > { %v766_v62 = vpop.f32.mrf.mxu1 }
 0x191   : > { %v1439_v37 = vadd.f32 %v4700_v61, %v1051_v27  ;;  %v767_v23 = vadd.f32 %v766_v62, %v4399_v10  ;;  %v1389_v56 = vpop.f32.mrf.mxu3  ;;  %v2557_v10 = vor.u32 %v2556_v40, %v2553_v1  ;;  %v2560_v62 = vshrl.u32 %v4770_v58, 16 }
 0x193   : > { %v1777_v53 = vpop.f32.mrf.mxu0  ;;  %v4752_v17 = vadd.f32 %v1775_v52, %v1439_v37  ;;  %v2915_v52 = vsel %vm2910_vm6, %v2912_v15, %v2914_v48  ;;  %v2563_v37 = vshll.u32 %v4770_v58, 16 }
 0x195   : > { %v2565_v1 = vrot.slane %v2563_v37, 3  ;;  %v2259_v37 = vrot.slane %v4746_v28, 2 }
 0x196   : > { %v993_v6 = vpop.f32.mrf.mxu2 }
 0x197   : > { %v1052_v61 = vadd.f32 %v993_v6, %v767_v23 }
 0x198   : > { %v769_v51 = vpop.f32.mrf.mxu1 }
 0x199   : > { %v1440_v38 = vadd.f32 %v4713_v49, %v1052_v61  ;;  %v770_v63 = vadd.f32 %v769_v51, %v4414_v25  ;;  %v1391_v2 = vpop.f32.mrf.mxu3  ;;  %v2558_v49 = vsel %vm2514_vm4, %v2548_v43, %v2557_v10  ;;  %v1869_v25 = vrot.slane %v4042_v18, 2 }
 0x19a   : > { %v2916_v43 = vrot.slane %v4717_v39, 3  ;;  %v2562_v61 = vrot.slane %v2560_v62, 2  ;;  %v4043_v62 = vld [vmem:[%s4109_s23 + $0x28] sm:$0xff] }
 0x19b   : > { %v1780_v7 = vpop.f32.mrf.mxu0  ;;  %3659 = vmatmul.msk.bf16.gmra.mxu1 %vm491_vm1, %v1868_v20  ;;  %3761 = vmatmul.msk.bf16.gmra.mxu2 %vm491_vm1, %v2256_v13  ;;  %v4764_v42 = vadd.f32 %v1777_v53, %v1440_v38  ;;  %v1870_v51 = vsel %vm1863_vm5, %v1867_v16, %v1869_v25  ;;  %v2258_v20 = vsel %vm1863_vm5, %v2255_v12, %v2257_v59  ;;  %v4792_v12 = vld [vmem:[%s4109_s23 + $0x40] sm:$0xff] }
 0x19e   : > { %3829 = vmatmul.msk.bf16.gmra.mxu0 %vm491_vm1, %v2915_v52  ;;  %v996_v44 = vpop.f32.mrf.mxu2  ;;  %3797 = vmatmul.msk.bf16.gmra.mxu3 %vm491_vm1, %v2558_v49 }
 0x19f   : > { %v1053_v35 = vadd.f32 %v996_v44, %v770_v63 }
 0x1a0   : > { %v771_v15 = vpop.f32.mrf.mxu1 }
 0x1a1   : > { %v1441_v27 = vadd.f32 %v1384_v30, %v1053_v35  ;;  %v772_v36 = vadd.f32 %v771_v15, %v4425_v22  ;;  %v1394_v23 = vpop.f32.mrf.mxu3  ;;  %v2566_v22 = vor.u32 %v2565_v1, %v2562_v61  ;;  %v2569_v15 = vshrl.u32 %v4792_v12, 16 }
 0x1a3   : > { %v1782_v57 = vpop.f32.mrf.mxu0  ;;  %v4775_v53 = vadd.f32 %v1780_v7, %v1441_v27  ;;  %v2917_v7 = vsel %vm2910_vm6, %v2914_v48, %v2916_v43  ;;  %v2572_v27 = vshll.u32 %v4792_v12, 16 }
 0x1a5   : > { %v2574_v61 = vrot.slane %v2572_v27, 3  ;;  %v2261_v27 = vrot.slane %v4770_v58, 2 }
 0x1a6   : > { %v998_v6 = vpop.f32.mrf.mxu2 }
 0x1a7   : > { %v1054_v30 = vadd.f32 %v998_v6, %v772_v36 }
 0x1a8   : > { %v774_v40 = vpop.f32.mrf.mxu1 }
 0x1a9   : > { %v1442_v13 = vadd.f32 %v1386_v29, %v1054_v30  ;;  %v775_v52 = vadd.f32 %v774_v40, %v4440_v45  ;;  %v1396_v63 = vpop.f32.mrf.mxu3  ;;  %v2567_v29 = vsel %vm2514_vm4, %v2557_v10, %v2566_v22  ;;  %v1871_v45 = vrot.slane %v4043_v62, 2 }
 0x1aa   : > { %v2918_v10 = vrot.slane %v4746_v28, 3  ;;  %v2571_v30 = vrot.slane %v2569_v15, 2  ;;  %v4044_v15 = vld [vmem:[%s4109_s23 + $0x30] sm:$0xff] }
 0x1ab   : > { %v1785_v38 = vpop.f32.mrf.mxu0  ;;  %3660 = vmatmul.msk.bf16.gmra.mxu1 %vm491_vm1, %v1870_v51  ;;  %3762 = vmatmul.msk.bf16.gmra.mxu2 %vm491_vm1, %v2258_v20  ;;  %v4786_v39 = vadd.f32 %v1782_v57, %v1442_v13  ;;  %v1872_v40 = vsel %vm1863_vm5, %v1869_v25, %v1871_v45  ;;  %v2260_v51 = vsel %vm1863_vm5, %v2257_v59, %v2259_v37  ;;  %v4814_v59 = vld [vmem:[%s4109_s23 + $0x48] sm:$0xff] }
 0x1ae   : > { %3830 = vmatmul.msk.bf16.gmra.mxu0 %vm491_vm1, %v2917_v7  ;;  %v1001_v16 = vpop.f32.mrf.mxu2  ;;  %3798 = vmatmul.msk.bf16.gmra.mxu3 %vm491_vm1, %v2567_v29 }
 0x1af   : > { %v1055_v44 = vadd.f32 %v1001_v16, %v775_v52 }
 0x1b0   : > { %v776_v48 = vpop.f32.mrf.mxu1 }
 0x1b1   : > { %v1443_v35 = vadd.f32 %v1389_v56, %v1055_v44  ;;  %v777_v18 = vadd.f32 %v776_v48, %v4451_v46  ;;  %v1399_v36 = vpop.f32.mrf.mxu3  ;;  %v2575_v46 = vor.u32 %v2574_v61, %v2571_v30  ;;  %v2578_v48 = vshrl.u32 %v4814_v59, 16 }
 0x1b3   : > { %v1787_v49 = vpop.f32.mrf.mxu0  ;;  %v4797_v57 = vadd.f32 %v1785_v38, %v1443_v35  ;;  %v2919_v38 = vsel %vm2910_vm6, %v2916_v43, %v2918_v10  ;;  %v2581_v35 = vshll.u32 %v4814_v59, 16 }
 0x1b5   : > { %v2583_v30 = vrot.slane %v2581_v35, 3  ;;  %v2263_v35 = vrot.slane %v4792_v12, 2 }
 0x1b6   : > { %v1003_v6 = vpop.f32.mrf.mxu2 }
 0x1b7   : > { %v1056_v56 = vadd.f32 %v1003_v6, %v777_v18 }
 0x1b8   : > { %v779_v1 = vpop.f32.mrf.mxu1 }
 0x1b9   : > { %v1444_v20 = vadd.f32 %v1391_v2, %v1056_v56  ;;  %v780_v7 = vadd.f32 %v779_v1, %v4466_v19  ;;  %v1401_v52 = vpop.f32.mrf.mxu3  ;;  %v2576_v2 = vsel %vm2514_vm4, %v2566_v22, %v2575_v46  ;;  %v1873_v19 = vrot.slane %v4044_v15, 2  ;;  %v5277_v15 = vld [vmem:[#allocation8_spill] sm:$0xff] }
 0x1ba   : > { %v2920_v22 = vrot.slane %v4770_v58, 3  ;;  %v2580_v56 = vrot.slane %v2578_v48, 2  ;;  %v4045_v48 = vld [vmem:[%s4109_s23 + $0x38] sm:$0xff] }
 0x1bb   : > { %v1790_v13 = vpop.f32.mrf.mxu0  ;;  %3661 = vmatmul.msk.bf16.gmra.mxu1 %vm491_vm1, %v1872_v40  ;;  %3763 = vmatmul.msk.bf16.gmra.mxu2 %vm491_vm1, %v2260_v51  ;;  %v4808_v28 = vadd.f32 %v1787_v49, %v1444_v20  ;;  %v1874_v1 = vsel %vm1863_vm5, %v1871_v45, %v1873_v19  ;;  %v2262_v40 = vsel %vm1863_vm5, %v2259_v37, %v2261_v27  ;;  %v4836_v37 = vld [vmem:[%s4109_s23 + $0x50] sm:$0xff] }
 0x1be   : > { %3831 = vmatmul.msk.bf16.gmra.mxu0 %vm491_vm1, %v2919_v38  ;;  %v1006_v25 = vpop.f32.mrf.mxu2  ;;  %3799 = vmatmul.msk.bf16.gmra.mxu3 %vm491_vm1, %v2576_v2 }
 0x1bf   : > { %v1057_v16 = vadd.f32 %v1006_v25, %v780_v7 }
 0x1c0   : > { %v781_v43 = vpop.f32.mrf.mxu1 }
 0x1c1   : > { %v1445_v44 = vadd.f32 %v1394_v23, %v1057_v16  ;;  %v782_v62 = vadd.f32 %v781_v43, %v4475_v32  ;;  %v1404_v18 = vpop.f32.mrf.mxu3  ;;  %v2584_v32 = vor.u32 %v2583_v30, %v2580_v56  ;;  %v2587_v43 = vshrl.u32 %v4836_v37, 16 }
 0x1c3   : > { %v1792_v29 = vpop.f32.mrf.mxu0  ;;  %v4819_v49 = vadd.f32 %v1790_v13, %v1445_v44  ;;  %v2921_v13 = vsel %vm2910_vm6, %v2918_v10, %v2920_v22  ;;  %v2590_v44 = vshll.u32 %v4836_v37, 16  ;;  %v2589_v56 = vrot.slane %v2587_v43, 2 }
 0x1c5   : > { %v2592_v30 = vrot.slane %v2590_v44, 3 }
 0x1c6   : > { %v1008_v6 = vpop.f32.mrf.mxu2 }
 0x1c7   : > { %v1058_v23 = vadd.f32 %v1008_v6, %v782_v62 }
 0x1c8   : > { %v784_v61 = vpop.f32.mrf.mxu1 }
 0x1c9   : > { %v1446_v51 = vadd.f32 %v1396_v63, %v1058_v23  ;;  %v785_v38 = vadd.f32 %v784_v61, %v4494_v55  ;;  %v1406_v7 = vpop.f32.mrf.mxu3  ;;  %v2585_v63 = vsel %vm2514_vm4, %v2575_v46, %v2584_v32  ;;  %v1875_v55 = vrot.slane %v4045_v48, 2 }
 0x1ca   : > { %v2922_v46 = vrot.slane %v4792_v12, 3  ;;  %v2593_v12 = vor.u32 %v2592_v30, %v2589_v56 }
 0x1cb   : > { %v1795_v20 = vpop.f32.mrf.mxu0  ;;  %3662 = vmatmul.msk.bf16.gmra.mxu1 %vm491_vm1, %v1874_v1  ;;  %3764 = vmatmul.msk.bf16.gmra.mxu2 %vm491_vm1, %v2262_v40  ;;  %v4830_v58 = vadd.f32 %v1792_v29, %v1446_v51  ;;  %v1876_v1 = vsel %vm1863_vm5, %v1873_v19, %v1875_v55  ;;  %v2264_v40 = vsel %vm1863_vm5, %v2261_v27, %v2263_v35  ;;  %v4858_v27 = vld [vmem:[%s4109_s23 + $0x58] sm:$0xff] }
 0x1cc   : > { %v2596_v44 = vshrl.u32 %v4858_v27, 16 }
 0x1ce   : > { %3832 = vmatmul.msk.bf16.gmra.mxu0 %vm491_vm1, %v2921_v13  ;;  %v1011_v45 = vpop.f32.mrf.mxu2  ;;  %3800 = vmatmul.msk.bf16.gmra.mxu3 %vm491_vm1, %v2585_v63  ;;  %v2923_v13 = vsel %vm2910_vm6, %v2920_v22, %v2922_v46 }
 0x1cf   : > { %v1059_v25 = vadd.f32 %v1011_v45, %v785_v38  ;;  %v5278_v45 = vld [vmem:[#allocation2_spill] sm:$0xff] }
 0x1d0   : > { %v786_v10 = vpop.f32.mrf.mxu1 }
 0x1d1   : > { %v1447_v16 = vadd.f32 %v1399_v36, %v1059_v25  ;;  %v787_v62 = vadd.f32 %v786_v10, %v5277_v15  ;;  %v1409_v6 = vpop.f32.mrf.mxu3  ;;  %v4046_v15 = vld [vmem:[%s4109_s23 + $0x40] sm:$0xff] }
 0x1d3   : > { %v1797_v2 = vpop.f32.mrf.mxu0  ;;  %v4841_v29 = vadd.f32 %v1795_v20, %v1447_v16 }
 0x1d6   : > { %v1013_v23 = vpop.f32.mrf.mxu2 }
 0x1d7   : > { %v1060_v36 = vadd.f32 %v1013_v23, %v787_v62  ;;  %v1877_v62 = vrot.slane %v4046_v15, 2  ;;  %v2265_v23 = vrot.slane %v4814_v59, 2 }
 0x1d8   : > { %v789_v61 = vpop.f32.mrf.mxu1 }
 0x1d9   : > { %v1448_v51 = vadd.f32 %v1401_v52, %v1060_v36  ;;  %v790_v25 = vadd.f32 %v789_v61, %v5278_v45  ;;  %v1411_v63 = vpop.f32.mrf.mxu3  ;;  %v2594_v52 = vsel %vm2514_vm4, %v2584_v32, %v2593_v12  ;;  %v5279_v36 = vld [vmem:[#allocation3_spill] sm:$0xff]  ;;  %v2924_v32 = vrot.slane %v4814_v59, 3 }
 0x1db   : > { %v1800_v20 = vpop.f32.mrf.mxu0  ;;  %3663 = vmatmul.msk.bf16.gmra.mxu1 %vm491_vm1, %v1876_v1  ;;  %3765 = vmatmul.msk.bf16.gmra.mxu2 %vm491_vm1, %v2264_v40  ;;  %v4852_v38 = vadd.f32 %v1797_v2, %v1448_v51  ;;  %v2599_v2 = vshll.u32 %v4858_v27, 16  ;;  %v2598_v1 = vrot.slane %v2596_v44, 2 }
 0x1dd   : > { %v2601_v40 = vrot.slane %v2599_v2, 3 }
 0x1de   : > { %3833 = vmatmul.msk.bf16.gmra.mxu0 %vm491_vm1, %v2923_v13  ;;  %v1016_v19 = vpop.f32.mrf.mxu2  ;;  %3801 = vmatmul.msk.bf16.gmra.mxu3 %vm491_vm1, %v2594_v52  ;;  %v1878_v13 = vsel %vm1863_vm5, %v1875_v55, %v1877_v62  ;;  %v5280_v52 = vld [vmem:[#allocation4_spill] sm:$0xff] }
 0x1df   : > { %v1061_v10 = vadd.f32 %v1016_v19, %v790_v25  ;;  %v2925_v19 = vsel %vm2910_vm6, %v2922_v46, %v2924_v32  ;;  %v2602_v59 = vor.u32 %v2601_v40, %v2598_v1  ;;  %v2267_v1 = vrot.slane %v4836_v37, 2  ;;  %v5281_v40 = vld [vmem:[#allocation5_spill] sm:$0xff] }
 0x1e0   : > { %v791_v22 = vpop.f32.mrf.mxu1 }
 0x1e1   : > { %v1449_v16 = vadd.f32 %v1404_v18, %v1061_v10  ;;  %v792_v56 = vadd.f32 %v791_v22, %v5279_v36  ;;  %v1414_v30 = vpop.f32.mrf.mxu3 }
 0x1e3   : > { %v1802_v43 = vpop.f32.mrf.mxu0  ;;  %v4863_v48 = vadd.f32 %v1800_v20, %v1449_v16  ;;  %v2266_v20 = vsel %vm1863_vm5, %v2263_v35, %v2265_v23  ;;  %v4880_v35 = vld [vmem:[%s4109_s23 + $0x60] sm:$0xff] }
 0x1e4   : > { %v2605_v36 = vshrl.u32 %v4880_v35, 16 }
 0x1e6   : > { %v1018_v61 = vpop.f32.mrf.mxu2 }
 0x1e7   : > { %v1062_v18 = vadd.f32 %v1018_v61, %v792_v56  ;;  %v4047_v61 = vld [vmem:[%s4109_s23 + $0x48] sm:$0xff] }
 0x1e8   : > { %v794_v51 = vpop.f32.mrf.mxu1 }
 0x1e9   : > { %v1450_v45 = vadd.f32 %v1406_v7, %v1062_v18  ;;  %v795_v22 = vadd.f32 %v794_v51, %v5280_v52  ;;  %v1416_v16 = vpop.f32.mrf.mxu3  ;;  %v2603_v7 = vsel %vm2514_vm4, %v2593_v12, %v2602_v59  ;;  %v1879_v18 = vrot.slane %v4047_v61, 2  ;;  %v4904_v61 = vld [vmem:[%s4109_s23 + $0x68] sm:$0xff] }
 0x1ea   : > { %v2926_v12 = vrot.slane %v4836_v37, 3 }
 0x1eb   : > { %v1805_v25 = vpop.f32.mrf.mxu0  ;;  %3664 = vmatmul.msk.bf16.gmra.mxu1 %vm491_vm1, %v1878_v13  ;;  %3766 = vmatmul.msk.bf16.gmra.mxu2 %vm491_vm1, %v2266_v20  ;;  %v4874_v10 = vadd.f32 %v1802_v43, %v1450_v45  ;;  %v2608_v43 = vshll.u32 %v4880_v35, 16  ;;  %v2607_v45 = vrot.slane %v2605_v36, 2 }
 0x1ee   : > { %3834 = vmatmul.msk.bf16.gmra.mxu0 %vm491_vm1, %v2925_v19  ;;  %v1021_v55 = vpop.f32.mrf.mxu2  ;;  %3802 = vmatmul.msk.bf16.gmra.mxu3 %vm491_vm1, %v2603_v7  ;;  %v2610_v19 = vrot.slane %v2608_v43, 3  ;;  %v2927_v7 = vsel %vm2910_vm6, %v2924_v32, %v2926_v12 }
 0x1ef   : > { %v1063_v44 = vadd.f32 %v1021_v55, %v795_v22  ;;  %v1880_v22 = vsel %vm1863_vm5, %v1877_v62, %v1879_v18 }
 0x1f0   : > { %v796_v46 = vpop.f32.mrf.mxu1  ;;  %v2611_v37 = vor.u32 %v2610_v19, %v2607_v45  ;;  %v4048_v45 = vld [vmem:[%s4109_s23 + $0x50] sm:$0xff] }
 0x1f1   : > { %v1451_v2 = vadd.f32 %v1409_v6, %v1063_v44  ;;  %v797_v51 = vadd.f32 %v796_v46, %v5281_v40  ;;  %v2772_v13 = vpop.f32.mrf.mxu3  ;;  %v1881_v19 = vrot.slane %v4048_v45, 2 }
 0x1f3   : > { %v1807_v15 = vpop.f32.mrf.mxu0  ;;  %v4885_v56 = vadd.f32 %v1805_v25, %v1451_v2  ;;  %v2268_v25 = vsel %vm1863_vm5, %v2265_v23, %v2267_v1  ;;  %v5282_v2 = vld [vmem:[#allocation6_spill] sm:$0xff] }
 0x1f6   : > { %v1023_v20 = vpop.f32.mrf.mxu2 }
 0x1f7   : > { %v1064_v6 = vadd.f32 %v1023_v20, %v797_v51  ;;  %v2617_v20 = vshll.u32 %v4904_v61, 16 }
 0x1f8   : > { %v799_v52 = vpop.f32.mrf.mxu1 }
 0x1f9   : > { %v1452_v55 = vadd.f32 %v1411_v63, %v1064_v6  ;;  %v800_v36 = vadd.f32 %v799_v52, %v5282_v2  ;;  %v4900_v43 = vpop.f32.mrf.mxu3  ;;  %v2612_v63 = vsel %vm2514_vm4, %v2602_v59, %v2611_v37  ;;  %v2269_v52 = vrot.slane %v4858_v27, 2 }
 0x1fa   : > { %v2928_v59 = vrot.slane %v4858_v27, 3 }
 0x1fb   : > { %v1810_v44 = vpop.f32.mrf.mxu0  ;;  %3665 = vmatmul.msk.bf16.gmra.mxu1 %vm491_vm1, %v1880_v22  ;;  %3767 = vmatmul.msk.bf16.gmra.mxu2 %vm491_vm1, %v2268_v25  ;;  %v4896_v46 = vadd.f32 %v1807_v15, %v1452_v55  ;;  %v2614_v15 = vshrl.u32 %v4904_v61, 16  ;;  %v5283_v22 = vld [vmem:[#allocation7_spill] sm:$0xff] }
 0x1fc   : > { %v2929_v45 = vsel %vm2910_vm6, %v2926_v12, %v2928_v59 }
 0x1fd   : > { %v2616_v2 = vrot.slane %v2614_v15, 2 }
 0x1fe   : > { %3835 = vmatmul.msk.bf16.gmra.mxu0 %vm491_vm1, %v2927_v7  ;;  %v1026_v62 = vpop.f32.mrf.mxu2  ;;  %3803 = vmatmul.msk.bf16.gmra.mxu3 %vm491_vm1, %v2612_v63 }
 0x1ff   : > { %v1065_v23 = vadd.f32 %v1026_v62, %v800_v36  ;;  %v2619_v36 = vrot.slane %v2617_v20, 3 }
 0x200   : > { %v801_v32 = vpop.f32.mrf.mxu1 }
 0x201   : > { %v1453_v40 = vadd.f32 %v1414_v30, %v1065_v23  ;;  %v802_v25 = vadd.f32 %v801_v32, %v5283_v22  ;;  %v4915_v55 = vpop.f32.mrf.mxu3  ;;  %v1882_v23 = vsel %vm1863_vm5, %v1879_v18, %v1881_v19  ;;  %v2620_v27 = vor.u32 %v2619_v36, %v2616_v2  ;;  %v4930_v22 = vld [vmem:[%s4109_s23 + $0x70] sm:$0xff]  ;;  %v4049_v36 = vld [vmem:[%s4109_s23 + $0x58] sm:$0xff] }
 0x202   : > { %v2626_v2 = vshll.u32 %v4930_v22, 16 }
 0x203   : > { %v1812_v51 = vpop.f32.mrf.mxu0  ;;  %v4909_v6 = vadd.f32 %v1810_v44, %v1453_v40  ;;  %v2270_v44 = vsel %vm1863_vm5, %v2267_v1, %v2269_v52 }
 0x206   : > { %v1028_v30 = vpop.f32.mrf.mxu2 }
 0x207   : > { %v1066_v7 = vadd.f32 %v1028_v30, %v802_v25 }
 0x208   : > { %v1988_v62 = vpop.f32.mrf.mxu1 }
 0x209   : > { %v1454_v63 = vadd.f32 %v1416_v16, %v1066_v7  ;;  %v2078_v15 = vadd.f32 %v1988_v62, %v4521_v3  ;;  %v4926_v20 = vpop.f32.mrf.mxu3  ;;  %v2621_v16 = vsel %vm2514_vm4, %v2611_v37, %v2620_v27  ;;  %v2623_v7 = vshrl.u32 %v4930_v22, 16 }
 0x20a   : > { %v1883_v37 = vrot.slane %v4049_v36, 2  ;;  %v2271_v62 = vrot.slane %v4880_v35, 2 }
 0x20b   : > { %v3035_v40 = vpop.f32.mrf.mxu0  ;;  %3666 = vmatmul.msk.bf16.gmra.mxu1 %vm491_vm1, %v1882_v23  ;;  %3768 = vmatmul.msk.bf16.gmra.mxu2 %vm491_vm1, %v2270_v44  ;;  %v4922_v32 = vadd.f32 %v1812_v51, %v1454_v63  ;;  %v4935_v51 = vld [vmem:[%s5262_s2] ss:$0 sm:$0xff]  ;;  %v2930_v44 = vrot.slane %v4880_v35, 3 }
 0x20e   : > { %3836 = vmatmul.msk.bf16.gmra.mxu0 %vm491_vm1, %v2929_v45  ;;  %v2376_v18 = vpop.f32.mrf.mxu2  ;;  %3804 = vmatmul.msk.bf16.gmra.mxu3 %vm491_vm1, %v2621_v16  ;;  %v1884_v16 = vsel %vm1863_vm5, %v1881_v19, %v1883_v37 }
 0x20f   : > { %v2466_v1 = vadd.f32 %v2376_v18, %v2078_v15  ;;  %v2625_v15 = vrot.slane %v2623_v7, 2  ;;  %v2628_v18 = vrot.slane %v2626_v2, 3 }
 0x210   : > { %v1990_v12 = vpop.f32.mrf.mxu1 }
 0x211   : > { %v2862_v25 = vadd.f32 %v2772_v13, %v2466_v1  ;;  %v2079_v13 = vadd.f32 %v1990_v12, %v4531_v26  ;;  %v4945_v63 = vpop.f32.mrf.mxu3  ;;  %v2931_v26 = vsel %vm2910_vm6, %v2928_v59, %v2930_v44  ;;  %v2629_v19 = vor.u32 %v2628_v18, %v2625_v15 }
 0x213   : > { %v3037_v30 = vpop.f32.mrf.mxu0  ;;  %v3125_v3 = vadd.f32 %v3035_v40, %v2862_v25  ;;  %v2272_v25 = vsel %vm1863_vm5, %v2269_v52, %v2271_v62  ;;  %v2630_v2 = vsel %vm2514_vm4, %v2620_v27, %v2629_v19 }
 0x215   : > { %v3165_v23 = vadd.f32 %v4935_v51, %v3125_v3 }
 0x216   : > { %v2378_v45 = vpop.f32.mrf.mxu2 }
 0x217   : > { %3965 = vtanh.f32 %v3165_v23  ;;  %v2467_v40 = vadd.f32 %v2378_v45, %v2079_v13  ;;  %v4968_v23 = vld [vmem:[%s4109_s23 + $0x78] sm:$0xff] }
 0x218   : > { %v1993_v1 = vpop.f32.mrf.mxu1  ;;  %v2635_v18 = vshll.u32 %v4968_v23, 16 }
 0x219   : > { %v2863_v36 = vadd.f32 %v4900_v43, %v2467_v40  ;;  %v2080_v59 = vadd.f32 %v1993_v1, %v4537_v33  ;;  %v4962_v12 = vpop.f32.mrf.mxu3  ;;  %v2632_v33 = vshrl.u32 %v4968_v23, 16  ;;  %v4050_v1 = vld [vmem:[%s4109_s23 + $0x60] sm:$0xff] }
 0x21b   : > { %v3040_v3 = vpop.f32.mrf.mxu0  ;;  %v3126_v35 = vadd.f32 %v3037_v30, %v2863_v36  ;;  %3667 = vmatmul.msk.bf16.gmra.mxu1 %vm491_vm1, %v1884_v16  ;;  %3769 = vmatmul.msk.bf16.gmra.mxu2 %vm491_vm1, %v2272_v25  ;;  %v1885_v16 = vrot.slane %v4050_v1, 2  ;;  %v2273_v25 = vrot.slane %v4904_v61, 2  ;;  %v4998_v1 = vld [vmem:[%s4109_s23 + $0x80] sm:$0xff] }
 0x21d   : > { %v3966_v43 = vpop.eup %3965  ;;  %v3166_v52 = vadd.f32 %v4935_v51, %v3126_v35  ;;  %v2932_v35 = vrot.slane %v4904_v61, 3 }
 0x21e   : > { %3837 = vmatmul.msk.bf16.gmra.mxu0 %vm491_vm1, %v2931_v26  ;;  %3238 = vst.msk [vmem:[%s4955_s22] sm:$0xff] %vm3237_vm7, %v3966_v43  ;;  %v2381_v7 = vpop.f32.mrf.mxu2  ;;  %3805 = vmatmul.msk.bf16.gmra.mxu3 %vm491_vm1, %v2630_v2  ;;  %v2274_v2 = vsel %vm1863_vm5, %v2271_v62, %v2273_v25 }
 0x21f   : > { %3967 = vtanh.f32 %v3166_v52  ;;  %v2468_v30 = vadd.f32 %v2381_v7, %v2080_v59  ;;  %v2634_v52 = vrot.slane %v2632_v33, 2  ;;  %v2637_v59 = vrot.slane %v2635_v18, 3 }
 0x220   : > { %v1995_v13 = vpop.f32.mrf.mxu1  ;;  %v2933_v61 = vsel %vm2910_vm6, %v2930_v44, %v2932_v35 }
 0x221   : > { %v2864_v45 = vadd.f32 %v4915_v55, %v2468_v30  ;;  %v2081_v26 = vadd.f32 %v1995_v13, %v4547_v24  ;;  %v4979_v55 = vpop.f32.mrf.mxu3  ;;  %v1886_v30 = vsel %vm1863_vm5, %v1883_v37, %v1885_v16 }
 0x223   : > { %v3042_v40 = vpop.f32.mrf.mxu0  ;;  %v3127_v15 = vadd.f32 %v3040_v3, %v2864_v45 }
 0x225   : > { %v3968_v36 = vpop.eup %3967  ;;  %v3167_v27 = vadd.f32 %v4935_v51, %v3127_v15  ;;  %v2638_v15 = vor.u32 %v2637_v59, %v2634_v52  ;;  %v4051_v52 = vld [vmem:[%s4109_s23 + $0x68] sm:$0xff] }
 0x226   : > { %3239 = vst.msk [vmem:[%s4955_s22 + $0x8] sm:$0xff] %vm3237_vm7, %v3968_v36  ;;  %v2383_v3 = vpop.f32.mrf.mxu2  ;;  %v1887_v59 = vrot.slane %v4051_v52, 2 }
 0x227   : > { %3969 = vtanh.f32 %v3167_v27  ;;  %v2469_v43 = vadd.f32 %v2383_v3, %v2081_v26 }
 0x228   : > { %v1998_v7 = vpop.f32.mrf.mxu1 }
 0x229   : > { %v2865_v45 = vadd.f32 %v4926_v20, %v2469_v43  ;;  %v2082_v37 = vadd.f32 %v1998_v7, %v4553_v0  ;;  %v4992_v62 = vpop.f32.mrf.mxu3  ;;  %v2641_v0 = vshrl.u32 %v4998_v1, 16  ;;  %v2644_v43 = vshll.u32 %v4998_v1, 16 }
 0x22a   : > { %v2275_v7 = vrot.slane %v4930_v22, 2 }
 0x22b   : > { %v3045_v24 = vpop.f32.mrf.mxu0  ;;  %v3128_v13 = vadd.f32 %v3042_v40, %v2865_v45  ;;  %3668 = vmatmul.msk.bf16.gmra.mxu1 %vm491_vm1, %v1886_v30  ;;  %3770 = vmatmul.msk.bf16.gmra.mxu2 %vm491_vm1, %v2274_v2  ;;  %v2639_v40 = vsel %vm2514_vm4, %v2629_v19, %v2638_v15  ;;  %v2934_v45 = vrot.slane %v4930_v22, 3 }
 0x22d   : > { %v3970_v33 = vpop.eup %3969  ;;  %v3168_v18 = vadd.f32 %v4935_v51, %v3128_v13  ;;  %v2643_v13 = vrot.slane %v2641_v0, 2  ;;  %v2935_v22 = vsel %vm2910_vm6, %v2932_v35, %v2934_v45  ;;  %v5028_v0 = vld [vmem:[%s4109_s23 + $0x88] sm:$0xff] }
 0x22e   : > { %3838 = vmatmul.msk.bf16.gmra.mxu0 %vm491_vm1, %v2933_v61  ;;  %3240 = vst.msk [vmem:[%s4955_s22 + $0x10] sm:$0xff] %vm3237_vm7, %v3970_v33  ;;  %v2386_v20 = vpop.f32.mrf.mxu2  ;;  %3806 = vmatmul.msk.bf16.gmra.mxu3 %vm491_vm1, %v2639_v40  ;;  %v2646_v33 = vrot.slane %v2644_v43, 3 }
 0x22f   : > { %3971 = vtanh.f32 %v3168_v18  ;;  %v2470_v44 = vadd.f32 %v2386_v20, %v2082_v37  ;;  %v1888_v37 = vsel %vm1863_vm5, %v1885_v16, %v1887_v59  ;;  %v2276_v20 = vsel %vm1863_vm5, %v2273_v25, %v2275_v7 }
 0x230   : > { %v2000_v36 = vpop.f32.mrf.mxu1 }
 0x231   : > { %v2866_v27 = vadd.f32 %v4945_v63, %v2470_v44  ;;  %v2083_v2 = vadd.f32 %v2000_v36, %v4563_v4  ;;  %v5009_v63 = vpop.f32.mrf.mxu3  ;;  %v2647_v36 = vor.u32 %v2646_v33, %v2643_v13  ;;  %v2277_v13 = vrot.slane %v4968_v23, 2 }
 0x233   : > { %v3047_v26 = vpop.f32.mrf.mxu0  ;;  %v3129_v3 = vadd.f32 %v3045_v24, %v2866_v27 }
 0x235   : > { %v3972_v30 = vpop.eup %3971  ;;  %v3169_v19 = vadd.f32 %v4935_v51, %v3129_v3 }
 0x236   : > { %3241 = vst.msk [vmem:[%s4955_s22 + $0x18] sm:$0xff] %vm3237_vm7, %v3972_v30  ;;  %v2388_v24 = vpop.f32.mrf.mxu2 }
 0x237   : > { %3973 = vtanh.f32 %v3169_v19  ;;  %v2471_v61 = vadd.f32 %v2388_v24, %v2083_v2  ;;  %v2653_v2 = vshll.u32 %v5028_v0, 16  ;;  %v4052_v24 = vld [vmem:[%s4109_s23 + $0x70] sm:$0xff] }
 0x238   : > { %v2003_v18 = vpop.f32.mrf.mxu1 }
 0x239   : > { %v2867_v44 = vadd.f32 %v4962_v12, %v2471_v61  ;;  %v2084_v16 = vadd.f32 %v2003_v18, %v4575_v21  ;;  %v5022_v25 = vpop.f32.mrf.mxu3  ;;  %v2650_v21 = vshrl.u32 %v5028_v0, 16  ;;  %v1889_v61 = vrot.slane %v4052_v24, 2 }
 0x23b   : > { %v3050_v4 = vpop.f32.mrf.mxu0  ;;  %v3130_v40 = vadd.f32 %v3047_v26, %v2867_v44  ;;  %3669 = vmatmul.msk.bf16.gmra.mxu1 %vm491_vm1, %v1888_v37  ;;  %3771 = vmatmul.msk.bf16.gmra.mxu2 %vm491_vm1, %v2276_v20  ;;  %v2648_v26 = vsel %vm2514_vm4, %v2638_v15, %v2647_v36  ;;  %v2936_v37 = vrot.slane %v4968_v23, 3 }
 0x23d   : > { %v3974_v27 = vpop.eup %3973  ;;  %v3170_v3 = vadd.f32 %v4935_v51, %v3130_v40  ;;  %v2937_v23 = vsel %vm2910_vm6, %v2934_v45, %v2936_v37 }
 0x23e   : > { %3839 = vmatmul.msk.bf16.gmra.mxu0 %vm491_vm1, %v2935_v22  ;;  %3242 = vst.msk [vmem:[%s4955_s22 + $0x20] sm:$0xff] %vm3237_vm7, %v3974_v27  ;;  %v2391_v12 = vpop.f32.mrf.mxu2  ;;  %3807 = vmatmul.msk.bf16.gmra.mxu3 %vm491_vm1, %v2648_v26  ;;  %v2655_v22 = vrot.slane %v2653_v2, 3  ;;  %v1890_v27 = vsel %vm1863_vm5, %v1887_v59, %v1889_v61 }
 0x23f   : > { %3975 = vtanh.f32 %v3170_v3  ;;  %v2472_v35 = vadd.f32 %v2391_v12, %v2084_v16  ;;  %v2278_v3 = vsel %vm1863_vm5, %v2275_v7, %v2277_v13 }
 0x240   : > { %v2005_v43 = vpop.f32.mrf.mxu1 }
 0x241   : > { %v2868_v52 = vadd.f32 %v4979_v55, %v2472_v35  ;;  %v2085_v18 = vadd.f32 %v2005_v43, %v4588_v54  ;;  %v5039_v55 = vpop.f32.mrf.mxu3 }
 0x243   : > { %v3052_v30 = vpop.f32.mrf.mxu0  ;;  %v3131_v19 = vadd.f32 %v3050_v4, %v2868_v52  ;;  %v2652_v4 = vrot.slane %v2650_v21, 2 }
 0x245   : > { %v3976_v33 = vpop.eup %3975  ;;  %v3171_v15 = vadd.f32 %v4935_v51, %v3131_v19  ;;  %v2656_v35 = vor.u32 %v2655_v22, %v2652_v4  ;;  %v2938_v22 = vrot.slane %v4998_v1, 3 }
 0x246   : > { %3243 = vst.msk [vmem:[%s4955_s22 + $0x28] sm:$0xff] %vm3237_vm7, %v3976_v33  ;;  %v2393_v20 = vpop.f32.mrf.mxu2 }
 0x247   : > { %3977 = vtanh.f32 %v3171_v15  ;;  %v2473_v44 = vadd.f32 %v2393_v20, %v2085_v18  ;;  %v2657_v52 = vsel %vm2514_vm4, %v2647_v36, %v2656_v35  ;;  %v4053_v15 = vld [vmem:[%s4109_s23 + $0x78] sm:$0xff]  ;;  %v2279_v20 = vrot.slane %v4998_v1, 2 }
 0x248   : > { %v2008_v40 = vpop.f32.mrf.mxu1  ;;  %v1891_v18 = vrot.slane %v4053_v15, 2  ;;  %v2939_v1 = vsel %vm2910_vm6, %v2936_v37, %v2938_v22  ;;  %v4054_v15 = vld [vmem:[%s4109_s23 + $0x80] sm:$0xff] }
 0x249   : > { %v2869_v16 = vadd.f32 %v4992_v62, %v2473_v44  ;;  %v2086_v59 = vadd.f32 %v2008_v40, %v4597_v31  ;;  %v5052_v7 = vpop.f32.mrf.mxu3 }
 0x24b   : > { %v3055_v54 = vpop.f32.mrf.mxu0  ;;  %v3132_v12 = vadd.f32 %v3052_v30, %v2869_v16  ;;  %3670 = vmatmul.msk.bf16.gmra.mxu1 %vm491_vm1, %v1890_v27  ;;  %3772 = vmatmul.msk.bf16.gmra.mxu2 %vm491_vm1, %v2278_v3  ;;  %v5058_v30 = vld [vmem:[%s4109_s23 + $0x90] sm:$0xff] }
 0x24c   : > { %v2659_v31 = vshrl.u32 %v5058_v30, 16  ;;  %v2662_v33 = vshll.u32 %v5058_v30, 16 }
 0x24d   : > { %v3978_v26 = vpop.eup %3977  ;;  %v3172_v43 = vadd.f32 %v4935_v51, %v3132_v12  ;;  %v2280_v12 = vsel %vm1863_vm5, %v2277_v13, %v2279_v20 }
 0x24e   : > { %3840 = vmatmul.msk.bf16.gmra.mxu0 %vm491_vm1, %v2937_v23  ;;  %3244 = vst.msk [vmem:[%s4955_s22 + $0x30] sm:$0xff] %vm3237_vm7, %v3978_v26  ;;  %v2396_v62 = vpop.f32.mrf.mxu2  ;;  %3808 = vmatmul.msk.bf16.gmra.mxu3 %vm491_vm1, %v2657_v52  ;;  %v2661_v3 = vrot.slane %v2659_v31, 2  ;;  %v2664_v16 = vrot.slane %v2662_v33, 3  ;;  %v1892_v23 = vsel %vm1863_vm5, %v1889_v61, %v1891_v18 }
 0x24f   : > { %3979 = vtanh.f32 %v3172_v43  ;;  %v2474_v45 = vadd.f32 %v2396_v62, %v2086_v59 }
 0x250   : > { %v2010_v19 = vpop.f32.mrf.mxu1  ;;  %v2665_v59 = vor.u32 %v2664_v16, %v2661_v3 }
 0x251   : > { %v2870_v21 = vadd.f32 %v5009_v63, %v2474_v45  ;;  %v2087_v4 = vadd.f32 %v2010_v19, %v4607_v47  ;;  %v5069_v63 = vpop.f32.mrf.mxu3  ;;  %v5088_v19 = vld [vmem:[%s4109_s23 + $0x98] sm:$0xff] }
 0x252   : > { %v2666_v52 = vsel %vm2514_vm4, %v2656_v35, %v2665_v59  ;;  %v2671_v33 = vshll.u32 %v5088_v19, 16 }
 0x253   : > { %v3057_v2 = vpop.f32.mrf.mxu0  ;;  %v3133_v24 = vadd.f32 %v3055_v54, %v2870_v21 }
 0x255   : > { %v3980_v44 = vpop.eup %3979  ;;  %v3173_v36 = vadd.f32 %v4935_v51, %v3133_v24 }
 0x256   : > { %3245 = vst.msk [vmem:[%s4955_s22 + $0x38] sm:$0xff] %vm3237_vm7, %v3980_v44  ;;  %v2398_v40 = vpop.f32.mrf.mxu2  ;;  %v1893_v44 = vrot.slane %v4054_v15, 2  ;;  %v4055_v15 = vld [vmem:[%s4109_s23 + $0x88] sm:$0xff] }
 0x257   : > { %3981 = vtanh.f32 %v3173_v36  ;;  %v2475_v27 = vadd.f32 %v2398_v40, %v2087_v4  ;;  %v2281_v36 = vrot.slane %v5028_v0, 2 }
 0x258   : > { %v2013_v54 = vpop.f32.mrf.mxu1 }
 0x259   : > { %v2871_v26 = vadd.f32 %v5022_v25, %v2475_v27  ;;  %v2088_v61 = vadd.f32 %v2013_v54, %v4613_v14  ;;  %v5082_v13 = vpop.f32.mrf.mxu3  ;;  %v2668_v14 = vshrl.u32 %v5088_v19, 16 }
 0x25b   : > { %v3060_v47 = vpop.f32.mrf.mxu0  ;;  %v3134_v43 = vadd.f32 %v3057_v2, %v2871_v26  ;;  %3671 = vmatmul.msk.bf16.gmra.mxu1 %vm491_vm1, %v1892_v23  ;;  %3773 = vmatmul.msk.bf16.gmra.mxu2 %vm491_vm1, %v2280_v12  ;;  %v2670_v54 = vrot.slane %v2668_v14, 2  ;;  %v2673_v23 = vrot.slane %v2671_v33, 3  ;;  %v1894_v26 = vsel %vm1863_vm5, %v1891_v18, %v1893_v44 }
 0x25d   : > { %v3982_v62 = vpop.eup %3981  ;;  %v3174_v45 = vadd.f32 %v4935_v51, %v3134_v43  ;;  %v2502_v43 = vld [vmem:[%s4109_s23 + $0xa0] sm:$0x7] }
 0x25e   : > { %3841 = vmatmul.msk.bf16.gmra.mxu0 %vm491_vm1, %v2939_v1  ;;  %3246 = vst.msk [vmem:[%s4955_s22 + $0x40] sm:$0xff] %vm3237_vm7, %v3982_v62  ;;  %v2401_v25 = vpop.f32.mrf.mxu2  ;;  %3809 = vmatmul.msk.bf16.gmra.mxu3 %vm491_vm1, %v2666_v52 }
 0x25f   : > { %3983 = vtanh.f32 %v3174_v45  ;;  %v2476_v37 = vadd.f32 %v2401_v25, %v2088_v61  ;;  %v2674_v45 = vor.u32 %v2673_v23, %v2670_v54  ;;  %v2512_v61 = vunpack.c.l.b16 %v2502_v43 }
 0x260   : > { %v2015_v21 = vpop.f32.mrf.mxu1  ;;  %v2942_v54 = vrot.slane %v5058_v30, 3 }
 0x261   : > { %v2872_v2 = vadd.f32 %v5039_v55, %v2476_v37  ;;  %v2089_v40 = vadd.f32 %v2015_v21, %v4623_v60  ;;  %v2940_v55 = vrot.slane %v5028_v0, 3  ;;  %v5099_v27 = vpop.f32.mrf.mxu3  ;;  %v2675_v52 = vsel %vm2514_vm4, %v2665_v59, %v2674_v45 }
 0x262   : > { %v5118_v21 = vpack.c.b16 %v2512_v61, %v2512_v61 }
 0x263   : > { %v3062_v24 = vpop.f32.mrf.mxu0  ;;  %v3135_v31 = vadd.f32 %v3060_v47, %v2872_v2  ;;  %v2282_v47 = vsel %vm1863_vm5, %v2279_v20, %v2281_v36  ;;  %v2941_v0 = vsel %vm2910_vm6, %v2938_v22, %v2940_v55 }
 0x264   : > { %v2680_v33 = vshll.u32 %v5118_v21, 16 }
 0x265   : > { %v3984_v4 = vpop.eup %3983  ;;  %v3175_v35 = vadd.f32 %v4935_v51, %v3135_v31 }
 0x266   : > { %3247 = vst.msk [vmem:[%s4955_s22 + $0x48] sm:$0xff] %vm3237_vm7, %v3984_v4  ;;  %v2403_v3 = vpop.f32.mrf.mxu2  ;;  %v1895_v4 = vrot.slane %v4055_v15, 2 }
 0x267   : > { %3985 = vtanh.f32 %v3175_v35  ;;  %v2477_v16 = vadd.f32 %v2403_v3, %v2089_v40  ;;  %v2283_v35 = vrot.slane %v5058_v30, 2  ;;  %v5284_v3 = vld [vmem:[#allocation9_spill] sm:$0xff]  ;;  %v2943_v30 = vsel %vm2910_vm6, %v2940_v55, %v2942_v54 }
 0x268   : > { %v2018_v12 = vpop.f32.mrf.mxu1 }
 0x269   : > { %v2873_v1 = vadd.f32 %v5052_v7, %v2477_v16  ;;  %v2090_v20 = vadd.f32 %v2018_v12, %v4632_v11  ;;  %v5113_v7 = vpop.f32.mrf.mxu3  ;;  %v2677_v11 = vshrl.u32 %v5118_v21, 16 }
 0x26b   : > { %v3065_v60 = vpop.f32.mrf.mxu0  ;;  %v3136_v62 = vadd.f32 %v3062_v24, %v2873_v1  ;;  %3672 = vmatmul.msk.bf16.gmra.mxu1 %vm491_vm1, %v1894_v26  ;;  %3774 = vmatmul.msk.bf16.gmra.mxu2 %vm491_vm1, %v2282_v47  ;;  %v2679_v26 = vrot.slane %v2677_v11, 2  ;;  %v2682_v47 = vrot.slane %v2680_v33, 3  ;;  %v2285_v33 = vrot.slane %v5088_v19, 2 }
 0x26d   : > { %v3986_v25 = vpop.eup %3985  ;;  %v3176_v18 = vadd.f32 %v4935_v51, %v3136_v62 }
 0x26e   : > { %3842 = vmatmul.msk.bf16.gmra.mxu0 %vm491_vm1, %v2941_v0  ;;  %3248 = vst.msk [vmem:[%s4955_s22 + $0x50] sm:$0xff] %vm3237_vm7, %v3986_v25  ;;  %v2406_v22 = vpop.f32.mrf.mxu2  ;;  %3810 = vmatmul.msk.bf16.gmra.mxu3 %vm491_vm1, %v2675_v52  ;;  %v2284_v0 = vsel %vm1863_vm5, %v2281_v36, %v2283_v35  ;;  %v2683_v25 = vor.u32 %v2682_v47, %v2679_v26 }
 0x26f   : > { %3987 = vtanh.f32 %v3176_v18  ;;  %v2478_v37 = vadd.f32 %v2406_v22, %v2090_v20  ;;  %v2286_v26 = vsel %vm1863_vm5, %v2283_v35, %v2285_v33 }
 0x270   : > { %v2020_v2 = vpop.f32.mrf.mxu1 }
 0x271   : > { %v2874_v24 = vadd.f32 %v5069_v63, %v2478_v37  ;;  %v2091_v16 = vadd.f32 %v2020_v2, %v5284_v3  ;;  %v5129_v63 = vpop.f32.mrf.mxu3  ;;  %v2684_v37 = vsel %vm2514_vm4, %v2674_v45, %v2683_v25  ;;  %v2944_v3 = vrot.slane %v5088_v19, 3 }
 0x273   : > { %v3067_v31 = vpop.f32.mrf.mxu0  ;;  %v3137_v14 = vadd.f32 %v3065_v60, %v2874_v24  ;;  %v1896_v60 = vsel %vm1863_vm5, %v1893_v44, %v1895_v4  ;;  %v5285_v44 = vld [vmem:[#allocation10_spill] sm:$0xff] }
 0x275   : > { %v3988_v40 = vpop.eup %3987  ;;  %v3177_v59 = vadd.f32 %v4935_v51, %v3137_v14  ;;  %v4056_v14 = vld [vmem:[%s4109_s23 + $0x90] sm:$0xff] }
 0x276   : > { %3249 = vst.msk [vmem:[%s4955_s22 + $0x58] sm:$0xff] %vm3237_vm7, %v3988_v40  ;;  %v2408_v23 = vpop.f32.mrf.mxu2  ;;  %v1897_v11 = vrot.slane %v4056_v14, 2 }
 0x277   : > { %3989 = vtanh.f32 %v3177_v59  ;;  %v2479_v12 = vadd.f32 %v2408_v23, %v2091_v16 }
 0x278   : > { %v2023_v1 = vpop.f32.mrf.mxu1 }
 0x279   : > { %v2875_v43 = vadd.f32 %v5082_v13, %v2479_v12  ;;  %v2092_v22 = vadd.f32 %v2023_v1, %v5285_v44  ;;  %v5142_v36 = vpop.f32.mrf.mxu3  ;;  %v1898_v12 = vsel %vm1863_vm5, %v1895_v4, %v1897_v11  ;;  %v1899_v44 = vrot.slane %v4676_v50, 2 }
 0x27b   : > { %v3070_v62 = vpop.f32.mrf.mxu0  ;;  %v3138_v61 = vadd.f32 %v3067_v31, %v2875_v43  ;;  %3673 = vmatmul.msk.bf16.gmra.mxu1 %vm491_vm1, %v1896_v60  ;;  %3775 = vmatmul.msk.bf16.gmra.mxu2 %vm491_vm1, %v2284_v0  ;;  %v2945_v60 = vsel %vm2910_vm6, %v2942_v54, %v2944_v3 }
 0x27d   : > { %v3990_v18 = vpop.eup %3989  ;;  %v3178_v20 = vadd.f32 %v4935_v51, %v3138_v61 }
 0x27e   : > { %3843 = vmatmul.msk.bf16.gmra.mxu0 %vm491_vm1, %v2943_v30  ;;  %3250 = vst.msk [vmem:[%s4955_s22 + $0x60] sm:$0xff] %vm3237_vm7, %v3990_v18  ;;  %v2411_v13 = vpop.f32.mrf.mxu2  ;;  %3811 = vmatmul.msk.bf16.gmra.mxu3 %vm491_vm1, %v2684_v37  ;;  %v2946_v37 = vrot.slane %v5118_v21, 3 }
 0x27f   : > { %3991 = vtanh.f32 %v3178_v20  ;;  %v2480_v55 = vadd.f32 %v2411_v13, %v2092_v22 }
 0x280   : > { %v2025_v52 = vpop.f32.mrf.mxu1 }
 0x281   : > { %v2876_v2 = vadd.f32 %v5099_v27, %v2480_v55  ;;  %v2093_v59 = vadd.f32 %v2025_v52, %v4680_v8  ;;  %v2817_v45 = vpop.f32.mrf.mxu3  ;;  %v2150_v8 = vld [vmem:[%s4109_s23 + $0xa0] sm:$0x3] }
 0x282   : > { %v2232_v19 = vunpack.c.l.b16 %v2150_v8 }
 0x283   : > { %v3072_v24 = vpop.f32.mrf.mxu0  ;;  %v3139_v31 = vadd.f32 %v3070_v62, %v2876_v2 }
 0x284   : > { %v2251_v61 = vpack.c.b16 %v2232_v19, %v2232_v19 }
 0x285   : > { %v3992_v15 = vpop.eup %3991  ;;  %v3179_v40 = vadd.f32 %v4935_v51, %v3139_v31  ;;  %v1900_v31 = vsel %vm1863_vm5, %v1897_v11, %v1899_v44 }
 0x286   : > { %3251 = vst.msk [vmem:[%s4955_s22 + $0x68] sm:$0xff] %vm3237_vm7, %v3992_v15  ;;  %v2413_v27 = vpop.f32.mrf.mxu2  ;;  %v2287_v22 = vrot.slane %v2251_v61, 2 }
 0x287   : > { %3993 = vtanh.f32 %v3179_v40  ;;  %v2481_v16 = vadd.f32 %v2413_v27, %v2093_v59  ;;  %v2947_v40 = vsel %vm2910_vm6, %v2944_v3, %v2946_v37 }
 0x288   : > { %v2028_v23 = vpop.f32.mrf.mxu1  ;;  %v2288_v50 = vsel %vm1863_vm5, %v2285_v33, %v2287_v22 }
 0x289   : > { %v2877_v47 = vadd.f32 %v5113_v7, %v2481_v16  ;;  %v2094_v4 = vadd.f32 %v2028_v23, %v4696_v34  ;;  %v2819_v35 = vpop.f32.mrf.mxu3 }
 0x28b   : > { %v3075_v1 = vpop.f32.mrf.mxu0  ;;  %v3140_v0 = vadd.f32 %v3072_v24, %v2877_v47  ;;  %3674 = vmatmul.msk.bf16.gmra.mxu1 %vm491_vm1, %v1898_v12  ;;  %3776 = vmatmul.msk.bf16.gmra.mxu2 %vm491_vm1, %v2286_v26 }
 0x28d   : > { %v3994_v43 = vpop.eup %3993  ;;  %v3180_v62 = vadd.f32 %v4935_v51, %v3140_v0 }
 0x28e   : > { %3844 = vmatmul.msk.bf16.gmra.mxu0 %vm491_vm1, %v2945_v60  ;;  %3252 = vst.msk [vmem:[%s4955_s22 + $0x70] sm:$0xff] %vm3237_vm7, %v3994_v43  ;;  %v2416_v7 = vpop.f32.mrf.mxu2 }
 0x28f   : > { %3995 = vtanh.f32 %v3180_v62  ;;  %v2482_v54 = vadd.f32 %v2416_v7, %v2094_v4 }
 0x290   : > { %v2030_v30 = vpop.f32.mrf.mxu1 }
 0x291   : > { %v2878_v25 = vadd.f32 %v5129_v63, %v2482_v54  ;;  %v2095_v34 = vadd.f32 %v2030_v30, %v4709_v9  ;;  %v2822_v52 = vpop.f32.mrf.mxu3 }
 0x293   : > { %v3077_v18 = vpop.f32.mrf.mxu0  ;;  %v3141_v20 = vadd.f32 %v3075_v1, %v2878_v25 }
 0x295   : > { %v3996_v13 = vpop.eup %3995  ;;  %v3181_v55 = vadd.f32 %v4935_v51, %v3141_v20 }
 0x296   : > { %3253 = vst.msk [vmem:[%s4955_s22 + $0x78] sm:$0xff] %vm3237_vm7, %v3996_v13  ;;  %v2418_v2 = vpop.f32.mrf.mxu2 }
 0x297   : > { %3997 = vtanh.f32 %v3181_v55  ;;  %v2483_v24 = vadd.f32 %v2418_v2, %v2095_v34 }
 0x298   : > { %v2033_v63 = vpop.f32.mrf.mxu1 }
 0x299   : > { %v2879_v14 = vadd.f32 %v5142_v36, %v2483_v24  ;;  %v2096_v11 = vadd.f32 %v2033_v63, %v4727_v5  ;;  %v2824_v27 = vpop.f32.mrf.mxu3 }
 0x29b   : > { %v3080_v15 = vpop.f32.mrf.mxu0  ;;  %v3142_v9 = vadd.f32 %v3077_v18, %v2879_v14  ;;  %3675 = vmatmul.msk.bf16.gmra.mxu1 %vm491_vm1, %v1900_v31  ;;  %3777 = vmatmul.msk.bf16.gmra.mxu2 %vm491_vm1, %v2288_v50 }
 0x29d   : > { %v3998_v21 = vpop.eup %3997  ;;  %v3182_v59 = vadd.f32 %v4935_v51, %v3142_v9 }
 0x29e   : > { %3845 = vmatmul.msk.bf16.gmra.mxu0 %vm491_vm1, %v2947_v40  ;;  %3254 = vst.msk [vmem:[%s4955_s22 + $0x80] sm:$0xff] %vm3237_vm7, %v3998_v21  ;;  %v2421_v36 = vpop.f32.mrf.mxu2 }
 0x29f   : > { %3999 = vtanh.f32 %v3182_v59  ;;  %v2484_v33 = vadd.f32 %v2421_v36, %v2096_v11 }
 0x2a0   : > { %v2035_v3 = vpop.f32.mrf.mxu1 }
 0x2a1   : > { %v2880_v16 = vadd.f32 %v2817_v45, %v2484_v33  ;;  %v2097_v1 = vadd.f32 %v2035_v3, %v4740_v41  ;;  %v2827_v5 = vpop.f32.mrf.mxu3 }
 0x2a3   : > { %v3082_v23 = vpop.f32.mrf.mxu0  ;;  %v3143_v12 = vadd.f32 %v3080_v15, %v2880_v16 }
 0x2a5   : > { %v4000_v26 = vpop.eup %3999  ;;  %v3183_v47 = vadd.f32 %v4935_v51, %v3143_v12 }
 0x2a6   : > { %3255 = vst.msk [vmem:[%s4955_s22 + $0x88] sm:$0xff] %vm3237_vm7, %v4000_v26  ;;  %v2423_v60 = vpop.f32.mrf.mxu2 }
 0x2a7   : > { %4001 = vtanh.f32 %v3183_v47  ;;  %v2485_v8 = vadd.f32 %v2423_v60, %v2097_v1 }
 0x2a8   : > { %v2038_v0 = vpop.f32.mrf.mxu1 }
 0x2a9   : > { %v2881_v19 = vadd.f32 %v2819_v35, %v2485_v8  ;;  %v2098_v7 = vadd.f32 %v2038_v0, %v4752_v17  ;;  %v2829_v61 = vpop.f32.mrf.mxu3 }
 0x2ab   : > { %v3085_v43 = vpop.f32.mrf.mxu0  ;;  %v3144_v62 = vadd.f32 %v3082_v23, %v2881_v19 }
 0x2ad   : > { %v4002_v45 = vpop.eup %4001  ;;  %v3184_v4 = vadd.f32 %v4935_v51, %v3144_v62 }
 0x2ae   : > { %3256 = vst.msk [vmem:[%s4955_s22 + $0x90] sm:$0xff] %vm3237_vm7, %v4002_v45  ;;  %v2426_v54 = vpop.f32.mrf.mxu2 }
 0x2af   : > { %4003 = vtanh.f32 %v3184_v4  ;;  %v2486_v41 = vadd.f32 %v2426_v54, %v2098_v7 }
 0x2b0   : > { %v2040_v30 = vpop.f32.mrf.mxu1 }
 0x2b1   : > { %v2882_v25 = vadd.f32 %v2822_v52, %v2486_v41  ;;  %v2099_v22 = vadd.f32 %v2040_v30, %v4764_v42  ;;  %v2832_v2 = vpop.f32.mrf.mxu3 }
 0x2b3   : > { %v3087_v18 = vpop.f32.mrf.mxu0  ;;  %v3145_v20 = vadd.f32 %v3085_v43, %v2882_v25 }
 0x2b5   : > { %v4004_v35 = vpop.eup %4003  ;;  %v3185_v44 = vadd.f32 %v4935_v51, %v3145_v20 }
 0x2b6   : > { %3257 = vst.msk [vmem:[%s4955_s22 + $0x98] sm:$0xff] %vm3237_vm7, %v4004_v35  ;;  %v2428_v13 = vpop.f32.mrf.mxu2 }
 0x2b7   : > { %4005 = vtanh.f32 %v3185_v44  ;;  %v2487_v17 = vadd.f32 %v2428_v13, %v2099_v22 }
 0x2b8   : > { %v2043_v55 = vpop.f32.mrf.mxu1 }
 0x2b9   : > { %v2883_v34 = vadd.f32 %v2824_v27, %v2487_v17  ;;  %v2100_v31 = vadd.f32 %v2043_v55, %v4775_v53  ;;  %v2834_v21 = vpop.f32.mrf.mxu3 }
 0x2bb   : > { %v3090_v37 = vpop.f32.mrf.mxu0  ;;  %v3146_v24 = vadd.f32 %v3087_v18, %v2883_v34 }
 0x2bd   : > { %v4006_v52 = vpop.eup %4005  ;;  %v3186_v63 = vadd.f32 %v4935_v51, %v3146_v24 }
 0x2be   : > { %3258 = vst.msk [vmem:[%s4955_s22 + $0xa0] sm:$0xff] %vm3237_vm7, %v4006_v52  ;;  %v2431_v50 = vpop.f32.mrf.mxu2 }
 0x2bf   : > { %4007 = vtanh.f32 %v3186_v63  ;;  %v2488_v42 = vadd.f32 %v2431_v50, %v2100_v31 }
 0x2c0   : > { %v2045_v14 = vpop.f32.mrf.mxu1 }
 0x2c1   : > { %v2884_v15 = vadd.f32 %v2827_v5, %v2488_v42  ;;  %v2101_v27 = vadd.f32 %v2045_v14, %v4786_v39  ;;  %v2837_v60 = vpop.f32.mrf.mxu3 }
 0x2c3   : > { %v3092_v40 = vpop.f32.mrf.mxu0  ;;  %v3147_v9 = vadd.f32 %v3090_v37, %v2884_v15 }
 0x2c5   : > { %v4008_v59 = vpop.eup %4007  ;;  %v3187_v11 = vadd.f32 %v4935_v51, %v3147_v9 }
 0x2c6   : > { %3259 = vst.msk [vmem:[%s4955_s22 + $0xa8] sm:$0xff] %vm3237_vm7, %v4008_v59  ;;  %v2433_v36 = vpop.f32.mrf.mxu2 }
 0x2c7   : > { %4009 = vtanh.f32 %v3187_v11  ;;  %v2489_v53 = vadd.f32 %v2433_v36, %v2101_v27 }
 0x2c8   : > { %v2048_v33 = vpop.f32.mrf.mxu1 }
 0x2c9   : > { %v2885_v3 = vadd.f32 %v2829_v61, %v2489_v53  ;;  %v2102_v47 = vadd.f32 %v2048_v33, %v4797_v57  ;;  %v2839_v54 = vpop.f32.mrf.mxu3 }
 0x2cb   : > { %v3095_v16 = vpop.f32.mrf.mxu0  ;;  %v3148_v23 = vadd.f32 %v3092_v40, %v2885_v3 }
 0x2cd   : > { %v4010_v12 = vpop.eup %4009  ;;  %v3188_v26 = vadd.f32 %v4935_v51, %v3148_v23 }
 0x2ce   : > { %3260 = vst.msk [vmem:[%s4955_s22 + $0xb0] sm:$0xff] %vm3237_vm7, %v4010_v12  ;;  %v2436_v1 = vpop.f32.mrf.mxu2 }
 0x2cf   : > { %4011 = vtanh.f32 %v3188_v26  ;;  %v2490_v39 = vadd.f32 %v2436_v1, %v2102_v47 }
 0x2d0   : > { %v2050_v5 = vpop.f32.mrf.mxu1 }
 0x2d1   : > { %v2886_v8 = vadd.f32 %v2832_v2, %v2490_v39  ;;  %v2103_v45 = vadd.f32 %v2050_v5, %v4808_v28  ;;  %v2842_v17 = vpop.f32.mrf.mxu3 }
 0x2d3   : > { %v3097_v0 = vpop.f32.mrf.mxu0  ;;  %v3149_v19 = vadd.f32 %v3095_v16, %v2886_v8 }
 0x2d5   : > { %v4012_v43 = vpop.eup %4011  ;;  %v3189_v62 = vadd.f32 %v4935_v51, %v3149_v19 }
 0x2d6   : > { %3261 = vst.msk [vmem:[%s4955_s22 + $0xb8] sm:$0xff] %vm3237_vm7, %v4012_v43  ;;  %v2438_v4 = vpop.f32.mrf.mxu2 }
 0x2d7   : > { %4013 = vtanh.f32 %v3189_v62  ;;  %v2491_v57 = vadd.f32 %v2438_v4, %v2103_v45 }
 0x2d8   : > { %v2053_v7 = vpop.f32.mrf.mxu1 }
 0x2d9   : > { %v2887_v41 = vadd.f32 %v2834_v21, %v2491_v57  ;;  %v2104_v20 = vadd.f32 %v2053_v7, %v4819_v49  ;;  %v2844_v42 = vpop.f32.mrf.mxu3 }
 0x2db   : > { %v3100_v30 = vpop.f32.mrf.mxu0  ;;  %v3150_v61 = vadd.f32 %v3097_v0, %v2887_v41 }
 0x2dd   : > { %v4014_v25 = vpop.eup %4013  ;;  %v3190_v18 = vadd.f32 %v4935_v51, %v3150_v61 }
 0x2de   : > { %3262 = vst.msk [vmem:[%s4955_s22 + $0xc0] sm:$0xff] %vm3237_vm7, %v4014_v25  ;;  %v2441_v35 = vpop.f32.mrf.mxu2 }
 0x2df   : > { %4015 = vtanh.f32 %v3190_v18  ;;  %v2492_v28 = vadd.f32 %v2441_v35, %v2104_v20  ;;  %v4057_v20 = vld [vmem:[%s5262_s2] ss:$0 sm:$0xff] }
 0x2e0   : > { %v2055_v44 = vpop.f32.mrf.mxu1 }
 0x2e1   : > { %v2888_v22 = vadd.f32 %v2837_v60, %v2492_v28  ;;  %v2105_v2 = vadd.f32 %v2055_v44, %v4830_v58  ;;  %v2847_v16 = vpop.f32.mrf.mxu3 }
 0x2e3   : > { %v3102_v13 = vpop.f32.mrf.mxu0  ;;  %v3151_v55 = vadd.f32 %v3100_v30, %v2888_v22 }
 0x2e5   : > { %v4016_v34 = vpop.eup %4015  ;;  %v3191_v37 = vadd.f32 %v4935_v51, %v3151_v55 }
 0x2e6   : > { %3263 = vst.msk [vmem:[%s4955_s22 + $0xc8] sm:$0xff] %vm3237_vm7, %v4016_v34  ;;  %v2443_v24 = vpop.f32.mrf.mxu2 }
 0x2e7   : > { %4017 = vtanh.f32 %v3191_v37  ;;  %v2493_v49 = vadd.f32 %v2443_v24, %v2105_v2 }
 0x2e8   : > { %v2058_v52 = vpop.f32.mrf.mxu1 }
 0x2e9   : > { %v2889_v63 = vadd.f32 %v2839_v54, %v2493_v49  ;;  %v2106_v40 = vadd.f32 %v2058_v52, %v4841_v29  ;;  %v2849_v0 = vpop.f32.mrf.mxu3 }
 0x2eb   : > { %v3105_v31 = vpop.f32.mrf.mxu0  ;;  %v3152_v50 = vadd.f32 %v3102_v13, %v2889_v63 }
 0x2ed   : > { %v4018_v14 = vpop.eup %4017  ;;  %v3192_v15 = vadd.f32 %v4935_v51, %v3152_v50 }
 0x2ee   : > { %3264 = vst.msk [vmem:[%s4955_s22 + $0xd0] sm:$0xff] %vm3237_vm7, %v4018_v14  ;;  %v2446_v9 = vpop.f32.mrf.mxu2 }
 0x2ef   : > { %4019 = vtanh.f32 %v3192_v15  ;;  %v2494_v58 = vadd.f32 %v2446_v9, %v2106_v40 }
 0x2f0   : > { %v2060_v21 = vpop.f32.mrf.mxu1 }
 0x2f1   : > { %v2890_v59 = vadd.f32 %v2842_v17, %v2494_v58  ;;  %v2107_v33 = vadd.f32 %v2060_v21, %v4852_v38  ;;  %v2852_v30 = vpop.f32.mrf.mxu3 }
 0x2f3   : > { %v3107_v11 = vpop.f32.mrf.mxu0  ;;  %v3153_v27 = vadd.f32 %v3105_v31, %v2890_v59 }
 0x2f5   : > { %v4020_v36 = vpop.eup %4019  ;;  %v3193_v53 = vadd.f32 %v4935_v51, %v3153_v27 }
 0x2f6   : > { %3265 = vst.msk [vmem:[%s4955_s22 + $0xd8] sm:$0xff] %vm3237_vm7, %v4020_v36  ;;  %v2448_v3 = vpop.f32.mrf.mxu2 }
 0x2f7   : > { %4021 = vtanh.f32 %v3193_v53  ;;  %v2495_v29 = vadd.f32 %v2448_v3, %v2107_v33 }
 0x2f8   : > { %v2063_v23 = vpop.f32.mrf.mxu1 }
 0x2f9   : > { %v2891_v12 = vadd.f32 %v2844_v42, %v2495_v29  ;;  %v2108_v39 = vadd.f32 %v2063_v23, %v4863_v48  ;;  %v2854_v17 = vpop.f32.mrf.mxu3 }
 0x2fb   : > { %v3110_v26 = vpop.f32.mrf.mxu0  ;;  %v3154_v47 = vadd.f32 %v3107_v11, %v2891_v12 }
 0x2fd   : > { %v4022_v1 = vpop.eup %4021  ;;  %v3194_v60 = vadd.f32 %v4935_v51, %v3154_v47 }
 0x2fe   : > { %3266 = vst.msk [vmem:[%s4955_s22 + $0xe0] sm:$0xff] %vm3237_vm7, %v4022_v1  ;;  %v2451_v5 = vpop.f32.mrf.mxu2 }
 0x2ff   : > { %4023 = vtanh.f32 %v3194_v60  ;;  %v2496_v38 = vadd.f32 %v2451_v5, %v2108_v39 }
 0x300   : > { %v2065_v8 = vpop.f32.mrf.mxu1 }
 0x301   : > { %v2892_v19 = vadd.f32 %v2847_v16, %v2496_v38  ;;  %v2109_v57 = vadd.f32 %v2065_v8, %v4874_v10  ;;  %v2857_v14 = vpop.f32.mrf.mxu3 }
 0x303   : > { %v3112_v43 = vpop.f32.mrf.mxu0  ;;  %v3155_v62 = vadd.f32 %v3110_v26, %v2892_v19 }
 0x305   : > { %v4024_v45 = vpop.eup %4023  ;;  %v3195_v4 = vadd.f32 %v4935_v51, %v3155_v62 }
 0x306   : > { %3267 = vst.msk [vmem:[%s4955_s22 + $0xe8] sm:$0xff] %vm3237_vm7, %v4024_v45  ;;  %v2453_v7 = vpop.f32.mrf.mxu2 }
 0x307   : > { %4025 = vtanh.f32 %v3195_v4  ;;  %v2497_v48 = vadd.f32 %v2453_v7, %v2109_v57 }
 0x308   : > { %v2068_v54 = vpop.f32.mrf.mxu1 }
 0x309   : > { %v2893_v41 = vadd.f32 %v2849_v0, %v2497_v48  ;;  %v2110_v51 = vadd.f32 %v2068_v54, %v4885_v56  ;;  %v2859_v53 = vpop.f32.mrf.mxu3 }
 0x30b   : > { %v3156_v61 = vadd.f32 %v3112_v43, %v2893_v41  ;;  %v3115_v25 = vpop.f32.mrf.mxu0 }
 0x30d   : > { %v4026_v18 = vpop.eup %4025  ;;  %v3196_v35 = vadd.f32 %v4057_v20, %v3156_v61 }
 0x30e   : > { %3268 = vst.msk [vmem:[%s4955_s22 + $0xf0] sm:$0xff] %vm3237_vm7, %v4026_v18  ;;  %v2456_v10 = vpop.f32.mrf.mxu2 }
 0x30f   : > { %4027 = vtanh.f32 %v3196_v35  ;;  %v2498_v28 = vadd.f32 %v2456_v10, %v2110_v51 }
 0x310   : > { %v2070_v44 = vpop.f32.mrf.mxu1 }
 0x311   : > { %v2894_v22 = vadd.f32 %v2852_v30, %v2498_v28  ;;  %v2111_v37 = vadd.f32 %v2070_v44, %v4896_v46 }
 0x313   : > { %v3157_v13 = vadd.f32 %v3115_v25, %v2894_v22  ;;  %v3117_v2 = vpop.f32.mrf.mxu0 }
 0x315   : > { %v4028_v55 = vpop.eup %4027  ;;  %v3197_v34 = vadd.f32 %v4057_v20, %v3157_v13 }
 0x316   : > { %3269 = vst.msk [vmem:[%s4955_s22 + $0xf8] sm:$0xff] %vm3237_vm7, %v4028_v55  ;;  %v2458_v24 = vpop.f32.mrf.mxu2 }
 0x317   : > { %4029 = vtanh.f32 %v3197_v34  ;;  %v2499_v56 = vadd.f32 %v2458_v24, %v2111_v37 }
 0x318   : > { %v2073_v49 = vpop.f32.mrf.mxu1 }
 0x319   : > { %v2895_v52 = vadd.f32 %v2854_v17, %v2499_v56  ;;  %v2112_v42 = vadd.f32 %v2073_v49, %v4909_v6 }
 0x31b   : > { %v3158_v63 = vadd.f32 %v3117_v2, %v2895_v52  ;;  %v3120_v40 = vpop.f32.mrf.mxu0 }
 0x31d   : > { %v4030_v31 = vpop.eup %4029  ;;  %v3198_v50 = vadd.f32 %v4057_v20, %v3158_v63 }
 0x31e   : > { %3270 = vst.msk [vmem:[%s4955_s22 + $0x100] sm:$0xff] %vm3237_vm7, %v4030_v31  ;;  %v2461_v15 = vpop.f32.mrf.mxu2 }
 0x31f   : > { %4031 = vtanh.f32 %v3198_v50  ;;  %v2500_v46 = vadd.f32 %v2461_v15, %v2112_v42 }
 0x320   : > { %v2075_v58 = vpop.f32.mrf.mxu1 }
 0x321   : > { %v2896_v9 = vadd.f32 %v2857_v14, %v2500_v46  ;;  %v2113_v27 = vadd.f32 %v2075_v58, %v4922_v32 }
 0x323   : > { %v3159_v21 = vadd.f32 %v3120_v40, %v2896_v9  ;;  %v3122_v3 = vpop.f32.mrf.mxu0 }
 0x325   : > { %v4032_v59 = vpop.eup %4031  ;;  %v3199_v11 = vadd.f32 %v4057_v20, %v3159_v21 }
 0x326   : > { %3271 = vst.msk [vmem:[%s4955_s22 + $0x108] sm:$0xff] %vm3237_vm7, %v4032_v59  ;;  %v2463_v36 = vpop.f32.mrf.mxu2 }
 0x327   : > { %4033 = vtanh.f32 %v3199_v11  ;;  %v2501_v6 = vadd.f32 %v2463_v36, %v2113_v27 }
 0x329   : > { %v2897_v33 = vadd.f32 %v2859_v53, %v2501_v6 }
 0x32b   : > { %v3160_v16 = vadd.f32 %v3122_v3, %v2897_v33 }
 0x32d   : > { %v4034_v29 = vpop.eup %4033  ;;  %v3200_v23 = vadd.f32 %v4057_v20, %v3160_v16 }
 0x32e   : > { %3272 = vst.msk [vmem:[%s4955_s22 + $0x110] sm:$0xff] %vm3237_vm7, %v4034_v29 }
 0x32f   : > { %4035 = vtanh.f32 %v3200_v23 }
 0x335   : > { %v4036_v12 = vpop.eup %4035 }
 0x336   : > { %3273 = vst.msk [vmem:[%s4955_s22 + $0x118] sm:$0xff] %vm3237_vm7, %v4036_v12 }
 0x337 PF: > { %s13_s12 = sadd.s32 1, %s4064_s12  }
 0x338   : > { %p10_p4 = scmp.ge.s32.totalorder %s13_s12, 4  }
 0x33a   :  { %12 = sbr.rel (!%p10_p4) target bundleno = 1 (0x1), region = 62 }

</bundles_post_ra>
